<compile_context>
chip_gen: v5e
topology: v5e:2x2
jax: 0.10.0
libtpu: 0.0.40
codegen_flags: <defaults>
</compile_context>

<pallas_src>
import numpy as np
import jax
import jax.numpy as jnp
from jax.experimental import pallas as pl
from jax.experimental.pallas import tpu as pltpu

EPS = 1e-5
AUX_DIM = 3
CPAD = 128          # lane-dense padding of all conv-stage channel dims
H_LSTM = 128


# ----------------------------- Pallas kernels ------------------------------

def stage1_kernel(xf_ref, p_ref, w_ref, wsum_ref, b_ref,
                  g0_ref, b0_ref, g_ref, bt_ref, o_ref):
    # BatchNorm2d(1) in training mode: stats over the whole (N,1,H,W) input,
    # folded into two scalars applied after the matmul.
    xf = xf_ref[...]                                          # (N, 4096) f32
    mu0 = jnp.mean(xf, keepdims=True)                         # (1, 1)
    var0 = jnp.mean((xf - mu0) ** 2, keepdims=True)           # (1, 1)
    s0 = g0_ref[...] * jax.lax.rsqrt(var0 + EPS)              # (1, 1)
    t0 = b0_ref[...] - mu0 * s0                               # (1, 1)
    # conv1(x) + cat([pool1(x)]*24, 1) -- pool folded into w (bf16 operands).
    pw = jnp.dot(p_ref[...], w_ref[...], preferred_element_type=jnp.float32)
    y = s0 * pw + t0 * wsum_ref[...] + b_ref[...]             # (R, 128) f32
    # BatchNorm2d(24) with batch stats (per padded column) + ReLU.
    mu = jnp.mean(y, axis=0, keepdims=True)
    var = jnp.mean((y - mu) ** 2, axis=0, keepdims=True)
    yn = (y - mu) * jax.lax.rsqrt(var + EPS)
    o_ref[...] = jnp.maximum(yn * g_ref[...] + bt_ref[...],
                             0.0).astype(jnp.bfloat16)


def conv_stage_kernel(p_ref, w_ref, b_ref, g_ref, bt_ref, o_ref):
    # conv_k(x) + cat([pool_k(x)]*r, 1)  ->  BatchNorm (batch stats) + ReLU.
    y = (jnp.dot(p_ref[...], w_ref[...], preferred_element_type=jnp.float32)
         + b_ref[...])                                        # (R, 128) f32
    mu = jnp.mean(y, axis=0, keepdims=True)
    var = jnp.mean((y - mu) ** 2, axis=0, keepdims=True)
    yn = (y - mu) * jax.lax.rsqrt(var + EPS)
    o_ref[...] = jnp.maximum(yn * g_ref[...] + bt_ref[...],
                             0.0).astype(jnp.bfloat16)


def lstm_head_kernel(x_ref, wih_ref, whh_ref, b_ref, wfc2_ref, bfc2_ref,
                     wfc3_ref, bfc3_ref, o_ref, gx_ref):
    # torch.nn.LSTM(192, 128, 1) over seq_len = N, batch = 1, h0 = c0 = 0,
    # followed by relu(fc2(.)) -> fc3, all in one kernel.
    n = x_ref.shape[0]
    H = H_LSTM

    # Hoisted input projection: ONE (N,512)x(512,512) MXU matmul instead of a
    # single-row matmul per serial step.
    gx_ref[...] = (jnp.dot(x_ref[...], wih_ref[...],
                           preferred_element_type=jnp.float32) + b_ref[...])

    def body(t, carry):
        h, c = carry
        gates = gx_ref[pl.ds(t, 1), :] + jnp.dot(
            h.astype(jnp.bfloat16), whh_ref[...],
            preferred_element_type=jnp.float32)               # (1, 512)
        i = jax.nn.sigmoid(gates[:, 0 * H:1 * H])
        f = jax.nn.sigmoid(gates[:, 1 * H:2 * H])
        g = jnp.tanh(gates[:, 2 * H:3 * H])
        o = jax.nn.sigmoid(gates[:, 3 * H:4 * H])
        c = f * c + i * g
        h = o * jnp.tanh(c)
        o_ref[pl.ds(t, 1), :] = h                             # stash h_t
        return (h, c)

    h0 = jnp.zeros((1, H), jnp.float32)
    c0 = jnp.zeros((1, H), jnp.float32)
    jax.lax.fori_loop(0, n, body, (h0, c0))

    # Fused head: relu(fc2(hseq)) -> fc3 (output padded to 128 lanes;
    # column 0 is the value used by forward()).
    hseq = o_ref[...].astype(jnp.bfloat16)                    # (N, 128)
    z = jnp.maximum(
        jnp.dot(hseq, wfc2_ref[...], preferred_element_type=jnp.float32)
        + bfc2_ref[...], 0.0)
    o_ref[...] = (jnp.dot(z.astype(jnp.bfloat16), wfc3_ref[...],
                          preferred_element_type=jnp.float32) + bfc3_ref[...])


# ------------------------------- glue / wrapper -----------------------------

def _pallas_full(kernel, out_shape, *args, scratch_shapes=()):
    # Everything here is tiny -> whole-array VMEM blocks, no grid.
    return pl.pallas_call(
        kernel,
        out_shape=out_shape,
        in_specs=[pl.BlockSpec(memory_space=pltpu.MemorySpace.VMEM)] * len(args),
        out_specs=pl.BlockSpec(memory_space=pltpu.MemorySpace.VMEM),
        scratch_shapes=list(scratch_shapes),
    )(*args)


def im2col_nhwc(x, k, s):
    """x: (N,H,W,C) NHWC -> patches (N*OH*OW, k*k*C); columns ordered (kh,kw,c)."""
    N, H, W, C = x.shape
    OH = (H - k) // s + 1
    OW = (W - k) // s + 1
    cols = []
    for dh in range(k):
        for dw in range(k):
            cols.append(x[:, dh:dh + s * (OH - 1) + 1:s,
                             dw:dw + s * (OW - 1) + 1:s, :])  # (N, OH, OW, C)
    p = jnp.concatenate(cols, axis=-1)                         # (N, OH, OW, k*k*C)
    return p.reshape(N * OH * OW, k * k * C), OH, OW


def conv_weight_nhwc(w, cin_pad, cout_pad):
    """Torch (Cout,Cin,k,k) -> (k*k*cin_pad, cout_pad), rows ordered (kh,kw,c)."""
    cout, cin, k, _ = w.shape
    wp = jnp.transpose(w, (2, 3, 1, 0))                        # (kh, kw, cin, cout)
    wp = jnp.pad(wp, ((0, 0), (0, 0), (0, cin_pad - cin), (0, cout_pad - cout)))
    return wp.reshape(k * k * cin_pad, cout_pad)


def pool_matrix_nhwc(cin, cin_pad, k, cout, cout_pad):
    """Constant so that patches @ Wp == torch.cat([AvgPool(x)] * r, dim=1)."""
    wp = np.zeros((k * k * cin_pad, cout_pad), np.float32)
    inv = 1.0 / (k * k)
    for co in range(cout):
        ci = co % cin
        for kh in range(k):
            for kw in range(k):
                wp[(kh * k + kw) * cin_pad + ci, co] = inv
    return jnp.asarray(wp)


def expand_lstm_input_weight(wih_t, c_real=48, hh=2, ww=2, c_pad=CPAD):
    """Map Wih columns from torch's NCHW .view(-1,192) flatten onto the padded
    NHWC flatten (hh, ww, c_pad) -> hh*ww*c_pad; padded rows are zero."""
    src = np.zeros((hh * ww * c_pad,), np.int32)
    keep = np.zeros((hh * ww * c_pad, 1), np.float32)
    for c in range(c_real):
        for h in range(hh):
            for w in range(ww):
                src[(h * ww + w) * c_pad + c] = (c * hh + h) * ww + w
                keep[(h * ww + w) * c_pad + c, 0] = 1.0
    return wih_t[src, :] * keep                                # (hh*ww*c_pad, 512)


def _pad_row(v, width):
    v = jnp.asarray(v, jnp.float32).reshape(-1)
    return jnp.pad(v, (0, width - v.shape[0])).reshape(1, width)


def init_params(key, aux_dim):
    ks = jax.random.split(key, 14)

    def xavier(k, shape, fan_in, fan_out):
        b = float(np.sqrt(6.0 / (fan_in + fan_out)))
        return jax.random.uniform(k, shape, jnp.float32, -b, b)

    p = {}
    # conv weights (Cout,Cin,kh,kw) -- xavier_uniform, biases ~ PyTorch default.
    p["w1"] = xavier(ks[0], (24, 1, 8, 8), 1 * 64, 24 * 64)
    p["b1"] = jax.random.uniform(ks[1], (24,), jnp.float32, -1 / 8.0, 1 / 8.0)
    p["w2"] = xavier(ks[2], (48, 24, 4, 4), 24 * 16, 48 * 16)
    s2 = float(1.0 / np.sqrt(24 * 16))
    p["b2"] = jax.random.uniform(ks[3], (48,), jnp.float32, -s2, s2)
    p["w3"] = xavier(ks[4], (48, 48, 4, 4), 48 * 16, 48 * 16)
    s3 = float(1.0 / np.sqrt(48 * 16))
    p["b3"] = jax.random.uniform(ks[5], (48,), jnp.float32, -s3, s3)
    # BatchNorm affine params (default init gamma=1, beta=0).
    p["bn0_g"], p["bn0_b"] = jnp.ones((1, 1), jnp.float32), jnp.zeros((1, 1), jnp.float32)
    p["bn1_g"], p["bn1_b"] = jnp.ones((24,), jnp.float32), jnp.zeros((24,), jnp.float32)
    p["bn2_g"], p["bn2_b"] = jnp.ones((48,), jnp.float32), jnp.zeros((48,), jnp.float32)
    p["bn3_g"], p["bn3_b"] = jnp.ones((48,), jnp.float32), jnp.zeros((48,), jnp.float32)
    # LSTM(192,128): gate order [i,f,g,o]; bias is (b_ih + b_hh).
    sl = float(1.0 / np.sqrt(128))
    p["wih"] = jax.random.uniform(ks[6], (512, 192), jnp.float32, -sl, sl)
    p["whh"] = jax.random.uniform(ks[7], (512, 128), jnp.float32, -sl, sl)
    p["blstm"] = (jax.random.uniform(ks[8], (512,), jnp.float32, -sl, sl)
                  + jax.random.uniform(ks[9], (512,), jnp.float32, -sl, sl))
    # fc2 (xavier), fc3 (uniform(-3e-4, 3e-4)).
    p["wfc2"] = xavier(ks[10], (128, 128), 128, 128)
    p["bfc2"] = jax.random.uniform(ks[11], (128,), jnp.float32, -sl, sl)
    p["wfc3"] = jax.random.uniform(ks[12], (1 + aux_dim, 128), jnp.float32, -3e-4, 3e-4)
    p["bfc3"] = jax.random.uniform(ks[13], (1 + aux_dim,), jnp.float32, -sl, sl)
    return p


def prepare_params(params, aux_dim=AUX_DIM):
    """One-time weight preprocessing: pool fold, (kh,kw,c) row permutation,
    zero-padding to 128 lanes, transposes and bf16 casts of matmul operands."""
    prep = {}

    def fused_conv(w, cin, cin_pad, cout, k):
        return (conv_weight_nhwc(w, cin_pad, CPAD)
                + pool_matrix_nhwc(cin, cin_pad, k, cout, CPAD))

    w1 = fused_conv(params["w1"], 1, 1, 24, 8)                  # (64, 128)
    prep["w1"] = w1.astype(jnp.bfloat16)
    prep["w1sum"] = jnp.sum(w1, axis=0, keepdims=True)          # bn0 scalar fold
    prep["b1"] = _pad_row(params["b1"], CPAD)
    prep["bn0_g"], prep["bn0_b"] = params["bn0_g"], params["bn0_b"]
    prep["bn1_g"] = _pad_row(params["bn1_g"], CPAD)
    prep["bn1_b"] = _pad_row(params["bn1_b"], CPAD)

    prep["w2"] = fused_conv(params["w2"], 24, CPAD, 48, 4).astype(jnp.bfloat16)
    prep["b2"] = _pad_row(params["b2"], CPAD)
    prep["bn2_g"] = _pad_row(params["bn2_g"], CPAD)
    prep["bn2_b"] = _pad_row(params["bn2_b"], CPAD)

    prep["w3"] = fused_conv(params["w3"], 48, CPAD, 48, 4).astype(jnp.bfloat16)
    prep["b3"] = _pad_row(params["b3"], CPAD)
    prep["bn3_g"] = _pad_row(params["bn3_g"], CPAD)
    prep["bn3_b"] = _pad_row(params["bn3_b"], CPAD)

    prep["wih"] = expand_lstm_input_weight(params["wih"].T).astype(jnp.bfloat16)
    prep["whh"] = params["whh"].T.astype(jnp.bfloat16)          # (128, 512)
    prep["blstm"] = params["blstm"].reshape(1, 512)

    prep["wfc2"] = params["wfc2"].T.astype(jnp.bfloat16)        # (128, 128)
    prep["bfc2"] = _pad_row(params["bfc2"], CPAD)
    nout = 1 + aux_dim
    prep["wfc3"] = jnp.pad(params["wfc3"].T,
                           ((0, 0), (0, CPAD - nout))).astype(jnp.bfloat16)
    prep["bfc3"] = _pad_row(params["bfc3"], CPAD)
    return prep


@jax.jit
def a2c_value_forward(prep, x):
    """x: (N, 1, 64, 64) float32 NCHW.  Returns model(x)[:, 0] -> (N,)."""
    N = x.shape[0]
    x = x.astype(jnp.float32)
    xf = x.reshape(N, -1)                                       # (N, 4096) for bn0
    xh = x.reshape(N, 64, 64, 1).astype(jnp.bfloat16)           # NHWC (C = 1)

    # stage 1: bn0 -> conv1 + cat([pool1]*24) -> bn1 -> relu (channels -> 128)
    p1, oh1, ow1 = im2col_nhwc(xh, 8, 4)                        # (N*225, 64)
    y1 = _pallas_full(
        stage1_kernel, jax.ShapeDtypeStruct((p1.shape[0], CPAD), jnp.bfloat16),
        xf, p1, prep["w1"], prep["w1sum"], prep["b1"],
        prep["bn0_g"], prep["bn0_b"], prep["bn1_g"], prep["bn1_b"])
    h1 = y1.reshape(N, oh1, ow1, CPAD)                          # NHWC, no transpose

    # stage 2: conv2 + cat([pool2]*2) -> bn2 -> relu
    p2, oh2, ow2 = im2col_nhwc(h1, 4, 2)                        # (N*36, 2048)
    y2 = _pallas_full(
        conv_stage_kernel, jax.ShapeDtypeStruct((p2.shape[0], CPAD), jnp.bfloat16),
        p2, prep["w2"], prep["b2"], prep["bn2_g"], prep["bn2_b"])
    h2 = y2.reshape(N, oh2, ow2, CPAD)

    # stage 3: conv3 + pool3 -> bn3 -> relu
    p3, oh3, ow3 = im2col_nhwc(h2, 4, 2)                        # (N*4, 2048)
    y3 = _pallas_full(
        conv_stage_kernel, jax.ShapeDtypeStruct((p3.shape[0], CPAD), jnp.bfloat16),
        p3, prep["w3"], prep["b3"], prep["bn3_g"], prep["bn3_b"])
    h3 = y3.reshape(N, oh3 * ow3 * CPAD)                        # (N, 512) padded flatten

    # LSTM over the batch dim as a length-N sequence + fused fc2/relu/fc3 head.
    out = _pallas_full(
        lstm_head_kernel, jax.ShapeDtypeStruct((N, CPAD), jnp.float32),
        h3, prep["wih"], prep["whh"], prep["blstm"],
        prep["wfc2"], prep["bfc2"], prep["wfc3"], prep["bfc3"],
        scratch_shapes=(pltpu.VMEM((N, 4 * H_LSTM), jnp.float32),))
    return out[:, 0]


if __name__ == "__main__":
    key = jax.random.PRNGKey(0)
    k_param, k_x = jax.random.split(key)
    params = init_params(k_param, AUX_DIM)
    prep = prepare_params(params, AUX_DIM)
    # The module's transform produces 64x64 grayscale images in [0, 1].
    x = jax.random.uniform(k_x, (2, 1, 64, 64), jnp.float32)
    out = a2c_value_forward(prep, x)
    out = jax.block_until_ready(out)
    assert out.shape == (2,) and out.dtype == jnp.float32
    assert bool(jnp.all(jnp.isfinite(out)))
    print("KERNEL_OK")
</pallas_src>

<mosaic_0001>
module attributes {stable_mosaic.version = 11 : i64} {
  func.func @stage1_kernel(%arg0: memref<2x4096xf32, #tpu.memory_space<vmem>>, %arg1: memref<450x64xbf16, #tpu.memory_space<vmem>>, %arg2: memref<64x128xbf16, #tpu.memory_space<vmem>>, %arg3: memref<1x128xf32, #tpu.memory_space<vmem>>, %arg4: memref<1x128xf32, #tpu.memory_space<vmem>>, %arg5: memref<1x1xf32, #tpu.memory_space<vmem>>, %arg6: memref<1x1xf32, #tpu.memory_space<vmem>>, %arg7: memref<1x128xf32, #tpu.memory_space<vmem>>, %arg8: memref<1x128xf32, #tpu.memory_space<vmem>>, %arg9: memref<450x128xbf16, #tpu.memory_space<vmem>>) attributes {dimension_semantics = [], scalar_prefetch = 0 : i64, scratch_operands = 0 : i64, tpu.core_type = #tpu.core_type<tc>} {
    %c0 = arith.constant 0 : index
    %c0_0 = arith.constant 0 : index
    %0 = vector.load %arg0[%c0, %c0_0] : memref<2x4096xf32, #tpu.memory_space<vmem>>, vector<2x4096xf32>
    %1 = vector.shape_cast %0 : vector<2x4096xf32> to vector<1x2x4096xf32>
    %cst = arith.constant dense<0.000000e+00> : vector<1xf32>
    %2 = vector.multi_reduction <add>, %1, %cst [1, 2] : vector<1x2x4096xf32> to vector<1xf32>
    %3 = vector.shape_cast %2 : vector<1xf32> to vector<1x1x1xf32>
    %4 = vector.extract %3[0, 0, 0] : f32 from vector<1x1x1xf32>
    %5 = vector.broadcast %4 : f32 to vector<1x1xf32>
    %cst_1 = arith.constant 8.192000e+03 : f32
    %6 = vector.broadcast %cst_1 : f32 to vector<1x1xf32>
    %7 = arith.divf %5, %6 : vector<1x1xf32>
    %8 = vector.broadcast %7 : vector<1x1xf32> to vector<2x4096xf32>
    %9 = arith.subf %0, %8 : vector<2x4096xf32>
    %10 = arith.mulf %9, %9 : vector<2x4096xf32>
    %11 = vector.shape_cast %10 : vector<2x4096xf32> to vector<1x2x4096xf32>
    %cst_2 = arith.constant dense<0.000000e+00> : vector<1xf32>
    %12 = vector.multi_reduction <add>, %11, %cst_2 [1, 2] : vector<1x2x4096xf32> to vector<1xf32>
    %13 = vector.shape_cast %12 : vector<1xf32> to vector<1x1x1xf32>
    %14 = vector.extract %13[0, 0, 0] : f32 from vector<1x1x1xf32>
    %15 = vector.broadcast %14 : f32 to vector<1x1xf32>
    %cst_3 = arith.constant 8.192000e+03 : f32
    %16 = vector.broadcast %cst_3 : f32 to vector<1x1xf32>
    %17 = arith.divf %15, %16 : vector<1x1xf32>
    %c0_4 = arith.constant 0 : index
    %c0_5 = arith.constant 0 : index
    %18 = vector.load %arg5[%c0_4, %c0_5] : memref<1x1xf32, #tpu.memory_space<vmem>>, vector<1x1xf32>
    %cst_6 = arith.constant 9.99999974E-6 : f32
    %19 = vector.broadcast %cst_6 : f32 to vector<1x1xf32>
    %20 = arith.addf %17, %19 : vector<1x1xf32>
    %21 = math.rsqrt %20 : vector<1x1xf32>
    %22 = arith.mulf %18, %21 : vector<1x1xf32>
    %c0_7 = arith.constant 0 : index
    %c0_8 = arith.constant 0 : index
    %23 = vector.load %arg6[%c0_7, %c0_8] : memref<1x1xf32, #tpu.memory_space<vmem>>, vector<1x1xf32>
    %24 = arith.mulf %7, %22 : vector<1x1xf32>
    %25 = arith.subf %23, %24 : vector<1x1xf32>
    %c0_9 = arith.constant 0 : index
    %c0_10 = arith.constant 0 : index
    %26 = vector.load %arg1[%c0_9, %c0_10] : memref<450x64xbf16, #tpu.memory_space<vmem>>, vector<450x64xbf16>
    %c0_11 = arith.constant 0 : index
    %c0_12 = arith.constant 0 : index
    %27 = vector.load %arg2[%c0_11, %c0_12] : memref<64x128xbf16, #tpu.memory_space<vmem>>, vector<64x128xbf16>
    %cst_13 = arith.constant dense<0.000000e+00> : vector<450x128xf32>
    %28 = tpu.matmul %26, %27, %cst_13 {dimension_numbers = #tpu.dot_dimension_numbers<[1], [0], [0], [1], [0, 0, 1, 1], [], []>} : vector<450x64xbf16>, vector<64x128xbf16>, vector<450x128xf32> -> vector<450x128xf32>
    %29 = vector.broadcast %22 : vector<1x1xf32> to vector<450x128xf32>
    %30 = arith.mulf %29, %28 : vector<450x128xf32>
    %c0_14 = arith.constant 0 : index
    %c0_15 = arith.constant 0 : index
    %31 = vector.load %arg3[%c0_14, %c0_15] : memref<1x128xf32, #tpu.memory_space<vmem>>, vector<1x128xf32>
    %32 = vector.broadcast %25 : vector<1x1xf32> to vector<1x128xf32>
    %33 = arith.mulf %32, %31 : vector<1x128xf32>
    %34 = vector.broadcast %33 : vector<1x128xf32> to vector<450x128xf32>
    %35 = arith.addf %30, %34 : vector<450x128xf32>
    %c0_16 = arith.constant 0 : index
    %c0_17 = arith.constant 0 : index
    %36 = vector.load %arg4[%c0_16, %c0_17] : memref<1x128xf32, #tpu.memory_space<vmem>>, vector<1x128xf32>
    %37 = vector.broadcast %36 : vector<1x128xf32> to vector<450x128xf32>
    %38 = arith.addf %35, %37 : vector<450x128xf32>
    %cst_18 = arith.constant dense<0.000000e+00> : vector<128xf32>
    %39 = vector.multi_reduction <add>, %38, %cst_18 [0] : vector<450x128xf32> to vector<128xf32>
    %40 = vector.shape_cast %39 : vector<128xf32> to vector<1x128xf32>
    %cst_19 = arith.constant 4.500000e+02 : f32
    %41 = vector.broadcast %cst_19 : f32 to vector<1x128xf32>
    %42 = arith.divf %40, %41 : vector<1x128xf32>
    %43 = vector.broadcast %42 : vector<1x128xf32> to vector<450x128xf32>
    %44 = arith.subf %38, %43 : vector<450x128xf32>
    %45 = arith.mulf %44, %44 : vector<450x128xf32>
    %cst_20 = arith.constant dense<0.000000e+00> : vector<128xf32>
    %46 = vector.multi_reduction <add>, %45, %cst_20 [0] : vector<450x128xf32> to vector<128xf32>
    %47 = vector.shape_cast %46 : vector<128xf32> to vector<1x128xf32>
    %cst_21 = arith.constant 4.500000e+02 : f32
    %48 = vector.broadcast %cst_21 : f32 to vector<1x128xf32>
    %49 = arith.divf %47, %48 : vector<1x128xf32>
    %50 = vector.broadcast %42 : vector<1x128xf32> to vector<450x128xf32>
    %51 = arith.subf %38, %50 : vector<450x128xf32>
    %cst_22 = arith.constant 9.99999974E-6 : f32
    %52 = vector.broadcast %cst_22 : f32 to vector<1x128xf32>
    %53 = arith.addf %49, %52 : vector<1x128xf32>
    %54 = math.rsqrt %53 : vector<1x128xf32>
    %55 = vector.broadcast %54 : vector<1x128xf32> to vector<450x128xf32>
    %56 = arith.mulf %51, %55 : vector<450x128xf32>
    %c0_23 = arith.constant 0 : index
    %c0_24 = arith.constant 0 : index
    %57 = vector.load %arg7[%c0_23, %c0_24] : memref<1x128xf32, #tpu.memory_space<vmem>>, vector<1x128xf32>
    %58 = vector.broadcast %57 : vector<1x128xf32> to vector<450x128xf32>
    %59 = arith.mulf %56, %58 : vector<450x128xf32>
    %c0_25 = arith.constant 0 : index
    %c0_26 = arith.constant 0 : index
    %60 = vector.load %arg8[%c0_25, %c0_26] : memref<1x128xf32, #tpu.memory_space<vmem>>, vector<1x128xf32>
    %61 = vector.broadcast %60 : vector<1x128xf32> to vector<450x128xf32>
    %62 = arith.addf %59, %61 : vector<450x128xf32>
    %cst_27 = arith.constant 0.000000e+00 : f32
    %63 = vector.broadcast %cst_27 : f32 to vector<450x128xf32>
    %64 = arith.maximumf %62, %63 : vector<450x128xf32>
    %65 = arith.truncf %64 : vector<450x128xf32> to vector<450x128xbf16>
    %c0_28 = arith.constant 0 : index
    %c0_29 = arith.constant 0 : index
    %66 = vector.load %arg9[%c0_28, %c0_29] : memref<450x128xbf16, #tpu.memory_space<vmem>>, vector<450x128xbf16>
    tpu.vector_store %arg9[%c0_28, %c0_29], %65 {strides = array<i32>} : memref<450x128xbf16, #tpu.memory_space<vmem>>, vector<450x128xbf16>,
    return
  }
}

module attributes {stable_mosaic.version = 11 : i64} {
  func.func @conv_stage_kernel(%arg0: memref<72x2048xbf16, #tpu.memory_space<vmem>>, %arg1: memref<2048x128xbf16, #tpu.memory_space<vmem>>, %arg2: memref<1x128xf32, #tpu.memory_space<vmem>>, %arg3: memref<1x128xf32, #tpu.memory_space<vmem>>, %arg4: memref<1x128xf32, #tpu.memory_space<vmem>>, %arg5: memref<72x128xbf16, #tpu.memory_space<vmem>>) attributes {dimension_semantics = [], scalar_prefetch = 0 : i64, scratch_operands = 0 : i64, tpu.core_type = #tpu.core_type<tc>} {
    %c0 = arith.constant 0 : index
    %c0_0 = arith.constant 0 : index
    %0 = vector.load %arg0[%c0, %c0_0] : memref<72x2048xbf16, #tpu.memory_space<vmem>>, vector<72x2048xbf16>
    %c0_1 = arith.constant 0 : index
    %c0_2 = arith.constant 0 : index
    %1 = vector.load %arg1[%c0_1, %c0_2] : memref<2048x128xbf16, #tpu.memory_space<vmem>>, vector<2048x128xbf16>
    %cst = arith.constant dense<0.000000e+00> : vector<72x128xf32>
    %2 = tpu.matmul %0, %1, %cst {dimension_numbers = #tpu.dot_dimension_numbers<[1], [0], [0], [1], [0, 0, 1, 1], [], []>} : vector<72x2048xbf16>, vector<2048x128xbf16>, vector<72x128xf32> -> vector<72x128xf32>
    %c0_3 = arith.constant 0 : index
    %c0_4 = arith.constant 0 : index
    %3 = vector.load %arg2[%c0_3, %c0_4] : memref<1x128xf32, #tpu.memory_space<vmem>>, vector<1x128xf32>
    %4 = vector.broadcast %3 : vector<1x128xf32> to vector<72x128xf32>
    %5 = arith.addf %2, %4 : vector<72x128xf32>
    %cst_5 = arith.constant dense<0.000000e+00> : vector<128xf32>
    %6 = vector.multi_reduction <add>, %5, %cst_5 [0] : vector<72x128xf32> to vector<128xf32>
    %7 = vector.shape_cast %6 : vector<128xf32> to vector<1x128xf32>
    %cst_6 = arith.constant 7.200000e+01 : f32
    %8 = vector.broadcast %cst_6 : f32 to vector<1x128xf32>
    %9 = arith.divf %7, %8 : vector<1x128xf32>
    %10 = vector.broadcast %9 : vector<1x128xf32> to vector<72x128xf32>
    %11 = arith.subf %5, %10 : vector<72x128xf32>
    %12 = arith.mulf %11, %11 : vector<72x128xf32>
    %cst_7 = arith.constant dense<0.000000e+00> : vector<128xf32>
    %13 = vector.multi_reduction <add>, %12, %cst_7 [0] : vector<72x128xf32> to vector<128xf32>
    %14 = vector.shape_cast %13 : vector<128xf32> to vector<1x128xf32>
    %cst_8 = arith.constant 7.200000e+01 : f32
    %15 = vector.broadcast %cst_8 : f32 to vector<1x128xf32>
    %16 = arith.divf %14, %15 : vector<1x128xf32>
    %17 = vector.broadcast %9 : vector<1x128xf32> to vector<72x128xf32>
    %18 = arith.subf %5, %17 : vector<72x128xf32>
    %cst_9 = arith.constant 9.99999974E-6 : f32
    %19 = vector.broadcast %cst_9 : f32 to vector<1x128xf32>
    %20 = arith.addf %16, %19 : vector<1x128xf32>
    %21 = math.rsqrt %20 : vector<1x128xf32>
    %22 = vector.broadcast %21 : vector<1x128xf32> to vector<72x128xf32>
    %23 = arith.mulf %18, %22 : vector<72x128xf32>
    %c0_10 = arith.constant 0 : index
    %c0_11 = arith.constant 0 : index
    %24 = vector.load %arg3[%c0_10, %c0_11] : memref<1x128xf32, #tpu.memory_space<vmem>>, vector<1x128xf32>
    %25 = vector.broadcast %24 : vector<1x128xf32> to vector<72x128xf32>
    %26 = arith.mulf %23, %25 : vector<72x128xf32>
    %c0_12 = arith.constant 0 : index
    %c0_13 = arith.constant 0 : index
    %27 = vector.load %arg4[%c0_12, %c0_13] : memref<1x128xf32, #tpu.memory_space<vmem>>, vector<1x128xf32>
    %28 = vector.broadcast %27 : vector<1x128xf32> to vector<72x128xf32>
    %29 = arith.addf %26, %28 : vector<72x128xf32>
    %cst_14 = arith.constant 0.000000e+00 : f32
    %30 = vector.broadcast %cst_14 : f32 to vector<72x128xf32>
    %31 = arith.maximumf %29, %30 : vector<72x128xf32>
    %32 = arith.truncf %31 : vector<72x128xf32> to vector<72x128xbf16>
    %c0_15 = arith.constant 0 : index
    %c0_16 = arith.constant 0 : index
    %33 = vector.load %arg5[%c0_15, %c0_16] : memref<72x128xbf16, #tpu.memory_space<vmem>>, vector<72x128xbf16>
    tpu.vector_store %arg5[%c0_15, %c0_16], %32 {strides = array<i32>} : memref<72x128xbf16, #tpu.memory_space<vmem>>, vector<72x128xbf16>,
    return
  }
}

module attributes {stable_mosaic.version = 11 : i64} {
  func.func @conv_stage_kernel(%arg0: memref<8x2048xbf16, #tpu.memory_space<vmem>>, %arg1: memref<2048x128xbf16, #tpu.memory_space<vmem>>, %arg2: memref<1x128xf32, #tpu.memory_space<vmem>>, %arg3: memref<1x128xf32, #tpu.memory_space<vmem>>, %arg4: memref<1x128xf32, #tpu.memory_space<vmem>>, %arg5: memref<8x128xbf16, #tpu.memory_space<vmem>>) attributes {dimension_semantics = [], scalar_prefetch = 0 : i64, scratch_operands = 0 : i64, tpu.core_type = #tpu.core_type<tc>} {
    %c0 = arith.constant 0 : index
    %c0_0 = arith.constant 0 : index
    %0 = vector.load %arg0[%c0, %c0_0] : memref<8x2048xbf16, #tpu.memory_space<vmem>>, vector<8x2048xbf16>
    %c0_1 = arith.constant 0 : index
    %c0_2 = arith.constant 0 : index
    %1 = vector.load %arg1[%c0_1, %c0_2] : memref<2048x128xbf16, #tpu.memory_space<vmem>>, vector<2048x128xbf16>
    %cst = arith.constant dense<0.000000e+00> : vector<8x128xf32>
    %2 = tpu.matmul %0, %1, %cst {dimension_numbers = #tpu.dot_dimension_numbers<[1], [0], [0], [1], [0, 0, 1, 1], [], []>} : vector<8x2048xbf16>, vector<2048x128xbf16>, vector<8x128xf32> -> vector<8x128xf32>
    %c0_3 = arith.constant 0 : index
    %c0_4 = arith.constant 0 : index
    %3 = vector.load %arg2[%c0_3, %c0_4] : memref<1x128xf32, #tpu.memory_space<vmem>>, vector<1x128xf32>
    %4 = vector.broadcast %3 : vector<1x128xf32> to vector<8x128xf32>
    %5 = arith.addf %2, %4 : vector<8x128xf32>
    %cst_5 = arith.constant dense<0.000000e+00> : vector<128xf32>
    %6 = vector.multi_reduction <add>, %5, %cst_5 [0] : vector<8x128xf32> to vector<128xf32>
    %7 = vector.shape_cast %6 : vector<128xf32> to vector<1x128xf32>
    %cst_6 = arith.constant 8.000000e+00 : f32
    %8 = vector.broadcast %cst_6 : f32 to vector<1x128xf32>
    %9 = arith.divf %7, %8 : vector<1x128xf32>
    %10 = vector.broadcast %9 : vector<1x128xf32> to vector<8x128xf32>
    %11 = arith.subf %5, %10 : vector<8x128xf32>
    %12 = arith.mulf %11, %11 : vector<8x128xf32>
    %cst_7 = arith.constant dense<0.000000e+00> : vector<128xf32>
    %13 = vector.multi_reduction <add>, %12, %cst_7 [0] : vector<8x128xf32> to vector<128xf32>
    %14 = vector.shape_cast %13 : vector<128xf32> to vector<1x128xf32>
    %cst_8 = arith.constant 8.000000e+00 : f32
    %15 = vector.broadcast %cst_8 : f32 to vector<1x128xf32>
    %16 = arith.divf %14, %15 : vector<1x128xf32>
    %17 = vector.broadcast %9 : vector<1x128xf32> to vector<8x128xf32>
    %18 = arith.subf %5, %17 : vector<8x128xf32>
    %cst_9 = arith.constant 9.99999974E-6 : f32
    %19 = vector.broadcast %cst_9 : f32 to vector<1x128xf32>
    %20 = arith.addf %16, %19 : vector<1x128xf32>
    %21 = math.rsqrt %20 : vector<1x128xf32>
    %22 = vector.broadcast %21 : vector<1x128xf32> to vector<8x128xf32>
    %23 = arith.mulf %18, %22 : vector<8x128xf32>
    %c0_10 = arith.constant 0 : index
    %c0_11 = arith.constant 0 : index
    %24 = vector.load %arg3[%c0_10, %c0_11] : memref<1x128xf32, #tpu.memory_space<vmem>>, vector<1x128xf32>
    %25 = vector.broadcast %24 : vector<1x128xf32> to vector<8x128xf32>
    %26 = arith.mulf %23, %25 : vector<8x128xf32>
    %c0_12 = arith.constant 0 : index
    %c0_13 = arith.constant 0 : index
    %27 = vector.load %arg4[%c0_12, %c0_13] : memref<1x128xf32, #tpu.memory_space<vmem>>, vector<1x128xf32>
    %28 = vector.broadcast %27 : vector<1x128xf32> to vector<8x128xf32>
    %29 = arith.addf %26, %28 : vector<8x128xf32>
    %cst_14 = arith.constant 0.000000e+00 : f32
    %30 = vector.broadcast %cst_14 : f32 to vector<8x128xf32>
    %31 = arith.maximumf %29, %30 : vector<8x128xf32>
    %32 = arith.truncf %31 : vector<8x128xf32> to vector<8x128xbf16>
    %c0_15 = arith.constant 0 : index
    %c0_16 = arith.constant 0 : index
    %33 = vector.load %arg5[%c0_15, %c0_16] : memref<8x128xbf16, #tpu.memory_space<vmem>>, vector<8x128xbf16>
    tpu.vector_store %arg5[%c0_15, %c0_16], %32 {strides = array<i32>} : memref<8x128xbf16, #tpu.memory_space<vmem>>, vector<8x128xbf16>,
    return
  }
}

module attributes {stable_mosaic.version = 11 : i64} {
  func.func @lstm_head_kernel(%arg0: memref<2x512xbf16, #tpu.memory_space<vmem>>, %arg1: memref<512x512xbf16, #tpu.memory_space<vmem>>, %arg2: memref<128x512xbf16, #tpu.memory_space<vmem>>, %arg3: memref<1x512xf32, #tpu.memory_space<vmem>>, %arg4: memref<128x128xbf16, #tpu.memory_space<vmem>>, %arg5: memref<1x128xf32, #tpu.memory_space<vmem>>, %arg6: memref<128x128xbf16, #tpu.memory_space<vmem>>, %arg7: memref<1x128xf32, #tpu.memory_space<vmem>>, %arg8: memref<2x128xf32, #tpu.memory_space<vmem>>, %arg9: memref<2x512xf32, #tpu.memory_space<vmem>>) attributes {dimension_semantics = [], scalar_prefetch = 0 : i64, scratch_operands = 1 : i64, tpu.core_type = #tpu.core_type<tc>} {
    %c0 = arith.constant 0 : index
    %c0_0 = arith.constant 0 : index
    %0 = vector.load %arg0[%c0, %c0_0] : memref<2x512xbf16, #tpu.memory_space<vmem>>, vector<2x512xbf16>
    %c0_1 = arith.constant 0 : index
    %c0_2 = arith.constant 0 : index
    %1 = vector.load %arg1[%c0_1, %c0_2] : memref<512x512xbf16, #tpu.memory_space<vmem>>, vector<512x512xbf16>
    %cst = arith.constant dense<0.000000e+00> : vector<2x512xf32>
    %2 = tpu.matmul %0, %1, %cst {dimension_numbers = #tpu.dot_dimension_numbers<[1], [0], [0], [1], [0, 0, 1, 1], [], []>} : vector<2x512xbf16>, vector<512x512xbf16>, vector<2x512xf32> -> vector<2x512xf32>
    %c0_3 = arith.constant 0 : index
    %c0_4 = arith.constant 0 : index
    %3 = vector.load %arg3[%c0_3, %c0_4] : memref<1x512xf32, #tpu.memory_space<vmem>>, vector<1x512xf32>
    %4 = vector.broadcast %3 : vector<1x512xf32> to vector<2x512xf32>
    %5 = arith.addf %2, %4 : vector<2x512xf32>
    %c0_5 = arith.constant 0 : index
    %c0_6 = arith.constant 0 : index
    %6 = vector.load %arg9[%c0_5, %c0_6] : memref<2x512xf32, #tpu.memory_space<vmem>>, vector<2x512xf32>
    tpu.vector_store %arg9[%c0_5, %c0_6], %5 {strides = array<i32>} : memref<2x512xf32, #tpu.memory_space<vmem>>, vector<2x512xf32>,
    %cst_7 = arith.constant 0.000000e+00 : f32
    %7 = vector.broadcast %cst_7 : f32 to vector<1x128xf32>
    %cst_8 = arith.constant 0.000000e+00 : f32
    %8 = vector.broadcast %cst_8 : f32 to vector<1x128xf32>
    %c0_i32 = arith.constant 0 : i32
    %c2_i32 = arith.constant 2 : i32
    %9 = arith.addi %c0_i32, %c2_i32 : i32
    %c1_i32 = arith.constant 1 : i32
    %10:2 = scf.for %arg10 = %c0_i32 to %9 step %c1_i32 iter_args(%arg11 = %7, %arg12 = %8) -> (vector<1x128xf32>, vector<1x128xf32>)  : i32 {
      %27 = arith.index_cast %arg10 : i32 to index
      %c0_25 = arith.constant 0 : index
      %28 = vector.load %arg9[%27, %c0_25] : memref<2x512xf32, #tpu.memory_space<vmem>>, vector<1x512xf32>
      %29 = arith.truncf %arg11 : vector<1x128xf32> to vector<1x128xbf16>
      %c0_26 = arith.constant 0 : index
      %c0_27 = arith.constant 0 : index
      %30 = vector.load %arg2[%c0_26, %c0_27] : memref<128x512xbf16, #tpu.memory_space<vmem>>, vector<128x512xbf16>
      %cst_28 = arith.constant dense<0.000000e+00> : vector<1x512xf32>
      %31 = tpu.matmul %29, %30, %cst_28 {dimension_numbers = #tpu.dot_dimension_numbers<[1], [0], [0], [1], [0, 0, 1, 1], [], []>} : vector<1x128xbf16>, vector<128x512xbf16>, vector<1x512xf32> -> vector<1x512xf32>
      %32 = arith.addf %28, %31 : vector<1x512xf32>
      %33 = vector.extract_strided_slice %32 {offsets = [0, 0], sizes = [1, 128], strides = [1, 1]} : vector<1x512xf32> to vector<1x128xf32>
      %34 = arith.negf %33 : vector<1x128xf32>
      %35 = math.exp %34 : vector<1x128xf32>
      %cst_29 = arith.constant 1.000000e+00 : f32
      %36 = vector.broadcast %cst_29 : f32 to vector<1x128xf32>
      %37 = arith.addf %36, %35 : vector<1x128xf32>
      %38 = arith.divf %36, %37 : vector<1x128xf32>
      %39 = vector.extract_strided_slice %32 {offsets = [0, 128], sizes = [1, 128], strides = [1, 1]} : vector<1x512xf32> to vector<1x128xf32>
      %40 = arith.negf %39 : vector<1x128xf32>
      %41 = math.exp %40 : vector<1x128xf32>
      %cst_30 = arith.constant 1.000000e+00 : f32
      %42 = vector.broadcast %cst_30 : f32 to vector<1x128xf32>
      %43 = arith.addf %42, %41 : vector<1x128xf32>
      %44 = arith.divf %42, %43 : vector<1x128xf32>
      %45 = vector.extract_strided_slice %32 {offsets = [0, 256], sizes = [1, 128], strides = [1, 1]} : vector<1x512xf32> to vector<1x128xf32>
      %46 = math.tanh %45 : vector<1x128xf32>
      %47 = vector.extract_strided_slice %32 {offsets = [0, 384], sizes = [1, 128], strides = [1, 1]} : vector<1x512xf32> to vector<1x128xf32>
      %48 = arith.negf %47 : vector<1x128xf32>
      %49 = math.exp %48 : vector<1x128xf32>
      %cst_31 = arith.constant 1.000000e+00 : f32
      %50 = vector.broadcast %cst_31 : f32 to vector<1x128xf32>
      %51 = arith.addf %50, %49 : vector<1x128xf32>
      %52 = arith.divf %50, %51 : vector<1x128xf32>
      %53 = arith.mulf %44, %arg12 : vector<1x128xf32>
      %54 = arith.mulf %38, %46 : vector<1x128xf32>
      %55 = arith.addf %53, %54 : vector<1x128xf32>
      %56 = math.tanh %55 : vector<1x128xf32>
      %57 = arith.mulf %52, %56 : vector<1x128xf32>
      %58 = arith.index_cast %arg10 : i32 to index
      %c0_32 = arith.constant 0 : index
      %59 = vector.load %arg8[%58, %c0_32] : memref<2x128xf32, #tpu.memory_space<vmem>>, vector<1x128xf32>
      tpu.vector_store %arg8[%58, %c0_32], %57 {strides = array<i32>} : memref<2x128xf32, #tpu.memory_space<vmem>>, vector<1x128xf32>,
      scf.yield %57, %55 : vector<1x128xf32>, vector<1x128xf32>
    }
    %c2_i32_9 = arith.constant 2 : i32
    %c0_10 = arith.constant 0 : index
    %c0_11 = arith.constant 0 : index
    %11 = vector.load %arg8[%c0_10, %c0_11] : memref<2x128xf32, #tpu.memory_space<vmem>>, vector<2x128xf32>
    %12 = arith.truncf %11 : vector<2x128xf32> to vector<2x128xbf16>
    %c0_12 = arith.constant 0 : index
    %c0_13 = arith.constant 0 : index
    %13 = vector.load %arg4[%c0_12, %c0_13] : memref<128x128xbf16, #tpu.memory_space<vmem>>, vector<128x128xbf16>
    %cst_14 = arith.constant dense<0.000000e+00> : vector<2x128xf32>
    %14 = tpu.matmul %12, %13, %cst_14 {dimension_numbers = #tpu.dot_dimension_numbers<[1], [0], [0], [1], [0, 0, 1, 1], [], []>} : vector<2x128xbf16>, vector<128x128xbf16>, vector<2x128xf32> -> vector<2x128xf32>
    %c0_15 = arith.constant 0 : index
    %c0_16 = arith.constant 0 : index
    %15 = vector.load %arg5[%c0_15, %c0_16] : memref<1x128xf32, #tpu.memory_space<vmem>>, vector<1x128xf32>
    %16 = vector.broadcast %15 : vector<1x128xf32> to vector<2x128xf32>
    %17 = arith.addf %14, %16 : vector<2x128xf32>
    %cst_17 = arith.constant 0.000000e+00 : f32
    %18 = vector.broadcast %cst_17 : f32 to vector<2x128xf32>
    %19 = arith.maximumf %17, %18 : vector<2x128xf32>
    %20 = arith.truncf %19 : vector<2x128xf32> to vector<2x128xbf16>
    %c0_18 = arith.constant 0 : index
    %c0_19 = arith.constant 0 : index
    %21 = vector.load %arg6[%c0_18, %c0_19] : memref<128x128xbf16, #tpu.memory_space<vmem>>, vector<128x128xbf16>
    %cst_20 = arith.constant dense<0.000000e+00> : vector<2x128xf32>
    %22 = tpu.matmul %20, %21, %cst_20 {dimension_numbers = #tpu.dot_dimension_numbers<[1], [0], [0], [1], [0, 0, 1, 1], [], []>} : vector<2x128xbf16>, vector<128x128xbf16>, vector<2x128xf32> -> vector<2x128xf32>
    %c0_21 = arith.constant 0 : index
    %c0_22 = arith.constant 0 : index
    %23 = vector.load %arg7[%c0_21, %c0_22] : memref<1x128xf32, #tpu.memory_space<vmem>>, vector<1x128xf32>
    %24 = vector.broadcast %23 : vector<1x128xf32> to vector<2x128xf32>
    %25 = arith.addf %22, %24 : vector<2x128xf32>
    %c0_23 = arith.constant 0 : index
    %c0_24 = arith.constant 0 : index
    %26 = vector.load %arg8[%c0_23, %c0_24] : memref<2x128xf32, #tpu.memory_space<vmem>>, vector<2x128xf32>
    tpu.vector_store %arg8[%c0_23, %c0_24], %25 {strides = array<i32>} : memref<2x128xf32, #tpu.memory_space<vmem>>, vector<2x128xf32>,
    return
  }
}

</mosaic_0001>

<bundles_post_ra>
// kernel: a2c_value_forward.4
= control target key start
LH: loop header
LB: loop body
LE: loop exit
PB: predicated region body
PF: predicated region fallthrough
CT: control target
= control target key end

     0   :  { %vm126_vm0 = vcmask 1041408   ;;  %vm627_vm2 = vcmask 523264   ;;  %s3629_s0 = inlined_call_operand.vmem [shape: f32[2,4096], index: 0, kind: input, shape index: {}]   ;;  %s3630_s2 = inlined_call_operand.vmem [shape: bf16[64,128], index: 2, kind: input, shape index: {}]   ;;  %s3631_s1 = inlined_call_operand.vmem [shape: bf16[450,64], index: 1, kind: input, shape index: {}]   ;;  %s3632_s5 = inlined_call_operand.<no memory space> [shape: f32[1,1], index: 5, kind: input, shape index: {}]   ;;  %s3633_s6 = inlined_call_operand.<no memory space> [shape: f32[1,1], index: 6, kind: input, shape index: {}]   ;;  %s3634_s4 = inlined_call_operand.vmem [shape: f32[1,128], index: 4, kind: input, shape index: {}]   ;;  %s3635_s7 = inlined_call_operand.vmem [shape: f32[1,128], index: 7, kind: input, shape index: {}]   ;;  %s3636_s8 = inlined_call_operand.vmem [shape: f32[1,128], index: 8, kind: input, shape index: {}]   ;;  %s3637_s3 = inlined_call_operand.vmem [shape: f32[1,128], index: 3, kind: input, shape index: {}]   ;;  %s3638_s9 = inlined_call_operand.vmem [shape: bf16[450,128], index: 9, kind: output, shape index: {}]  }
   0x1   :  { %v2118_v0 = vld [vmem:[%s3629_s0] sm:$0xff]  ;;  %v2123_v1 = vld [vmem:[%s3629_s0 + $0x8] sm:$0xff]  ;;  %v2130_v2 = vld [vmem:[%s3629_s0 + $0x10] sm:$0xff] }
   0x2   :  { %53 = vst [vmem:[#allocation1] ss:$4 sm:$0xff] %v2118_v0  ;;  %v2135_v3 = vld [vmem:[%s3629_s0 + $0x18] sm:$0xff]  ;;  %v2147_v20 = vld [vmem:[%s3629_s0 + $0x20] sm:$0xff]  ;;  %v2153_v22 = vld [vmem:[%s3629_s0 + $0x28] sm:$0xff] }
   0x3   :  { %55 = vst [vmem:[#allocation1 + $0x20] ss:$4 sm:$0xff] %v2123_v1  ;;  %v2165_v42 = vld [vmem:[%s3629_s0 + $0x30] sm:$0xff]  ;;  %v2170_v43 = vld [vmem:[%s3629_s0 + $0x38] sm:$0xff] }
   0x9   :  { %v56_v4 = vld.sshfl [vmem:[#allocation1] sm:$0xff pattern:$0x73625140]  ;;  %v57_v5 = vld.sshfl [vmem:[#allocation1 + $0x8] sm:$0xff pattern:$0x73625140] }
   0xa   :  { %v58_v6 = vld.sshfl [vmem:[#allocation1 + $0x10] sm:$0xff pattern:$0x73625140]  ;;  %v59_v7 = vld.sshfl [vmem:[#allocation1 + $0x18] sm:$0xff pattern:$0x73625140] }
   0xb   :  { %v60_v8 = vld.sshfl [vmem:[#allocation1 + $0x20] sm:$0xff pattern:$0x73625140]  ;;  %v61_v9 = vld.sshfl [vmem:[#allocation1 + $0x28] sm:$0xff pattern:$0x73625140] }
   0xc   :  { %v62_v10 = vld.sshfl [vmem:[#allocation1 + $0x30] sm:$0xff pattern:$0x73625140]  ;;  %v63_v11 = vld.sshfl [vmem:[#allocation1 + $0x38] sm:$0xff pattern:$0x73625140] }
   0xd   :  { %64 = vst [vmem:[#allocation1] ss:$4 sm:$0xff] %v2130_v2  ;;  %v127_v12 = vsel %vm126_vm0, %v56_v4, 0.0  ;;  %v128_v13 = vsel %vm126_vm0, %v57_v5, 0.0  ;;  %v130_v14 = vsel %vm126_vm0, %v58_v6, 0.0  ;;  %v132_v16 = vsel %vm126_vm0, %v59_v7, 0.0 }
   0xe   :  { %65 = vst [vmem:[#allocation1 + $0x20] ss:$4 sm:$0xff] %v2135_v3  ;;  %v129_v15 = vadd.f32 %v128_v13, %v127_v12  ;;  %v134_v18 = vsel %vm126_vm0, %v60_v8, 0.0  ;;  %v136_v21 = vsel %vm126_vm0, %v61_v9, 0.0  ;;  %v138_v25 = vsel %vm126_vm0, %v62_v10, 0.0 }
   0xf   :  { %v140_v26 = vsel %vm126_vm0, %v63_v11, 0.0 }
  0x10   :  { %v131_v17 = vadd.f32 %v130_v14, %v129_v15 }
  0x12   :  { %v133_v19 = vadd.f32 %v132_v16, %v131_v17 }
  0x14   :  { %v66_v23 = vld.sshfl [vmem:[#allocation1] sm:$0xff pattern:$0x73625140]  ;;  %v135_v24 = vadd.f32 %v134_v18, %v133_v19  ;;  %v67_v27 = vld.sshfl [vmem:[#allocation1 + $0x8] sm:$0xff pattern:$0x73625140] }
  0x15   :  { %v68_v28 = vld.sshfl [vmem:[#allocation1 + $0x10] sm:$0xff pattern:$0x73625140]  ;;  %v69_v29 = vld.sshfl [vmem:[#allocation1 + $0x18] sm:$0xff pattern:$0x73625140] }
  0x16   :  { %v70_v30 = vld.sshfl [vmem:[#allocation1 + $0x20] sm:$0xff pattern:$0x73625140]  ;;  %v137_v31 = vadd.f32 %v136_v21, %v135_v24  ;;  %v71_v32 = vld.sshfl [vmem:[#allocation1 + $0x28] sm:$0xff pattern:$0x73625140] }
  0x17   :  { %v72_v33 = vld.sshfl [vmem:[#allocation1 + $0x30] sm:$0xff pattern:$0x73625140]  ;;  %v73_v34 = vld.sshfl [vmem:[#allocation1 + $0x38] sm:$0xff pattern:$0x73625140] }
  0x18   :  { %74 = vst [vmem:[#allocation1] ss:$4 sm:$0xff] %v2147_v20  ;;  %v139_v35 = vadd.f32 %v138_v25, %v137_v31  ;;  %v142_v36 = vsel %vm126_vm0, %v66_v23, 0.0  ;;  %v144_v38 = vsel %vm126_vm0, %v67_v27, 0.0  ;;  %v146_v40 = vsel %vm126_vm0, %v68_v28, 0.0 }
  0x19   :  { %75 = vst [vmem:[#allocation1 + $0x20] ss:$4 sm:$0xff] %v2153_v22  ;;  %v148_v44 = vsel %vm126_vm0, %v69_v29, 0.0  ;;  %v150_v45 = vsel %vm126_vm0, %v70_v30, 0.0  ;;  %v152_v56 = vsel %vm126_vm0, %v71_v32, 0.0  ;;  %v154_v58 = vsel %vm126_vm0, %v72_v33, 0.0 }
  0x1a   :  { %v141_v37 = vadd.f32 %v140_v26, %v139_v35  ;;  %v156_v60 = vsel %vm126_vm0, %v73_v34, 0.0 }
  0x1c   :  { %v143_v39 = vadd.f32 %v142_v36, %v141_v37 }
  0x1e   :  { %v145_v41 = vadd.f32 %v144_v38, %v143_v39 }
  0x1f   :  { %v76_v46 = vld.sshfl [vmem:[#allocation1] sm:$0xff pattern:$0x73625140]  ;;  %v77_v47 = vld.sshfl [vmem:[#allocation1 + $0x8] sm:$0xff pattern:$0x73625140] }
  0x20   :  { %v78_v48 = vld.sshfl [vmem:[#allocation1 + $0x10] sm:$0xff pattern:$0x73625140]  ;;  %v147_v49 = vadd.f32 %v146_v40, %v145_v41  ;;  %v79_v50 = vld.sshfl [vmem:[#allocation1 + $0x18] sm:$0xff pattern:$0x73625140] }
  0x21   :  { %v80_v51 = vld.sshfl [vmem:[#allocation1 + $0x20] sm:$0xff pattern:$0x73625140]  ;;  %v81_v52 = vld.sshfl [vmem:[#allocation1 + $0x28] sm:$0xff pattern:$0x73625140] }
  0x22   :  { %v82_v53 = vld.sshfl [vmem:[#allocation1 + $0x30] sm:$0xff pattern:$0x73625140]  ;;  %v149_v54 = vadd.f32 %v148_v44, %v147_v49  ;;  %v83_v55 = vld.sshfl [vmem:[#allocation1 + $0x38] sm:$0xff pattern:$0x73625140] }
  0x23   :  { %84 = vst [vmem:[#allocation1] ss:$4 sm:$0xff] %v2165_v42  ;;  %v158_v62 = vsel %vm126_vm0, %v76_v46, 0.0  ;;  %v160_v4 = vsel %vm126_vm0, %v77_v47, 0.0  ;;  %v162_v6 = vsel %vm126_vm0, %v78_v48, 0.0  ;;  %v164_v8 = vsel %vm126_vm0, %v79_v50, 0.0 }
  0x24   :  { %85 = vst [vmem:[#allocation1 + $0x20] ss:$4 sm:$0xff] %v2170_v43  ;;  %v151_v57 = vadd.f32 %v150_v45, %v149_v54  ;;  %v166_v10 = vsel %vm126_vm0, %v80_v51, 0.0  ;;  %v168_v12 = vsel %vm126_vm0, %v81_v52, 0.0  ;;  %v170_v14 = vsel %vm126_vm0, %v82_v53, 0.0 }
  0x25   :  { %v172_v17 = vsel %vm126_vm0, %v83_v55, 0.0  ;;  %v2062_v54 = vmov 8192.0  }
  0x26   :  { %v153_v59 = vadd.f32 %v152_v56, %v151_v57  ;;  %2054 = vrcp.f32 %v2062_v54 }
  0x28   :  { %v155_v61 = vadd.f32 %v154_v58, %v153_v59 }
  0x2a   :  { %v157_v63 = vadd.f32 %v156_v60, %v155_v61  ;;  %v86_v15 = vld.sshfl [vmem:[#allocation1] sm:$0xff pattern:$0x73625140]  ;;  %v87_v18 = vld.sshfl [vmem:[#allocation1 + $0x8] sm:$0xff pattern:$0x73625140] }
  0x2b   :  { %v174_v21 = vsel %vm126_vm0, %v86_v15, 0.0  ;;  %v88_v23 = vld.sshfl [vmem:[#allocation1 + $0x10] sm:$0xff pattern:$0x73625140]  ;;  %v176_v25 = vsel %vm126_vm0, %v87_v18, 0.0 }
  0x2c   :  { %v159_v5 = vadd.f32 %v158_v62, %v157_v63  ;;  %v89_v26 = vld.sshfl [vmem:[#allocation1 + $0x18] sm:$0xff pattern:$0x73625140]  ;;  %v178_v28 = vsel %vm126_vm0, %v88_v23, 0.0  ;;  %v2055_v55 = vpop.eup %2054 }
  0x2d   :  { %v90_v29 = vld.sshfl [vmem:[#allocation1 + $0x20] sm:$0xff pattern:$0x73625140]  ;;  %v180_v31 = vsel %vm126_vm0, %v89_v26, 0.0  ;;  %v201_v56 = vmul.f32 8192.0, %v2055_v55  ;;  %vm205_vm1 = vweird.f32 %v2055_v55 }
  0x2e   :  { %v161_v7 = vadd.f32 %v160_v4, %v159_v5  ;;  %v91_v32 = vld.sshfl [vmem:[#allocation1 + $0x28] sm:$0xff pattern:$0x73625140]  ;;  %v182_v34 = vsel %vm126_vm0, %v90_v29, 0.0 }
  0x2f   :  { %v92_v35 = vld.sshfl [vmem:[#allocation1 + $0x30] sm:$0xff pattern:$0x73625140]  ;;  %v184_v37 = vsel %vm126_vm0, %v91_v32, 0.0  ;;  %v202_v57 = vsub.f32 1.0, %v201_v56 }
  0x30   :  { %v163_v9 = vadd.f32 %v162_v6, %v161_v7  ;;  %v93_v38 = vld.sshfl [vmem:[#allocation1 + $0x38] sm:$0xff pattern:$0x73625140]  ;;  %v186_v40 = vsel %vm126_vm0, %v92_v35, 0.0 }
  0x31   :  { %v188_v44 = vsel %vm126_vm0, %v93_v38, 0.0  ;;  %v203_v58 = vmul.f32 %v2055_v55, %v202_v57 }
  0x32   :  { %v165_v11 = vadd.f32 %v164_v8, %v163_v9 }
  0x33   :  { %v204_v59 = vadd.f32 %v2055_v55, %v203_v58 }
  0x34   :  { %v167_v13 = vadd.f32 %v166_v10, %v165_v11 }
  0x35   :  { %v2195_v60 = vsel %vm205_vm1, %v2055_v55, %v204_v59 }
  0x36   :  { %v169_v16 = vadd.f32 %v168_v12, %v167_v13 }
  0x38   :  { %v171_v19 = vadd.f32 %v170_v14, %v169_v16 }
  0x3a   :  { %v173_v24 = vadd.f32 %v172_v17, %v171_v19 }
  0x3c   :  { %v175_v27 = vadd.f32 %v174_v21, %v173_v24 }
  0x3e   :  { %v177_v30 = vadd.f32 %v176_v25, %v175_v27 }
  0x40   :  { %v179_v33 = vadd.f32 %v178_v28, %v177_v30 }
  0x42   :  { %v181_v36 = vadd.f32 %v180_v31, %v179_v33 }
  0x44   :  { %v183_v39 = vadd.f32 %v182_v34, %v181_v36 }
  0x46   :  { %v185_v41 = vadd.f32 %v184_v37, %v183_v39 }
  0x48   :  { %v187_v45 = vadd.f32 %v186_v40, %v185_v41 }
  0x4a   :  { %v189_v46 = vadd.f32 %v188_v44, %v187_v45 }
  0x4c   :  { %190 = vadd.xlane.f32.xlu0 %v189_v46 }
  0xbf   :  { %v191_v47 = vpop.xlane.xlu0 %190 }
  0xc0   :  { %v192_v48 = vrot.slane %v191_v47, 4 }
  0xc2   :  { %v193_v49 = vadd.f32 %v192_v48, %v191_v47 }
  0xc4   :  { %v194_v50 = vrot.slane %v193_v49, 2 }
  0xc6   :  { %v195_v51 = vadd.f32 %v194_v50, %v193_v49 }
  0xc8   :  { %v196_v52 = vrot.slane %v195_v51, 1 }
  0xca   :  { %v197_v53 = vadd.f32 %v196_v52, %v195_v51 }
  0xcc   :  { %2042 = vpush %v197_v53 }
  0xfd   :  { %s2043_s0 = spop %2042 }
  0xfe   :  { %v199_v61 = vstv %s2043_s0 }
  0xff   :  { %v2198_v62 = vmul.f32 %v2195_v60, %v199_v61 }
 0x101   :  { %v208_v63 = vsub.f32 %v2118_v0, %v2198_v62  ;;  %v209_v4 = vsub.f32 %v2123_v1, %v2198_v62  ;;  %v210_v7 = vsub.f32 %v2130_v2, %v2198_v62  ;;  %v211_v8 = vsub.f32 %v2135_v3, %v2198_v62 }
 0x102   :  { %v212_v23 = vsub.f32 %v2147_v20, %v2198_v62  ;;  %v213_v25 = vsub.f32 %v2153_v22, %v2198_v62  ;;  %v214_v46 = vsub.f32 %v2165_v42, %v2198_v62  ;;  %v215_v48 = vsub.f32 %v2170_v43, %v2198_v62 }
 0x103   :  { %v216_v5 = vmul.f32 %v208_v63, %v208_v63  ;;  %v217_v6 = vmul.f32 %v209_v4, %v209_v4  ;;  %v218_v13 = vmul.f32 %v210_v7, %v210_v7  ;;  %v219_v15 = vmul.f32 %v211_v8, %v211_v8 }
 0x104   :  { %v220_v34 = vmul.f32 %v212_v23, %v212_v23  ;;  %v221_v20 = vmul.f32 %v213_v25, %v213_v25  ;;  %v222_v57 = vmul.f32 %v214_v46, %v214_v46  ;;  %v223_v61 = vmul.f32 %v215_v48, %v215_v48 }
 0x105   :  { %232 = vst [vmem:[#allocation1] ss:$4 sm:$0xff] %v216_v5 }
 0x106   :  { %234 = vst [vmem:[#allocation1 + $0x20] ss:$4 sm:$0xff] %v217_v6 }
 0x10c   :  { %v235_v9 = vld.sshfl [vmem:[#allocation1] sm:$0xff pattern:$0x73625140]  ;;  %v236_v10 = vld.sshfl [vmem:[#allocation1 + $0x8] sm:$0xff pattern:$0x73625140] }
 0x10d   :  { %v237_v11 = vld.sshfl [vmem:[#allocation1 + $0x10] sm:$0xff pattern:$0x73625140]  ;;  %v238_v12 = vld.sshfl [vmem:[#allocation1 + $0x18] sm:$0xff pattern:$0x73625140] }
 0x10e   :  { %v239_v14 = vld.sshfl [vmem:[#allocation1 + $0x20] sm:$0xff pattern:$0x73625140]  ;;  %v240_v0 = vld.sshfl [vmem:[#allocation1 + $0x28] sm:$0xff pattern:$0x73625140] }
 0x10f   :  { %v241_v16 = vld.sshfl [vmem:[#allocation1 + $0x30] sm:$0xff pattern:$0x73625140]  ;;  %v242_v1 = vld.sshfl [vmem:[#allocation1 + $0x38] sm:$0xff pattern:$0x73625140] }
 0x110   :  { %243 = vst [vmem:[#allocation1] ss:$4 sm:$0xff] %v218_v13  ;;  %v305_v17 = vsel %vm126_vm0, %v235_v9, 0.0  ;;  %v306_v18 = vsel %vm126_vm0, %v236_v10, 0.0  ;;  %v308_v19 = vsel %vm126_vm0, %v237_v11, 0.0  ;;  %v310_v21 = vsel %vm126_vm0, %v238_v12, 0.0 }
 0x111   :  { %244 = vst [vmem:[#allocation1 + $0x20] ss:$4 sm:$0xff] %v219_v15  ;;  %v307_v2 = vadd.f32 %v306_v18, %v305_v17  ;;  %v312_v26 = vsel %vm126_vm0, %v239_v14, 0.0  ;;  %v314_v27 = vsel %vm126_vm0, %v240_v0, 0.0  ;;  %v316_v28 = vsel %vm126_vm0, %v241_v16, 0.0  ;;  %v1862_v15 = vld [vmem:[%s3630_s2 + $0x18] sm:$0xff] }
 0x112   :  { %v318_v40 = vsel %vm126_vm0, %v242_v1, 0.0  ;;  %2031 = vmatpush.bf16.msra.mxu2 %v1862_v15  ;;  %v1861_v17 = vld [vmem:[%s3630_s2 + $0x10] sm:$0xff]  ;;  %719 = vmatpush.bf16.msra.mxu0 %v1862_v15 }
 0x113   :  { %v309_v3 = vadd.f32 %v308_v19, %v307_v2  ;;  %2030 = vmatpush.bf16.msra.mxu1 %v1862_v15  ;;  %2032 = vmatpush.bf16.msra.mxu3 %v1862_v15 }
 0x115   :  { %v311_v24 = vadd.f32 %v310_v21, %v309_v3  ;;  %v1860_v21 = vld [vmem:[%s3630_s2 + $0x8] sm:$0xff] }
 0x116   :  { %2034 = vmatpush.bf16.msra.mxu2 %v1861_v17  ;;  %720 = vmatpush.bf16.msra.mxu0 %v1861_v17 }
 0x117   :  { %v245_v29 = vld.sshfl [vmem:[#allocation1] sm:$0xff pattern:$0x73625140]  ;;  %v246_v30 = vld.sshfl [vmem:[#allocation1 + $0x8] sm:$0xff pattern:$0x73625140]  ;;  %v313_v31 = vadd.f32 %v312_v26, %v311_v24  ;;  %2033 = vmatpush.bf16.msra.mxu1 %v1861_v17  ;;  %2035 = vmatpush.bf16.msra.mxu3 %v1861_v17 }
 0x118   :  { %v247_v32 = vld.sshfl [vmem:[#allocation1 + $0x10] sm:$0xff pattern:$0x73625140]  ;;  %v248_v33 = vld.sshfl [vmem:[#allocation1 + $0x18] sm:$0xff pattern:$0x73625140] }
 0x119   :  { %v249_v35 = vld.sshfl [vmem:[#allocation1 + $0x20] sm:$0xff pattern:$0x73625140]  ;;  %v250_v36 = vld.sshfl [vmem:[#allocation1 + $0x28] sm:$0xff pattern:$0x73625140]  ;;  %v315_v37 = vadd.f32 %v314_v27, %v313_v31 }
 0x11a   :  { %v251_v38 = vld.sshfl [vmem:[#allocation1 + $0x30] sm:$0xff pattern:$0x73625140]  ;;  %v252_v39 = vld.sshfl [vmem:[#allocation1 + $0x38] sm:$0xff pattern:$0x73625140]  ;;  %2037 = vmatpush.bf16.msra.mxu2 %v1860_v21  ;;  %721 = vmatpush.bf16.msra.mxu0 %v1860_v21 }
 0x11b   :  { %253 = vst [vmem:[#allocation1] ss:$4 sm:$0xff] %v220_v34  ;;  %v317_v22 = vadd.f32 %v316_v28, %v315_v37  ;;  %v320_v44 = vsel %vm126_vm0, %v245_v29, 0.0  ;;  %v322_v47 = vsel %vm126_vm0, %v246_v30, 0.0  ;;  %v324_v50 = vsel %vm126_vm0, %v247_v32, 0.0  ;;  %v1859_v28 = vld [vmem:[%s3630_s2] sm:$0xff]  ;;  %2036 = vmatpush.bf16.msra.mxu1 %v1860_v21  ;;  %2038 = vmatpush.bf16.msra.mxu3 %v1860_v21 }
 0x11c   :  { %254 = vst [vmem:[#allocation1 + $0x20] ss:$4 sm:$0xff] %v221_v20  ;;  %v326_v51 = vsel %vm126_vm0, %v248_v33, 0.0  ;;  %v328_v43 = vsel %vm126_vm0, %v249_v35, 0.0  ;;  %v330_v6 = vsel %vm126_vm0, %v250_v36, 0.0  ;;  %v332_v8 = vsel %vm126_vm0, %v251_v38, 0.0 }
 0x11d   :  { %v319_v41 = vadd.f32 %v318_v40, %v317_v22  ;;  %v334_v10 = vsel %vm126_vm0, %v252_v39, 0.0  ;;  %v1845_v33 = vld [vmem:[%s3631_s1 + $0x70] sm:$0xff]  ;;  %v1831_v34 = vld [vmem:[%s3631_s1] sm:$0xff]  ;;  %v1838_v37 = vld [vmem:[%s3631_s1 + $0x38] sm:$0xff] }
 0x11e   :  { %2040 = vmatpush.bf16.msra.mxu2 %v1859_v28  ;;  %722 = vmatpush.bf16.msra.mxu0 %v1859_v28  ;;  %v1853_v20 = vld [vmem:[%s3631_s1 + $0xb0] sm:$0xff]  ;;  %v1835_v17 = vld [vmem:[%s3631_s1 + $0x20] sm:$0xff] }
 0x11f   :  { %v321_v45 = vadd.f32 %v320_v44, %v319_v41  ;;  %2039 = vmatpush.bf16.msra.mxu1 %v1859_v28  ;;  %2041 = vmatpush.bf16.msra.mxu3 %v1859_v28  ;;  %v1843_v21 = vld [vmem:[%s3631_s1 + $0x60] sm:$0xff]  ;;  %v16_v28 = vstv %s3633_s6 }
 0x120   :  { %17 = vst [vmem:[#allocation3] sm:$0x1] %v16_v28 }
 0x121   :  { %v323_v49 = vadd.f32 %v322_v47, %v321_v45  ;;  %1816 = vmatmul.msk.bf16.vlgmr.msra.gmra.mxu2 %vm627_vm2, %v1845_v33  ;;  %1802 = vmatmul.msk.bf16.vlgmr.msra.gmra.mxu0 %vm627_vm2, %v1831_v34 }
 0x122   :  { %v255_v52 = vld.sshfl [vmem:[#allocation1] sm:$0xff pattern:$0x73625140]  ;;  %v256_v53 = vld.sshfl [vmem:[#allocation1 + $0x8] sm:$0xff pattern:$0x73625140]  ;;  %1809 = vmatmul.msk.bf16.vlgmr.msra.gmra.mxu1 %vm627_vm2, %v1838_v37  ;;  %1824 = vmatmul.msk.bf16.vlgmr.msra.gmra.mxu3 %vm627_vm2, %v1853_v20 }
 0x123   :  { %v257_v54 = vld.sshfl [vmem:[#allocation1 + $0x10] sm:$0xff pattern:$0x73625140]  ;;  %v258_v55 = vld.sshfl [vmem:[#allocation1 + $0x18] sm:$0xff pattern:$0x73625140]  ;;  %v325_v56 = vadd.f32 %v324_v50, %v323_v49 }
 0x124   :  { %v259_v58 = vld.sshfl [vmem:[#allocation1 + $0x20] sm:$0xff pattern:$0x73625140]  ;;  %v260_v59 = vld.sshfl [vmem:[#allocation1 + $0x28] sm:$0xff pattern:$0x73625140] }
 0x125   :  { %v261_v42 = vld.sshfl [vmem:[#allocation1 + $0x30] sm:$0xff pattern:$0x73625140]  ;;  %v262_v63 = vld.sshfl [vmem:[#allocation1 + $0x38] sm:$0xff pattern:$0x73625140]  ;;  %v327_v4 = vadd.f32 %v326_v51, %v325_v56 }
 0x126   :  { %263 = vst [vmem:[#allocation1] ss:$4 sm:$0xff] %v222_v57  ;;  %v336_v12 = vsel %vm126_vm0, %v255_v52, 0.0  ;;  %v338_v14 = vsel %vm126_vm0, %v256_v53, 0.0  ;;  %v340_v16 = vsel %vm126_vm0, %v257_v54, 0.0  ;;  %v342_v18 = vsel %vm126_vm0, %v258_v55, 0.0 }
 0x127   :  { %264 = vst [vmem:[#allocation1 + $0x20] ss:$4 sm:$0xff] %v223_v61  ;;  %v329_v5 = vadd.f32 %v328_v43, %v327_v4  ;;  %v344_v19 = vsel %vm126_vm0, %v259_v58, 0.0  ;;  %v346_v23 = vsel %vm126_vm0, %v260_v59, 0.0  ;;  %v348_v25 = vsel %vm126_vm0, %v261_v42, 0.0  ;;  %v1846_v58 = vld [vmem:[%s3631_s1 + $0x78] sm:$0xff] }
 0x128   :  { %v350_v29 = vsel %vm126_vm0, %v262_v63, 0.0  ;;  %v1847_v59 = vld [vmem:[%s3631_s1 + $0x80] sm:$0xff]  ;;  %v1832_v61 = vld [vmem:[%s3631_s1 + $0x8] sm:$0xff]  ;;  %v1854_v63 = vld [vmem:[%s3631_s1 + $0xb8] sm:$0xff] }
 0x129   :  { %v331_v7 = vadd.f32 %v330_v6, %v329_v5  ;;  %v1839_v42 = vld [vmem:[%s3631_s1 + $0x40] sm:$0xff]  ;;  %v1848_v4 = vld [vmem:[%s3631_s1 + $0x88] sm:$0xff]  ;;  %v1833_v43 = vld [vmem:[%s3631_s1 + $0x10] sm:$0xff] }
 0x12a   :  { %v1840_v5 = vld [vmem:[%s3631_s1 + $0x48] sm:$0xff]  ;;  %v1855_v6 = vld [vmem:[%s3631_s1 + $0xc0] sm:$0xff] }
 0x12b   :  { %v333_v9 = vadd.f32 %v332_v8, %v331_v7  ;;  %v1849_v7 = vld [vmem:[%s3631_s1 + $0x90] sm:$0xff] }
 0x12d   :  { %v335_v11 = vadd.f32 %v334_v10, %v333_v9  ;;  %v265_v26 = vld.sshfl [vmem:[#allocation1] sm:$0xff pattern:$0x73625140]  ;;  %v266_v30 = vld.sshfl [vmem:[#allocation1 + $0x8] sm:$0xff pattern:$0x73625140] }
 0x12e   :  { %v352_v32 = vsel %vm126_vm0, %v265_v26, 0.0  ;;  %v267_v35 = vld.sshfl [vmem:[#allocation1 + $0x10] sm:$0xff pattern:$0x73625140]  ;;  %v354_v38 = vsel %vm126_vm0, %v266_v30, 0.0 }
 0x12f   :  { %v337_v13 = vadd.f32 %v336_v12, %v335_v11  ;;  %v268_v39 = vld.sshfl [vmem:[#allocation1 + $0x18] sm:$0xff pattern:$0x73625140]  ;;  %v356_v40 = vsel %vm126_vm0, %v267_v35, 0.0  ;;  %v451_v26 = vld [vmem:[%s3631_s1 + $0xe0] sm:$0x1] }
 0x130   :  { %v269_v41 = vld.sshfl [vmem:[#allocation1 + $0x20] sm:$0xff pattern:$0x73625140]  ;;  %v358_v45 = vsel %vm126_vm0, %v268_v39, 0.0  ;;  %v1834_v12 = vld [vmem:[%s3631_s1 + $0x18] sm:$0xff]  ;;  %v1837_v30 = vld [vmem:[%s3631_s1 + $0x30] sm:$0xff] }
 0x131   :  { %v339_v0 = vadd.f32 %v338_v14, %v337_v13  ;;  %v270_v46 = vld.sshfl [vmem:[#allocation1 + $0x28] sm:$0xff pattern:$0x73625140]  ;;  %v360_v48 = vsel %vm126_vm0, %v269_v41, 0.0  ;;  %1817 = vmatmul.msk.bf16.gmra.mxu2 %vm627_vm2, %v1846_v58  ;;  %1803 = vmatmul.msk.bf16.gmra.mxu0 %vm627_vm2, %v1832_v61  ;;  %v1841_v13 = vld [vmem:[%s3631_s1 + $0x50] sm:$0xff] }
 0x132   :  { %v271_v49 = vld.sshfl [vmem:[#allocation1 + $0x30] sm:$0xff pattern:$0x73625140]  ;;  %v362_v51 = vsel %vm126_vm0, %v270_v46, 0.0  ;;  %1810 = vmatmul.msk.bf16.gmra.mxu1 %vm627_vm2, %v1839_v42  ;;  %1825 = vmatmul.msk.bf16.gmra.mxu3 %vm627_vm2, %v1854_v63  ;;  %v1856_v14 = vld [vmem:[%s3631_s1 + $0xc8] sm:$0xff] }
 0x133   :  { %v341_v1 = vadd.f32 %v340_v16, %v339_v0  ;;  %v272_v52 = vld.sshfl [vmem:[#allocation1 + $0x38] sm:$0xff pattern:$0x73625140]  ;;  %v364_v54 = vsel %vm126_vm0, %v271_v49, 0.0  ;;  %v392_v46 = vld [vmem:[#allocation3] sm:$0x1] }
 0x134   :  { %v366_v56 = vsel %vm126_vm0, %v272_v52, 0.0  ;;  %v1850_v0 = vld [vmem:[%s3631_s1 + $0x98] sm:$0xff] }
 0x135   :  { %v343_v2 = vadd.f32 %v342_v18, %v341_v1  ;;  %v1842_v18 = vld [vmem:[%s3631_s1 + $0x58] sm:$0xff] }
 0x137   :  { %v345_v3 = vadd.f32 %v344_v19, %v343_v2  ;;  %v1857_v2 = vld [vmem:[%s3631_s1 + $0xd0] sm:$0xff]  ;;  %v1851_v19 = vld [vmem:[%s3631_s1 + $0xa0] sm:$0xff] }
 0x139   :  { %v347_v24 = vadd.f32 %v346_v23, %v345_v3  ;;  %v1836_v3 = vld [vmem:[%s3631_s1 + $0x28] sm:$0xff]  ;;  %v1858_v23 = vld [vmem:[%s3631_s1 + $0xd8] sm:$0xff] }
 0x13b   :  { %v349_v27 = vadd.f32 %v348_v25, %v347_v24  ;;  %v1852_v24 = vld [vmem:[%s3631_s1 + $0xa8] sm:$0xff]  ;;  %v14_v25 = vstv %s3632_s5 }
 0x13c   :  { %15 = vst [vmem:[#allocation2] sm:$0x1] %v14_v25 }
 0x13d   :  { %v351_v31 = vadd.f32 %v350_v29, %v349_v27  ;;  %v2063_v27 = vmov 0   ;;  %v573_v29 = vunpack.c.l.b16 %v451_v26 }
 0x13e   :  { %2049 = vset.pattern.permute.xlu1 %v2063_v27  ;;  %2050 = vset.pattern.permute.xlu0 %v2063_v27 }
 0x13f   :  { %v353_v36 = vadd.f32 %v352_v32, %v351_v31  ;;  %v1844_v31 = vld [vmem:[%s3631_s1 + $0x68] sm:$0xff]  ;;  %v602_v32 = vpack.c.b16 %v573_v29, %v573_v29 }
 0x141   :  { %v355_v22 = vadd.f32 %v354_v38, %v353_v36  ;;  %1818 = vmatmul.msk.bf16.gmra.mxu2 %vm627_vm2, %v1847_v59  ;;  %1804 = vmatmul.msk.bf16.gmra.mxu0 %vm627_vm2, %v1833_v43 }
 0x142   :  { %1811 = vmatmul.msk.bf16.gmra.mxu1 %vm627_vm2, %v1840_v5  ;;  %1826 = vmatmul.msk.bf16.gmra.mxu3 %vm627_vm2, %v1855_v6 }
 0x143   :  { %v357_v44 = vadd.f32 %v356_v40, %v355_v22  ;;  %v379_v41 = vld [vmem:[#allocation2] sm:$0x1] }
 0x145   :  { %v359_v47 = vadd.f32 %v358_v45, %v357_v44 }
 0x147   :  { %v361_v50 = vadd.f32 %v360_v48, %v359_v47 }
 0x149   :  { %v363_v53 = vadd.f32 %v362_v51, %v361_v50 }
 0x14b   :  { %v365_v55 = vadd.f32 %v364_v54, %v363_v53 }
 0x14d   :  { %v367_v57 = vadd.f32 %v366_v56, %v365_v55 }
 0x14f   :  { %368 = vadd.xlane.f32.xlu0 %v367_v57 }
 0x151   :  { %1819 = vmatmul.msk.bf16.gmra.mxu2 %vm627_vm2, %v1848_v4  ;;  %1805 = vmatmul.msk.bf16.gmra.mxu0 %vm627_vm2, %v1834_v12 }
 0x152   :  { %1812 = vmatmul.msk.bf16.gmra.mxu1 %vm627_vm2, %v1841_v13  ;;  %1827 = vmatmul.msk.bf16.gmra.mxu3 %vm627_vm2, %v1856_v14 }
 0x161   :  { %1820 = vmatmul.msk.bf16.gmra.mxu2 %vm627_vm2, %v1849_v7  ;;  %1806 = vmatmul.msk.bf16.gmra.mxu0 %vm627_vm2, %v1835_v17 }
 0x162   :  { %1813 = vmatmul.msk.bf16.gmra.mxu1 %vm627_vm2, %v1842_v18  ;;  %1828 = vmatmul.msk.bf16.gmra.mxu3 %vm627_vm2, %v1857_v2 }
 0x171   :  { %1821 = vmatmul.msk.bf16.gmra.mxu2 %vm627_vm2, %v1850_v0  ;;  %1807 = vmatmul.msk.bf16.gmra.mxu0 %vm627_vm2, %v1836_v3 }
 0x172   :  { %1814 = vmatmul.msk.bf16.gmra.mxu1 %vm627_vm2, %v1843_v21  ;;  %1829 = vmatmul.msk.bf16.gmra.mxu3 %vm627_vm2, %v1858_v23 }
 0x181   :  { %1822 = vmatmul.msk.bf16.gmra.mxu2 %vm627_vm2, %v1851_v19  ;;  %1808 = vmatmul.msk.bf16.gmra.mxu0 %vm627_vm2, %v1837_v30 }
 0x182   :  { %1815 = vmatmul.msk.bf16.gmra.mxu1 %vm627_vm2, %v1844_v31  ;;  %1830 = vmatmul.msk.bf16.gmra.mxu3 %vm627_vm2, %v602_v32  ;;  %v931_v31 = vld [vmem:[%s3637_s3] sm:$0x1] }
 0x191   :  { %1823 = vmatmul.msk.bf16.gmra.mxu2 %vm627_vm2, %v1852_v24 }
 0x19e   :  { %v724_v59 = vpop.f32.mrf.mxu0 }
 0x1a4   :  { %v2383_v22 = vpop.f32.mrf.mxu2 }
 0x1a6   :  { %v2408_v63 = vpop.f32.mrf.mxu0 }
 0x1ac   :  { %v2388_v49 = vpop.f32.mrf.mxu2 }
 0x1ae   :  { %v2412_v5 = vpop.f32.mrf.mxu0 }
 0x1b4   :  { %v2392_v52 = vpop.f32.mrf.mxu2 }
 0x1bc   :  { %v2396_v54 = vpop.f32.mrf.mxu2 }
 0x1c2   :  { %v369_v8 = vpop.xlane.xlu0 %368 }
 0x1c3   :  { %v370_v9 = vrot.slane %v369_v8, 4 }
 0x1c4   :  { %v2400_v56 = vpop.f32.mrf.mxu2 }
 0x1c5   :  { %v371_v10 = vadd.f32 %v370_v9, %v369_v8  ;;  %v2414_v8 = vpop.f32.mrf.mxu1  ;;  %v2416_v9 = vpop.f32.mrf.mxu0 }
 0x1c7   :  { %v372_v11 = vrot.slane %v371_v10, 2 }
 0x1c9   :  { %v373_v15 = vadd.f32 %v372_v11, %v371_v10 }
 0x1cb   :  { %v374_v16 = vrot.slane %v373_v15, 1 }
 0x1cc   :  { %v806_v57 = vpop.f32.mrf.mxu2 }
 0x1cd   :  { %v375_v1 = vadd.f32 %v374_v16, %v373_v15  ;;  %v2418_v12 = vpop.f32.mrf.mxu1  ;;  %v2420_v13 = vpop.f32.mrf.mxu0 }
 0x1cf   :  { %2044 = vpush %v375_v1 }
 0x1d4   :  { %v809_v42 = vpop.f32.mrf.mxu2 }
 0x1d5   :  { %v2422_v15 = vpop.f32.mrf.mxu1  ;;  %v2424_v1 = vpop.f32.mrf.mxu0 }
 0x1dc   :  { %v811_v43 = vpop.f32.mrf.mxu2 }
 0x1dd   :  { %v2426_v2 = vpop.f32.mrf.mxu1  ;;  %v2428_v19 = vpop.f32.mrf.mxu0 }
 0x1e4   :  { %v814_v7 = vpop.f32.mrf.mxu2 }
 0x1e5   :  { %v2430_v23 = vpop.f32.mrf.mxu1  ;;  %v2432_v24 = vpop.f32.mrf.mxu0 }
 0x1ec   :  { %v816_v11 = vpop.f32.mrf.mxu2 }
 0x1ed   :  { %v2434_v27 = vpop.f32.mrf.mxu1  ;;  %v2436_v28 = vpop.f32.mrf.mxu0 }
 0x1f4   :  { %v819_v0 = vpop.f32.mrf.mxu2 }
 0x1fc   :  { %v821_v17 = vpop.f32.mrf.mxu2 }
 0x200   :  { %s2045_s25 = spop %2044 }
 0x201   :  { %v377_v33 = vstv %s2045_s25 }
 0x202   :  { %v378_v34 = vmul.f32 %v377_v33, %v2195_v60  ;;  %v2386_v60 = vpop.f32.mrf.mxu3  ;;  %v2443_v33 = vpop.f32.mrf.mxu1 }
 0x204   :  { %v380_v35 = vadd.f32 1e-05, %v378_v34  ;;  %v824_v3 = vpop.f32.mrf.mxu2 }
 0x206   :  { %2056 = vrsqrt.f32 %v380_v35  ;;  %vm387_vm4 = vweird.f32 %v380_v35 }
 0x20a   :  { %v2390_v51 = vpop.f32.mrf.mxu3 }
 0x20c   :  { %v2057_v36 = vpop.eup %2056  ;;  %v826_v25 = vpop.f32.mrf.mxu2 }
 0x20d   :  { %v382_v37 = vmul.f32 %v2057_v36, %v380_v35  ;;  %vm388_vm3 = vweird.f32 %v2057_v36  ;;  %v2445_v35 = vpop.f32.mrf.mxu0 }
 0x20e   :  { %vm389_vm5 = vmor %vm387_vm4, %vm388_vm3 }
 0x20f   :  { %v383_v20 = vmul.f32 %v2057_v36, %v382_v37 }
 0x211   :  { %v384_v38 = vmul.f32 0.5, %v383_v20 }
 0x212   :  { %v2394_v53 = vpop.f32.mrf.mxu3 }
 0x213   :  { %v385_v39 = vsub.f32 1.5, %v384_v38 }
 0x214   :  { %v829_v29 = vpop.f32.mrf.mxu2 }
 0x215   :  { %v386_v40 = vmul.f32 %v2057_v36, %v385_v39 }
 0x217   :  { %v390_v44 = vsel %vm389_vm5, %v2057_v36, %v386_v40 }
 0x218   :  { %v391_v45 = vmul.f32 %v390_v44, %v379_v41 }
 0x21a   :  { %v393_v47 = vmul.f32 %v391_v45, %v2198_v62  ;;  %v869_v50 = vperm.slane %v391_v45, 0  ;;  %v2398_v55 = vpop.f32.mrf.mxu3 }
 0x21c   :  { %v394_v48 = vsub.f32 %v392_v46, %v393_v47  ;;  %v831_v41 = vpop.f32.mrf.mxu2 }
 0x21e   :  { %934 = vperm.xlu1 %2049, %v394_v48  }
 0x222   :  { %v2402_v62 = vpop.f32.mrf.mxu3 }
 0x226   :  { %871 = vperm.xlu1 %2049, %v869_v50  }
 0x22a   :  { %v2404_v58 = vpop.f32.mrf.mxu3 }
 0x232   :  { %v2406_v61 = vpop.f32.mrf.mxu3 }
 0x23a   :  { %v2410_v4 = vpop.f32.mrf.mxu3 }
 0x242   :  { %v854_v6 = vpop.f32.mrf.mxu3 }
 0x24a   :  { %v856_v10 = vpop.f32.mrf.mxu3 }
 0x252   :  { %v859_v14 = vpop.f32.mrf.mxu3 }
 0x25a   :  { %v861_v16 = vpop.f32.mrf.mxu3 }
 0x262   :  { %v864_v18 = vpop.f32.mrf.mxu3 }
 0x26a   :  { %v866_v21 = vpop.f32.mrf.mxu3 }
 0x290   :  { %v935_v26 = vpop.permute.xlu1 %934 }
 0x291   :  { %v937_v30 = vperm.slane %v935_v26, 0 }
 0x293   :  { %v938_v34 = vmul.f32 %v937_v30, %v931_v31 }
 0x295   :  { %v2452_v40 = vperm.slane %v938_v34, 0 }
 0x298   :  { %v2441_v32 = vpop.permute.xlu1 %871 }
 0x299   :  { %v926_v36 = vmul.f32 %v2441_v32, %v854_v6  ;;  %v927_v37 = vmul.f32 %v2441_v32, %v856_v10  ;;  %v928_v20 = vmul.f32 %v2441_v32, %v859_v14  ;;  %v929_v38 = vmul.f32 %v2441_v32, %v861_v16 }
 0x29a   :  { %v930_v39 = vmul.f32 %v2441_v32, %v864_v18  ;;  %v874_v44 = vmul.f32 %v2441_v32, %v724_v59  ;;  %v907_v45 = vmul.f32 %v2441_v32, %v806_v57  ;;  %v908_v46 = vmul.f32 %v2441_v32, %v809_v42 }
 0x29b   :  { %v909_v47 = vmul.f32 %v2441_v32, %v811_v43  ;;  %v910_v48 = vmul.f32 %v2441_v32, %v814_v7  ;;  %v911_v50 = vmul.f32 %v2441_v32, %v816_v11  ;;  %v912_v6 = vmul.f32 %v2441_v32, %v819_v0  ;;  %v2470_v7 = vpop.f32.mrf.mxu1 }
 0x29c   :  { %v913_v10 = vmul.f32 %v2441_v32, %v821_v17  ;;  %v914_v14 = vmul.f32 %v2441_v32, %v824_v3  ;;  %v915_v16 = vmul.f32 %v2441_v32, %v826_v25  ;;  %v916_v59 = vmul.f32 %v2441_v32, %v829_v29 }
 0x29d   :  { %v917_v57 = vmul.f32 %v2441_v32, %v831_v41  ;;  %v918_v42 = vmul.f32 %v2441_v32, %v2386_v60  ;;  %v919_v43 = vmul.f32 %v2441_v32, %v2390_v51  ;;  %v920_v11 = vmul.f32 %v2441_v32, %v2394_v53  ;;  %v2486_v53 = vpop.f32.mrf.mxu0 }
 0x29e   :  { %v921_v0 = vmul.f32 %v2441_v32, %v2398_v55  ;;  %v922_v17 = vmul.f32 %v2441_v32, %v2402_v62  ;;  %v923_v18 = vmul.f32 %v2441_v32, %v2404_v58  ;;  %v924_v60 = vmul.f32 %v2441_v32, %v2406_v61 }
 0x29f   :  { %v925_v51 = vmul.f32 %v2441_v32, %v2410_v4  ;;  %v975_v3 = vadd.f32 %v2452_v40, %v907_v45  ;;  %v976_v21 = vadd.f32 %v2452_v40, %v908_v46  ;;  %v977_v55 = vadd.f32 %v2452_v40, %v909_v47 }
 0x2a0   :  { %v978_v25 = vadd.f32 %v2452_v40, %v910_v48  ;;  %v979_v62 = vadd.f32 %v2452_v40, %v911_v50  ;;  %v980_v58 = vadd.f32 %v2452_v40, %v912_v6  ;;  %v981_v26 = vadd.f32 %v2452_v40, %v913_v10 }
 0x2a1   :  { %v982_v61 = vadd.f32 %v2452_v40, %v914_v14  ;;  %v983_v4 = vadd.f32 %v2452_v40, %v915_v16  ;;  %v984_v29 = vadd.f32 %v2452_v40, %v916_v59  ;;  %v985_v30 = vadd.f32 %v2452_v40, %v917_v57 }
 0x2a2   :  { %v986_v31 = vadd.f32 %v2452_v40, %v918_v42  ;;  %v987_v34 = vadd.f32 %v2452_v40, %v919_v43  ;;  %v988_v41 = vadd.f32 %v2452_v40, %v920_v11  ;;  %v989_v45 = vadd.f32 %v2452_v40, %v921_v0 }
 0x2a3   :  { %v990_v46 = vadd.f32 %v2452_v40, %v922_v17  ;;  %v991_v47 = vadd.f32 %v2452_v40, %v923_v18  ;;  %v992_v48 = vadd.f32 %v2452_v40, %v924_v60  ;;  %v993_v50 = vadd.f32 %v2452_v40, %v925_v51  ;;  %v2514_v43 = vpop.f32.mrf.mxu1 }
 0x2a4   :  { %v994_v6 = vadd.f32 %v2452_v40, %v926_v36  ;;  %v995_v10 = vadd.f32 %v2452_v40, %v927_v37  ;;  %v996_v14 = vadd.f32 %v2452_v40, %v928_v20  ;;  %v875_v16 = vmul.f32 %v2441_v32, %v2408_v63  ;;  %v2523_v37 = vld [vmem:[%s3634_s4] ss:$0 sm:$0xff] }
 0x2a5   :  { %v876_v59 = vmul.f32 %v2441_v32, %v2412_v5  ;;  %v997_v57 = vadd.f32 %v2452_v40, %v929_v38  ;;  %v998_v42 = vadd.f32 %v2452_v40, %v930_v39  ;;  %v877_v11 = vmul.f32 %v2441_v32, %v2416_v9  ;;  %v751_v38 = vpop.f32.mrf.mxu0 }
 0x2a6   :  { %v878_v36 = vmul.f32 %v2441_v32, %v2420_v13  ;;  %v942_v63 = vadd.f32 %v2452_v40, %v874_v44  ;;  %v943_v5 = vadd.f32 %v2452_v40, %v875_v16  ;;  %v879_v39 = vmul.f32 %v2441_v32, %v2424_v1 }
 0x2a7   :  { %v944_v20 = vadd.f32 %v2452_v40, %v876_v59  ;;  %v880_v9 = vmul.f32 %v2441_v32, %v2428_v19  ;;  %v945_v13 = vadd.f32 %v2452_v40, %v877_v11  ;;  %v2544_v60 = vadd.f32 %v2523_v37, %v975_v3 }
 0x2a8   :  { %v946_v0 = vadd.f32 %v2452_v40, %v878_v36  ;;  %v2535_v17 = vadd.f32 %v2523_v37, %v942_v63  ;;  %v2538_v44 = vadd.f32 %v2523_v37, %v943_v5  ;;  %v2547_v1 = vadd.f32 %v2523_v37, %v976_v21 }
 0x2a9   :  { %v2541_v18 = vadd.f32 %v2523_v37, %v944_v20  ;;  %3665 = vst [vmem:[#allocation4_spill] sm:$0xff] %v2544_v60  ;;  %v2550_v19 = vadd.f32 %v2523_v37, %v977_v55  ;;  %v2553_v51 = vadd.f32 %v2523_v37, %v978_v25  ;;  %v2556_v16 = vadd.f32 %v2523_v37, %v979_v62 }
 0x2aa   :  { %3666 = vst [vmem:[#allocation5_spill] sm:$0xff] %v2547_v1  ;;  %v2559_v59 = vadd.f32 %v2523_v37, %v980_v58  ;;  %v2562_v11 = vadd.f32 %v2523_v37, %v981_v26  ;;  %v2565_v3 = vadd.f32 %v2523_v37, %v982_v61  ;;  %v2568_v21 = vadd.f32 %v2523_v37, %v983_v4 }
 0x2ab   :  { %3667 = vst [vmem:[#allocation6_spill] sm:$0xff] %v2550_v19  ;;  %v2571_v55 = vadd.f32 %v2523_v37, %v984_v29  ;;  %v2574_v25 = vadd.f32 %v2523_v37, %v985_v30  ;;  %v2577_v62 = vadd.f32 %v2523_v37, %v986_v31  ;;  %v2580_v58 = vadd.f32 %v2523_v37, %v987_v34  ;;  %v2594_v30 = vpop.f32.mrf.mxu1 }
 0x2ac   :  { %3668 = vst [vmem:[#allocation7_spill] sm:$0xff] %v2553_v51  ;;  %v2583_v26 = vadd.f32 %v2523_v37, %v988_v41  ;;  %v2586_v61 = vadd.f32 %v2523_v37, %v989_v45  ;;  %v2589_v4 = vadd.f32 %v2523_v37, %v990_v46  ;;  %v2592_v29 = vadd.f32 %v2523_v37, %v991_v47 }
 0x2ad   :  { %v2597_v31 = vadd.f32 %v2523_v37, %v992_v48  ;;  %v2600_v34 = vadd.f32 %v2523_v37, %v993_v50  ;;  %v2603_v41 = vadd.f32 %v2523_v37, %v994_v6  ;;  %v2606_v45 = vadd.f32 %v2523_v37, %v995_v10  ;;  %v754_v50 = vpop.f32.mrf.mxu0 }
 0x2ae   :  { %v2609_v46 = vadd.f32 %v2523_v37, %v996_v14  ;;  %v2612_v47 = vadd.f32 %v2523_v37, %v997_v57  ;;  %v2615_v36 = vadd.f32 %v2523_v37, %v998_v42  ;;  %v1060_v48 = vadd.f32 %v2538_v44, %v2535_v17 }
 0x2af   :  { %v881_v6 = vmul.f32 %v2441_v32, %v2432_v24  ;;  %v947_v63 = vadd.f32 %v2452_v40, %v879_v39  ;;  %v2623_v10 = vadd.f32 %v2523_v37, %v945_v13  ;;  %v882_v57 = vmul.f32 %v2441_v32, %v2436_v28 }
 0x2b0   :  { %v1061_v14 = vadd.f32 %v1060_v48, %v2541_v18  ;;  %v948_v42 = vadd.f32 %v2452_v40, %v880_v9  ;;  %v2630_v5 = vadd.f32 %v2523_v37, %v946_v0  ;;  %v883_v24 = vmul.f32 %v2441_v32, %v2445_v35 }
 0x2b1   :  { %3669 = vst [vmem:[#allocation8_spill] sm:$0xff] %v2623_v10  ;;  %v949_v39 = vadd.f32 %v2452_v40, %v881_v6  ;;  %v2637_v13 = vadd.f32 %v2523_v37, %v947_v63  ;;  %v884_v28 = vmul.f32 %v2441_v32, %v2486_v53  ;;  %v950_v9 = vadd.f32 %v2452_v40, %v882_v57 }
 0x2b2   :  { %3670 = vst [vmem:[#allocation9_spill] sm:$0xff] %v2630_v5  ;;  %v1062_v20 = vadd.f32 %v1061_v14, %v2623_v10  ;;  %v2644_v0 = vadd.f32 %v2523_v37, %v948_v42  ;;  %v885_v35 = vmul.f32 %v2441_v32, %v751_v38  ;;  %v951_v6 = vadd.f32 %v2452_v40, %v883_v24 }
 0x2b3   :  { %3671 = vst [vmem:[#allocation10_spill] sm:$0xff] %v2637_v13  ;;  %v784_v10 = vpop.f32.mrf.mxu1  ;;  %v2650_v63 = vadd.f32 %v2523_v37, %v949_v39  ;;  %v886_v53 = vmul.f32 %v2441_v32, %v754_v50  ;;  %v952_v57 = vadd.f32 %v2452_v40, %v884_v28  ;;  %v2656_v42 = vadd.f32 %v2523_v37, %v950_v9 }
 0x2b4   :  { %v1063_v48 = vadd.f32 %v1062_v20, %v2630_v5  ;;  %v953_v38 = vadd.f32 %v2452_v40, %v885_v35  ;;  %v2662_v24 = vadd.f32 %v2523_v37, %v951_v6 }
 0x2b5   :  { %v756_v5 = vpop.f32.mrf.mxu0  ;;  %v954_v50 = vadd.f32 %v2452_v40, %v886_v53  ;;  %v2669_v28 = vadd.f32 %v2523_v37, %v952_v57 }
 0x2b6   :  { %v1064_v14 = vadd.f32 %v1063_v48, %v2637_v13  ;;  %v887_v13 = vmul.f32 %v2441_v32, %v756_v5  ;;  %v889_v5 = vmul.f32 %v2441_v32, %v2418_v12  ;;  %v2676_v6 = vadd.f32 %v2523_v37, %v953_v38 }
 0x2b7   :  { %v2683_v57 = vadd.f32 %v2523_v37, %v954_v50  ;;  %v891_v12 = vmul.f32 %v2441_v32, %v2426_v2  ;;  %v893_v2 = vmul.f32 %v2441_v32, %v2434_v27  ;;  %v895_v27 = vmul.f32 %v2441_v32, %v2470_v7 }
 0x2b8   :  { %v1065_v20 = vadd.f32 %v1064_v14, %v2644_v0  ;;  %v888_v14 = vmul.f32 %v2441_v32, %v2414_v8  ;;  %v955_v35 = vadd.f32 %v2452_v40, %v887_v13  ;;  %v890_v8 = vmul.f32 %v2441_v32, %v2422_v15 }
 0x2b9   :  { %v957_v13 = vadd.f32 %v2452_v40, %v889_v5  ;;  %v892_v15 = vmul.f32 %v2441_v32, %v2430_v23  ;;  %v959_v5 = vadd.f32 %v2452_v40, %v891_v12  ;;  %v894_v23 = vmul.f32 %v2441_v32, %v2443_v33 }
 0x2ba   :  { %v1066_v48 = vadd.f32 %v1065_v20, %v2650_v63  ;;  %v956_v53 = vadd.f32 %v2452_v40, %v888_v14  ;;  %v2690_v38 = vadd.f32 %v2523_v37, %v955_v35  ;;  %v958_v14 = vadd.f32 %v2452_v40, %v890_v8 }
 0x2bb   :  { %v2704_v35 = vadd.f32 %v2523_v37, %v957_v13  ;;  %v960_v8 = vadd.f32 %v2452_v40, %v892_v15  ;;  %v961_v12 = vadd.f32 %v2452_v40, %v893_v2  ;;  %v2718_v13 = vadd.f32 %v2523_v37, %v959_v5 }
 0x2bc   :  { %v1067_v39 = vadd.f32 %v1066_v48, %v2656_v42  ;;  %v786_v48 = vpop.f32.mrf.mxu1  ;;  %3672 = vst [vmem:[#allocation11_spill] sm:$0xff] %v2690_v38  ;;  %v2697_v50 = vadd.f32 %v2523_v37, %v956_v53  ;;  %v2711_v53 = vadd.f32 %v2523_v37, %v958_v14  ;;  %v896_v33 = vmul.f32 %v2441_v32, %v2514_v43 }
 0x2bd   :  { %3674 = vst [vmem:[#allocation13_spill] sm:$0xff] %v2718_v13  ;;  %v962_v15 = vadd.f32 %v2452_v40, %v894_v23  ;;  %v2725_v14 = vadd.f32 %v2523_v37, %v960_v8  ;;  %v897_v7 = vmul.f32 %v2441_v32, %v2594_v30  ;;  %v963_v2 = vadd.f32 %v2452_v40, %v895_v27 }
 0x2be   :  { %v1068_v9 = vadd.f32 %v1067_v39, %v2662_v24  ;;  %3673 = vst [vmem:[#allocation12_spill] sm:$0xff] %v2711_v53  ;;  %v2732_v5 = vadd.f32 %v2523_v37, %v961_v12  ;;  %v964_v43 = vadd.f32 %v2452_v40, %v896_v33 }
 0x2bf   :  { %v2738_v23 = vadd.f32 %v2523_v37, %v962_v15  ;;  %v965_v30 = vadd.f32 %v2452_v40, %v897_v7  ;;  %v2744_v27 = vadd.f32 %v2523_v37, %v963_v2 }
 0x2c0   :  { %v1069_v20 = vadd.f32 %v1068_v9, %v2669_v28  ;;  %v2750_v33 = vadd.f32 %v2523_v37, %v964_v43 }
 0x2c1   :  { %v2756_v7 = vadd.f32 %v2523_v37, %v965_v30 }
 0x2c2   :  { %v1070_v39 = vadd.f32 %v1069_v20, %v2676_v6 }
 0x2c4   :  { %v1071_v9 = vadd.f32 %v1070_v39, %v2683_v57 }
 0x2c6   :  { %v1072_v20 = vadd.f32 %v1071_v9, %v2690_v38  ;;  %v789_v38 = vpop.f32.mrf.mxu1 }
 0x2c8   :  { %v1073_v39 = vadd.f32 %v1072_v20, %v2697_v50 }
 0x2ca   :  { %v1074_v9 = vadd.f32 %v1073_v39, %v2704_v35 }
 0x2cc   :  { %v1075_v20 = vadd.f32 %v1074_v9, %v2711_v53  ;;  %v898_v53 = vmul.f32 %v2441_v32, %v784_v10 }
 0x2ce   :  { %v1076_v39 = vadd.f32 %v1075_v20, %v2718_v13  ;;  %v899_v20 = vmul.f32 %v2441_v32, %v786_v48  ;;  %v791_v13 = vpop.f32.mrf.mxu1  ;;  %v966_v10 = vadd.f32 %v2452_v40, %v898_v53 }
 0x2d0   :  { %v1077_v9 = vadd.f32 %v1076_v39, %v2725_v14  ;;  %v900_v39 = vmul.f32 %v2441_v32, %v789_v38  ;;  %v967_v48 = vadd.f32 %v2452_v40, %v899_v20  ;;  %v2763_v53 = vadd.f32 %v2523_v37, %v966_v10 }
 0x2d2   :  { %v1078_v8 = vadd.f32 %v1077_v9, %v2732_v5  ;;  %v901_v9 = vmul.f32 %v2441_v32, %v791_v13  ;;  %v968_v38 = vadd.f32 %v2452_v40, %v900_v39  ;;  %v903_v13 = vmul.f32 %v2441_v32, %v2388_v49 }
 0x2d3   :  { %v2770_v30 = vadd.f32 %v2523_v37, %v967_v48  ;;  %v905_v49 = vmul.f32 %v2441_v32, %v2396_v54 }
 0x2d4   :  { %v1079_v12 = vadd.f32 %v1078_v8, %v2738_v23  ;;  %v902_v8 = vmul.f32 %v2441_v32, %v2383_v22  ;;  %v969_v20 = vadd.f32 %v2452_v40, %v901_v9  ;;  %v904_v22 = vmul.f32 %v2441_v32, %v2392_v52 }
 0x2d5   :  { %v2777_v10 = vadd.f32 %v2523_v37, %v968_v38  ;;  %v971_v9 = vadd.f32 %v2452_v40, %v903_v13  ;;  %v906_v52 = vmul.f32 %v2441_v32, %v2400_v56 }
 0x2d6   :  { %v1080_v15 = vadd.f32 %v1079_v12, %v2744_v27  ;;  %v970_v39 = vadd.f32 %v2452_v40, %v902_v8  ;;  %v2784_v48 = vadd.f32 %v2523_v37, %v969_v20  ;;  %v972_v8 = vadd.f32 %v2452_v40, %v904_v22 }
 0x2d7   :  { %v2796_v54 = vadd.f32 %v2523_v37, %v971_v9  ;;  %v974_v20 = vadd.f32 %v2452_v40, %v906_v52 }
 0x2d8   :  { %v1081_v2 = vadd.f32 %v1080_v15, %v2750_v33  ;;  %v2791_v38 = vadd.f32 %v2523_v37, %v970_v39 }
 0x2d9   :  { %v2809_v39 = vadd.f32 %v2523_v37, %v974_v20 }
 0x2da   :  { %v1082_v43 = vadd.f32 %v1081_v2, %v2756_v7 }
 0x2dc   :  { %v1083_v12 = vadd.f32 %v1082_v43, %v2763_v53 }
 0x2de   :  { %v1084_v15 = vadd.f32 %v1083_v12, %v2770_v30  ;;  %v973_v12 = vadd.f32 %v2452_v40, %v905_v49 }
 0x2e0   :  { %v1085_v2 = vadd.f32 %v1084_v15, %v2777_v10  ;;  %v2801_v15 = vadd.f32 %v2523_v37, %v972_v8  ;;  %v2805_v32 = vadd.f32 %v2523_v37, %v973_v12 }
 0x2e2   :  { %v1086_v43 = vadd.f32 %v1085_v2, %v2784_v48 }
 0x2e4   :  { %v1087_v13 = vadd.f32 %v1086_v43, %v2791_v38 }
 0x2e6   :  { %v1088_v56 = vadd.f32 %v1087_v13, %v2796_v54 }
 0x2e8   :  { %v1089_v22 = vadd.f32 %v1088_v56, %v2801_v15 }
 0x2ea   :  { %v1090_v49 = vadd.f32 %v1089_v22, %v2805_v32 }
 0x2ec   :  { %v1091_v9 = vadd.f32 %v1090_v49, %v2809_v39 }
 0x2ee   :  { %v1092_v2 = vadd.f32 %v1091_v9, %v2544_v60 }
 0x2f0   :  { %v1093_v40 = vadd.f32 %v1092_v2, %v2547_v1 }
 0x2f2   :  { %v1094_v52 = vadd.f32 %v1093_v40, %v2550_v19 }
 0x2f4   :  { %v1095_v8 = vadd.f32 %v1094_v52, %v2553_v51 }
 0x2f6   :  { %v1096_v43 = vadd.f32 %v1095_v8, %v2556_v16 }
 0x2f8   :  { %v1097_v12 = vadd.f32 %v1096_v43, %v2559_v59 }
 0x2fa   :  { %v1098_v13 = vadd.f32 %v1097_v12, %v2562_v11 }
 0x2fc   :  { %v1099_v37 = vadd.f32 %v1098_v13, %v2565_v3 }
 0x2fe   :  { %v1100_v20 = vadd.f32 %v1099_v37, %v2568_v21  ;;  %v2064_v37 = vmov 450.0  }
 0x2ff   :  { %2058 = vrcp.f32 %v2064_v37 }
 0x300   :  { %v1101_v56 = vadd.f32 %v1100_v20, %v2571_v55 }
 0x302   :  { %v1102_v22 = vadd.f32 %v1101_v56, %v2574_v25 }
 0x304   :  { %v1103_v49 = vadd.f32 %v1102_v22, %v2577_v62 }
 0x306   :  { %v1104_v9 = vadd.f32 %v1103_v49, %v2580_v58  ;;  %v2059_v49 = vpop.eup %2058 }
 0x307   :  { %vm1128_vm6 = vweird.f32 %v2059_v49 }
 0x308   :  { %v1105_v2 = vadd.f32 %v1104_v9, %v2583_v26  ;;  %v1115_v9 = vsel %vm126_vm0, %v2615_v36, 0.0 }
 0x30a   :  { %v1106_v40 = vadd.f32 %v1105_v2, %v2586_v61 }
 0x30c   :  { %v1107_v52 = vadd.f32 %v1106_v40, %v2589_v4  ;;  %v1124_v40 = vmul.f32 450.0, %v2059_v49 }
 0x30e   :  { %v1108_v8 = vadd.f32 %v1107_v52, %v2592_v29  ;;  %v1125_v51 = vsub.f32 1.0, %v1124_v40 }
 0x310   :  { %v1109_v43 = vadd.f32 %v1108_v8, %v2597_v31 }
 0x312   :  { %v1110_v12 = vadd.f32 %v1109_v43, %v2600_v34 }
 0x314   :  { %v1111_v13 = vadd.f32 %v1110_v12, %v2603_v41  ;;  %v1126_v12 = vmul.f32 %v2059_v49, %v1125_v51 }
 0x316   :  { %v1112_v20 = vadd.f32 %v1111_v13, %v2606_v45  ;;  %v1127_v37 = vadd.f32 %v2059_v49, %v1126_v12 }
 0x318   :  { %v1113_v56 = vadd.f32 %v1112_v20, %v2609_v46  ;;  %v2838_v60 = vsel %vm1128_vm6, %v2059_v49, %v1127_v37 }
 0x31a   :  { %v1114_v22 = vadd.f32 %v1113_v56, %v2612_v47 }
 0x31c   :  { %v1116_v2 = vadd.f32 %v1115_v9, %v1114_v22 }
 0x31e   :  { %v1117_v52 = vrot.slane %v1116_v2, 4 }
 0x320   :  { %v1118_v8 = vadd.f32 %v1117_v52, %v1116_v2 }
 0x322   :  { %v1119_v43 = vrot.slane %v1118_v8, 2 }
 0x324   :  { %v1120_v19 = vadd.f32 %v1119_v43, %v1118_v8 }
 0x326   :  { %v1121_v1 = vrot.slane %v1120_v19, 1 }
 0x328   :  { %v1122_v13 = vadd.f32 %v1121_v1, %v1120_v19 }
 0x32a   :  { %v2841_v20 = vmul.f32 %v2838_v60, %v1122_v13 }
 0x32c   :  { %v2845_v56 = vsub.f32 %v2556_v16, %v2841_v20  ;;  %v2849_v22 = vsub.f32 %v2559_v59, %v2841_v20  ;;  %v2853_v51 = vsub.f32 %v2562_v11, %v2841_v20  ;;  %v2857_v1 = vsub.f32 %v2565_v3, %v2841_v20 }
 0x32d   :  { %v2861_v19 = vsub.f32 %v2568_v21, %v2841_v20  ;;  %v2865_v16 = vsub.f32 %v2571_v55, %v2841_v20  ;;  %v2869_v59 = vsub.f32 %v2574_v25, %v2841_v20  ;;  %v2873_v11 = vsub.f32 %v2577_v62, %v2841_v20 }
 0x32e   :  { %v2877_v3 = vsub.f32 %v2580_v58, %v2841_v20  ;;  %v2881_v21 = vsub.f32 %v2583_v26, %v2841_v20  ;;  %v2885_v55 = vsub.f32 %v2586_v61, %v2841_v20  ;;  %v2889_v25 = vsub.f32 %v2589_v4, %v2841_v20 }
 0x32f   :  { %v2893_v62 = vsub.f32 %v2592_v29, %v2841_v20  ;;  %v2897_v58 = vsub.f32 %v2597_v31, %v2841_v20  ;;  %v2901_v26 = vsub.f32 %v2600_v34, %v2841_v20  ;;  %v2905_v61 = vsub.f32 %v2603_v41, %v2841_v20 }
 0x330   :  { %v2909_v4 = vsub.f32 %v2606_v45, %v2841_v20  ;;  %v2913_v29 = vsub.f32 %v2609_v46, %v2841_v20  ;;  %v2917_v31 = vsub.f32 %v2612_v47, %v2841_v20  ;;  %v2921_v34 = vsub.f32 %v2535_v17, %v2841_v20  ;;  %v3681_v47 = vld [vmem:[#allocation8_spill] sm:$0xff]  ;;  %v3682_v17 = vld [vmem:[#allocation9_spill] sm:$0xff] }
 0x331   :  { %3675 = vst [vmem:[#allocation14_spill] sm:$0xff] %v2897_v58  ;;  %v2925_v41 = vsub.f32 %v2538_v44, %v2841_v20  ;;  %v2929_v45 = vsub.f32 %v2541_v18, %v2841_v20  ;;  %v2937_v9 = vsub.f32 %v3681_v47, %v2841_v20  ;;  %v2941_v2 = vsub.f32 %v3682_v17, %v2841_v20  ;;  %v3683_v18 = vld [vmem:[#allocation10_spill] sm:$0xff] }
 0x332   :  { %3676 = vst [vmem:[#allocation15_spill] sm:$0xff] %v2901_v26  ;;  %v1188_v46 = vmul.f32 %v2921_v34, %v2921_v34  ;;  %v2947_v52 = vsub.f32 %v3683_v18, %v2841_v20  ;;  %v2953_v12 = vsub.f32 %v2644_v0, %v2841_v20  ;;  %v2959_v47 = vsub.f32 %v2650_v63, %v2841_v20 }
 0x333   :  { %3677 = vst [vmem:[#allocation16_spill] sm:$0xff] %v2905_v61  ;;  %v1189_v49 = vmul.f32 %v2925_v41, %v2925_v41  ;;  %v1190_v44 = vmul.f32 %v2929_v45, %v2929_v45  ;;  %v1191_v8 = vmul.f32 %v2937_v9, %v2937_v9  ;;  %v1192_v37 = vmul.f32 %v2941_v2, %v2941_v2 }
 0x334   :  { %3678 = vst [vmem:[#allocation17_spill] sm:$0xff] %v2909_v4  ;;  %v2965_v17 = vsub.f32 %v2656_v42, %v2841_v20  ;;  %v1194_v0 = vmul.f32 %v2953_v12, %v2953_v12  ;;  %v1195_v63 = vmul.f32 %v2959_v47, %v2959_v47 }
 0x335   :  { %3679 = vst [vmem:[#allocation18_spill] sm:$0xff] %v2913_v29  ;;  %v1245_v40 = vadd.f32 %v1189_v49, %v1188_v46  ;;  %v1193_v46 = vmul.f32 %v2947_v52, %v2947_v52 }
 0x336   :  { %3680 = vst [vmem:[#allocation19_spill] sm:$0xff] %v2917_v31  ;;  %v1196_v42 = vmul.f32 %v2965_v17, %v2965_v17 }
 0x337   :  { %v1246_v43 = vadd.f32 %v1245_v40, %v1190_v44  ;;  %v2971_v40 = vsub.f32 %v2662_v24, %v2841_v20 }
 0x339   :  { %v1247_v13 = vadd.f32 %v1246_v43, %v1191_v8  ;;  %v2977_v8 = vsub.f32 %v2669_v28, %v2841_v20  ;;  %v1197_v24 = vmul.f32 %v2971_v40, %v2971_v40 }
 0x33b   :  { %v1248_v49 = vadd.f32 %v1247_v13, %v1192_v37  ;;  %v2983_v37 = vsub.f32 %v2676_v6, %v2841_v20  ;;  %v1198_v28 = vmul.f32 %v2977_v8, %v2977_v8 }
 0x33d   :  { %v1249_v44 = vadd.f32 %v1248_v49, %v1193_v46  ;;  %3684 = vst [vmem:[#allocation8_spill] sm:$0xff] %v2983_v37  ;;  %v2989_v46 = vsub.f32 %v2683_v57, %v2841_v20  ;;  %v1199_v6 = vmul.f32 %v2983_v37, %v2983_v37 }
 0x33f   :  { %v1250_v18 = vadd.f32 %v1249_v44, %v1194_v0  ;;  %3685 = vst [vmem:[#allocation9_spill] sm:$0xff] %v2989_v46  ;;  %v3686_v0 = vld [vmem:[#allocation11_spill] sm:$0xff]  ;;  %v1200_v57 = vmul.f32 %v2989_v46, %v2989_v46 }
 0x340   :  { %v2995_v44 = vsub.f32 %v3686_v0, %v2841_v20  ;;  %v3687_v0 = vld [vmem:[#allocation12_spill] sm:$0xff] }
 0x341   :  { %v1251_v43 = vadd.f32 %v1250_v18, %v1195_v63  ;;  %v3001_v18 = vsub.f32 %v2697_v50, %v2841_v20  ;;  %v3013_v37 = vsub.f32 %v3687_v0, %v2841_v20  ;;  %v3031_v0 = vsub.f32 %v2732_v5, %v2841_v20 }
 0x343   :  { %v1252_v13 = vadd.f32 %v1251_v43, %v1196_v42  ;;  %v3007_v43 = vsub.f32 %v2704_v35, %v2841_v20  ;;  %v1202_v50 = vmul.f32 %v3001_v18, %v3001_v18  ;;  %v1207_v5 = vmul.f32 %v3031_v0, %v3031_v0 }
 0x345   :  { %v1253_v49 = vadd.f32 %v1252_v13, %v1197_v24  ;;  %v1201_v24 = vmul.f32 %v2995_v44, %v2995_v44  ;;  %v1203_v35 = vmul.f32 %v3007_v43, %v3007_v43 }
 0x347   :  { %v1254_v63 = vadd.f32 %v1253_v49, %v1198_v28  ;;  %v3688_v49 = vld [vmem:[#allocation13_spill] sm:$0xff] }
 0x348   :  { %v3019_v46 = vsub.f32 %v3688_v49, %v2841_v20  ;;  %v3037_v49 = vsub.f32 %v2738_v23, %v2841_v20 }
 0x349   :  { %v1255_v42 = vadd.f32 %v1254_v63, %v1199_v6  ;;  %v3025_v63 = vsub.f32 %v2725_v14, %v2841_v20 }
 0x34a   :  { %v1208_v23 = vmul.f32 %v3037_v49, %v3037_v49 }
 0x34b   :  { %v1256_v13 = vadd.f32 %v1255_v42, %v1200_v57  ;;  %v1204_v57 = vmul.f32 %v3013_v37, %v3013_v37  ;;  %v1206_v14 = vmul.f32 %v3025_v63, %v3025_v63 }
 0x34d   :  { %v1257_v28 = vadd.f32 %v1256_v13, %v1201_v24  ;;  %v1205_v24 = vmul.f32 %v3019_v46, %v3019_v46 }
 0x34f   :  { %v1258_v6 = vadd.f32 %v1257_v28, %v1202_v50  ;;  %v3043_v28 = vsub.f32 %v2744_v27, %v2841_v20 }
 0x351   :  { %v1259_v42 = vadd.f32 %v1258_v6, %v1203_v35  ;;  %v3049_v6 = vsub.f32 %v2750_v33, %v2841_v20  ;;  %v1209_v27 = vmul.f32 %v3043_v28, %v3043_v28 }
 0x353   :  { %v1260_v13 = vadd.f32 %v1259_v42, %v1204_v57  ;;  %v3055_v42 = vsub.f32 %v2756_v7, %v2841_v20  ;;  %v1210_v33 = vmul.f32 %v3049_v6, %v3049_v6 }
 0x355   :  { %v1261_v50 = vadd.f32 %v1260_v13, %v1205_v24  ;;  %v3061_v13 = vsub.f32 %v2763_v53, %v2841_v20  ;;  %v1211_v7 = vmul.f32 %v3055_v42, %v3055_v42 }
 0x357   :  { %v1262_v35 = vadd.f32 %v1261_v50, %v1206_v14  ;;  %v3067_v50 = vsub.f32 %v2770_v30, %v2841_v20  ;;  %v1212_v53 = vmul.f32 %v3061_v13, %v3061_v13 }
 0x359   :  { %v1263_v57 = vadd.f32 %v1262_v35, %v1207_v5  ;;  %v3073_v35 = vsub.f32 %v2777_v10, %v2841_v20  ;;  %v1213_v30 = vmul.f32 %v3067_v50, %v3067_v50 }
 0x35b   :  { %v1264_v24 = vadd.f32 %v1263_v57, %v1208_v23  ;;  %v3079_v57 = vsub.f32 %v2784_v48, %v2841_v20  ;;  %v1214_v10 = vmul.f32 %v3073_v35, %v3073_v35 }
 0x35d   :  { %v1265_v14 = vadd.f32 %v1264_v24, %v1209_v27  ;;  %v3085_v24 = vsub.f32 %v2791_v38, %v2841_v20  ;;  %v1215_v48 = vmul.f32 %v3079_v57, %v3079_v57 }
 0x35f   :  { %v1266_v5 = vadd.f32 %v1265_v14, %v1210_v33  ;;  %3689 = vst [vmem:[#allocation10_spill] sm:$0xff] %v3085_v24  ;;  %v3091_v14 = vsub.f32 %v2796_v54, %v2841_v20  ;;  %v1216_v38 = vmul.f32 %v3085_v24, %v3085_v24 }
 0x361   :  { %v1267_v23 = vadd.f32 %v1266_v5, %v1211_v7  ;;  %3690 = vst [vmem:[#allocation11_spill] sm:$0xff] %v3091_v14  ;;  %v3097_v5 = vsub.f32 %v2801_v15, %v2841_v20  ;;  %v1217_v54 = vmul.f32 %v3091_v14, %v3091_v14 }
 0x363   :  { %v1268_v27 = vadd.f32 %v1267_v23, %v1212_v53  ;;  %3691 = vst [vmem:[#allocation12_spill] sm:$0xff] %v3097_v5  ;;  %v3103_v23 = vsub.f32 %v2805_v32, %v2841_v20  ;;  %v1218_v15 = vmul.f32 %v3097_v5, %v3097_v5 }
 0x365   :  { %v1269_v33 = vadd.f32 %v1268_v27, %v1213_v30  ;;  %3692 = vst [vmem:[#allocation13_spill] sm:$0xff] %v3103_v23  ;;  %v3109_v27 = vsub.f32 %v2809_v39, %v2841_v20  ;;  %v1219_v32 = vmul.f32 %v3103_v23, %v3103_v23 }
 0x367   :  { %v1270_v7 = vadd.f32 %v1269_v33, %v1214_v10  ;;  %v3693_v33 = vld [vmem:[#allocation4_spill] sm:$0xff]  ;;  %v1220_v39 = vmul.f32 %v3109_v27, %v3109_v27 }
 0x368   :  { %v3115_v24 = vsub.f32 %v3693_v33, %v2841_v20  ;;  %v3698_v33 = vld [vmem:[#allocation7_spill] sm:$0xff] }
 0x369   :  { %v1271_v53 = vadd.f32 %v1270_v7, %v1215_v48  ;;  %v3695_v7 = vld [vmem:[#allocation5_spill] sm:$0xff]  ;;  %v3133_v23 = vsub.f32 %v3698_v33, %v2841_v20 }
 0x36a   :  { %3694 = vst [vmem:[#allocation4_spill] sm:$0xff] %v3115_v24  ;;  %v3121_v14 = vsub.f32 %v3695_v7, %v2841_v20 }
 0x36b   :  { %v1272_v30 = vadd.f32 %v1271_v53, %v1216_v38  ;;  %v3697_v53 = vld [vmem:[#allocation6_spill] sm:$0xff] }
 0x36c   :  { %3696 = vst [vmem:[#allocation5_spill] sm:$0xff] %v3121_v14  ;;  %v3127_v5 = vsub.f32 %v3697_v53, %v2841_v20 }
 0x36d   :  { %v1273_v10 = vadd.f32 %v1272_v30, %v1217_v54  ;;  %v1221_v54 = vmul.f32 %v3115_v24, %v3115_v24  ;;  %v1225_v24 = vmul.f32 %v2845_v56, %v2845_v56 }
 0x36e   :  { %v1223_v7 = vmul.f32 %v3127_v5, %v3127_v5 }
 0x36f   :  { %v1274_v48 = vadd.f32 %v1273_v10, %v1218_v15  ;;  %v1222_v15 = vmul.f32 %v3121_v14, %v3121_v14  ;;  %v1227_v14 = vmul.f32 %v2853_v51, %v2853_v51 }
 0x371   :  { %v1275_v38 = vadd.f32 %v1274_v48, %v1219_v32  ;;  %v1224_v48 = vmul.f32 %v3133_v23, %v3133_v23 }
 0x373   :  { %v1276_v30 = vadd.f32 %v1275_v38, %v1220_v39  ;;  %v1226_v38 = vmul.f32 %v2849_v22, %v2849_v22 }
 0x375   :  { %v1277_v10 = vadd.f32 %v1276_v30, %v1221_v54  ;;  %v1228_v30 = vmul.f32 %v2857_v1, %v2857_v1 }
 0x377   :  { %v1278_v32 = vadd.f32 %v1277_v10, %v1222_v15  ;;  %v1229_v10 = vmul.f32 %v2861_v19, %v2861_v19 }
 0x379   :  { %v1279_v53 = vadd.f32 %v1278_v32, %v1223_v7  ;;  %v1230_v32 = vmul.f32 %v2865_v16, %v2865_v16 }
 0x37b   :  { %v1280_v39 = vadd.f32 %v1279_v53, %v1224_v48  ;;  %v1231_v53 = vmul.f32 %v2869_v59, %v2869_v59 }
 0x37d   :  { %v1281_v33 = vadd.f32 %v1280_v39, %v1225_v24  ;;  %v1232_v39 = vmul.f32 %v2873_v11, %v2873_v11 }
 0x37f   :  { %v1282_v54 = vadd.f32 %v1281_v33, %v1226_v38  ;;  %v1233_v33 = vmul.f32 %v2877_v3, %v2877_v3 }
 0x381   :  { %v1283_v15 = vadd.f32 %v1282_v54, %v1227_v14  ;;  %v1234_v54 = vmul.f32 %v2881_v21, %v2881_v21 }
 0x383   :  { %v1284_v7 = vadd.f32 %v1283_v15, %v1228_v30  ;;  %v1235_v15 = vmul.f32 %v2885_v55, %v2885_v55 }
 0x385   :  { %v1285_v48 = vadd.f32 %v1284_v7, %v1229_v10  ;;  %v1236_v7 = vmul.f32 %v2889_v25, %v2889_v25 }
 0x387   :  { %v1286_v24 = vadd.f32 %v1285_v48, %v1230_v32  ;;  %v1237_v48 = vmul.f32 %v2893_v62, %v2893_v62 }
 0x389   :  { %v1287_v38 = vadd.f32 %v1286_v24, %v1231_v53  ;;  %v1238_v24 = vmul.f32 %v2897_v58, %v2897_v58 }
 0x38b   :  { %v1288_v14 = vadd.f32 %v1287_v38, %v1232_v39  ;;  %v1239_v38 = vmul.f32 %v2901_v26, %v2901_v26 }
 0x38d   :  { %v1289_v30 = vadd.f32 %v1288_v14, %v1233_v33  ;;  %v1240_v14 = vmul.f32 %v2905_v61, %v2905_v61 }
 0x38f   :  { %v1290_v10 = vadd.f32 %v1289_v30, %v1234_v54  ;;  %v3175_v30 = vsub.f32 %v2615_v36, %v2841_v20 }
 0x391   :  { %v1291_v32 = vadd.f32 %v1290_v10, %v1235_v15  ;;  %3699 = vst [vmem:[#allocation6_spill] sm:$0xff] %v3175_v30  ;;  %v1241_v15 = vmul.f32 %v2909_v4, %v2909_v4 }
 0x393   :  { %v1292_v53 = vadd.f32 %v1291_v32, %v1236_v7  ;;  %v1242_v7 = vmul.f32 %v2913_v29, %v2913_v29 }
 0x395   :  { %v1293_v39 = vadd.f32 %v1292_v53, %v1237_v48  ;;  %v1244_v48 = vmul.f32 %v3175_v30, %v3175_v30  ;;  %v1243_v53 = vmul.f32 %v2917_v31, %v2917_v31 }
 0x397   :  { %v1294_v33 = vadd.f32 %v1293_v39, %v1238_v24 }
 0x399   :  { %v1295_v54 = vadd.f32 %v1294_v33, %v1239_v38  ;;  %v1300_v38 = vsel %vm126_vm0, %v1244_v48, 0.0 }
 0x39b   :  { %v1296_v10 = vadd.f32 %v1295_v54, %v1240_v14 }
 0x39d   :  { %v1297_v32 = vadd.f32 %v1296_v10, %v1241_v15 }
 0x39f   :  { %v1298_v24 = vadd.f32 %v1297_v32, %v1242_v7 }
 0x3a1   :  { %v1299_v39 = vadd.f32 %v1298_v24, %v1243_v53  ;;  %v3700_v24 = vld [vmem:[#allocation8_spill] sm:$0xff] }
 0x3a3   :  { %v1301_v36 = vadd.f32 %v1300_v38, %v1299_v39  ;;  %v3701_v39 = vld [vmem:[#allocation9_spill] sm:$0xff] }
 0x3a5   :  { %v1302_v20 = vrot.slane %v1301_v36, 4 }
 0x3a7   :  { %v1303_v33 = vadd.f32 %v1302_v20, %v1301_v36  ;;  %v3702_v20 = vld [vmem:[#allocation10_spill] sm:$0xff] }
 0x3a9   :  { %v1304_v61 = vrot.slane %v1303_v33, 2 }
 0x3ab   :  { %v1305_v4 = vadd.f32 %v1304_v61, %v1303_v33  ;;  %v3703_v33 = vld [vmem:[#allocation11_spill] sm:$0xff] }
 0x3ad   :  { %v1306_v14 = vrot.slane %v1305_v4, 1 }
 0x3af   :  { %v1307_v54 = vadd.f32 %v1306_v14, %v1305_v4  ;;  %v3704_v14 = vld [vmem:[#allocation12_spill] sm:$0xff] }
 0x3b1   :  { %v1308_v29 = vmul.f32 %v1307_v54, %v2838_v60  ;;  %v3705_v54 = vld [vmem:[#allocation13_spill] sm:$0xff] }
 0x3b3   :  { %v1309_v15 = vadd.f32 1e-05, %v1308_v29 }
 0x3b5   :  { %2060 = vrsqrt.f32 %v1309_v15  ;;  %vm1316_vm8 = vweird.f32 %v1309_v15 }
 0x3bb   :  { %v2061_v10 = vpop.eup %2060 }
 0x3bc   :  { %v1311_v30 = vmul.f32 %v2061_v10, %v1309_v15  ;;  %vm1317_vm7 = vweird.f32 %v2061_v10  ;;  %v3706_v15 = vld [vmem:[#allocation4_spill] sm:$0xff] }
 0x3bd   :  { %vm1318_vm9 = vmor %vm1316_vm8, %vm1317_vm7 }
 0x3be   :  { %v1312_v26 = vmul.f32 %v2061_v10, %v1311_v30 }
 0x3c0   :  { %v1313_v58 = vmul.f32 0.5, %v1312_v26 }
 0x3c2   :  { %v1314_v31 = vsub.f32 1.5, %v1313_v58 }
 0x3c4   :  { %v1315_v7 = vmul.f32 %v2061_v10, %v1314_v31 }
 0x3c6   :  { %v1319_v32 = vsel %vm1318_vm9, %v2061_v10, %v1315_v7  ;;  %v3707_v10 = vld [vmem:[#allocation5_spill] sm:$0xff]  ;;  %v3228_v7 = vld [vmem:[%s3635_s7] ss:$0 sm:$0xff] }
 0x3c7   :  { %v1320_v48 = vmul.f32 %v1319_v32, %v2921_v34  ;;  %v1321_v61 = vmul.f32 %v1319_v32, %v2925_v41  ;;  %v1322_v4 = vmul.f32 %v1319_v32, %v2929_v45  ;;  %v1323_v60 = vmul.f32 %v1319_v32, %v2937_v9  ;;  %3708 = vst [vmem:[#allocation7_spill] sm:$0xff] %v3228_v7  ;;  %v3711_v7 = vld [vmem:[#allocation16_spill] sm:$0xff] }
 0x3c8   :  { %v1324_v29 = vmul.f32 %v1319_v32, %v2941_v2  ;;  %v1325_v53 = vmul.f32 %v1319_v32, %v2947_v52  ;;  %v1326_v26 = vmul.f32 %v1319_v32, %v2953_v12  ;;  %v1327_v58 = vmul.f32 %v1319_v32, %v2959_v47 }
 0x3c9   :  { %v1328_v31 = vmul.f32 %v1319_v32, %v2965_v17  ;;  %v1329_v30 = vmul.f32 %v1319_v32, %v2971_v40  ;;  %v1330_v34 = vmul.f32 %v1319_v32, %v2977_v8  ;;  %v1331_v41 = vmul.f32 %v1319_v32, %v3700_v24 }
 0x3ca   :  { %v1332_v45 = vmul.f32 %v1319_v32, %v3701_v39  ;;  %v1333_v9 = vmul.f32 %v1319_v32, %v2995_v44  ;;  %v1334_v2 = vmul.f32 %v1319_v32, %v3001_v18  ;;  %v1335_v52 = vmul.f32 %v1319_v32, %v3007_v43 }
 0x3cb   :  { %v1336_v12 = vmul.f32 %v1319_v32, %v3013_v37  ;;  %v1337_v47 = vmul.f32 %v1319_v32, %v3019_v46  ;;  %v1338_v17 = vmul.f32 %v1319_v32, %v3025_v63  ;;  %v1339_v40 = vmul.f32 %v1319_v32, %v3031_v0 }
 0x3cc   :  { %v1340_v8 = vmul.f32 %v1319_v32, %v3037_v49  ;;  %v1341_v38 = vmul.f32 %v1319_v32, %v3043_v28  ;;  %v1342_v36 = vmul.f32 %v1319_v32, %v3049_v6  ;;  %v1343_v44 = vmul.f32 %v1319_v32, %v3055_v42 }
 0x3cd   :  { %v1344_v18 = vmul.f32 %v1319_v32, %v3061_v13  ;;  %v1345_v43 = vmul.f32 %v1319_v32, %v3067_v50  ;;  %v1346_v37 = vmul.f32 %v1319_v32, %v3073_v35  ;;  %v1347_v46 = vmul.f32 %v1319_v32, %v3079_v57 }
 0x3ce   :  { %v1348_v63 = vmul.f32 %v1319_v32, %v3702_v20  ;;  %v1349_v0 = vmul.f32 %v1319_v32, %v3703_v33  ;;  %v1350_v49 = vmul.f32 %v1319_v32, %v3704_v14  ;;  %v1351_v28 = vmul.f32 %v1319_v32, %v3705_v54 }
 0x3cf   :  { %v1352_v6 = vmul.f32 %v1319_v32, %v3109_v27  ;;  %v1353_v42 = vmul.f32 %v1319_v32, %v3706_v15  ;;  %v1354_v13 = vmul.f32 %v1319_v32, %v3707_v10  ;;  %v1355_v50 = vmul.f32 %v1319_v32, %v3127_v5  ;;  %v3709_v15 = vld [vmem:[#allocation14_spill] sm:$0xff]  ;;  %v3710_v10 = vld [vmem:[#allocation15_spill] sm:$0xff] }
 0x3d0   :  { %v1356_v35 = vmul.f32 %v1319_v32, %v3133_v23  ;;  %v1357_v57 = vmul.f32 %v1319_v32, %v2845_v56  ;;  %v1358_v24 = vmul.f32 %v1319_v32, %v2849_v22  ;;  %v1359_v39 = vmul.f32 %v1319_v32, %v2853_v51 }
 0x3d1   :  { %v1360_v27 = vmul.f32 %v1319_v32, %v2857_v1  ;;  %v1361_v20 = vmul.f32 %v1319_v32, %v2861_v19  ;;  %v1362_v33 = vmul.f32 %v1319_v32, %v2865_v16  ;;  %v1363_v5 = vmul.f32 %v1319_v32, %v2869_v59  ;;  %v3712_v59 = vld [vmem:[#allocation17_spill] sm:$0xff] }
 0x3d2   :  { %v1364_v23 = vmul.f32 %v1319_v32, %v2873_v11  ;;  %v1365_v56 = vmul.f32 %v1319_v32, %v2877_v3  ;;  %v1366_v14 = vmul.f32 %v1319_v32, %v2881_v21  ;;  %v1367_v54 = vmul.f32 %v1319_v32, %v2885_v55  ;;  %v3713_v3 = vld [vmem:[#allocation18_spill] sm:$0xff]  ;;  %v3714_v55 = vld [vmem:[#allocation19_spill] sm:$0xff] }
 0x3d3   :  { %v1368_v22 = vmul.f32 %v1319_v32, %v2889_v25  ;;  %v1369_v51 = vmul.f32 %v1319_v32, %v2893_v62  ;;  %v1370_v1 = vmul.f32 %v1319_v32, %v3709_v15  ;;  %v1371_v19 = vmul.f32 %v1319_v32, %v3710_v10  ;;  %v3715_v62 = vld [vmem:[#allocation6_spill] sm:$0xff]  ;;  %v3716_v10 = vld [vmem:[#allocation7_spill] sm:$0xff] }
 0x3d4   :  { %v1372_v16 = vmul.f32 %v1319_v32, %v3711_v7  ;;  %v1373_v11 = vmul.f32 %v1319_v32, %v3712_v59  ;;  %v1374_v21 = vmul.f32 %v1319_v32, %v3713_v3  ;;  %v1375_v25 = vmul.f32 %v1319_v32, %v3714_v55 }
 0x3d5   :  { %v1376_v15 = vmul.f32 %v1319_v32, %v3715_v62  ;;  %v1381_v7 = vmul.f32 %v3716_v10, %v1320_v48  ;;  %v1382_v59 = vmul.f32 %v3716_v10, %v1321_v61  ;;  %v1383_v3 = vmul.f32 %v3716_v10, %v1322_v4 }
 0x3d6   :  { %v1384_v55 = vmul.f32 %v3716_v10, %v1323_v60  ;;  %v1385_v32 = vmul.f32 %v3716_v10, %v1324_v29  ;;  %v1386_v62 = vmul.f32 %v3716_v10, %v1325_v53  ;;  %v1387_v48 = vmul.f32 %v3716_v10, %v1326_v26 }
 0x3d7   :  { %v1388_v61 = vmul.f32 %v3716_v10, %v1327_v58  ;;  %v1389_v4 = vmul.f32 %v3716_v10, %v1328_v31  ;;  %v1390_v60 = vmul.f32 %v3716_v10, %v1329_v30  ;;  %v1391_v29 = vmul.f32 %v3716_v10, %v1330_v34 }
 0x3d8   :  { %v1392_v53 = vmul.f32 %v3716_v10, %v1331_v41  ;;  %v1393_v26 = vmul.f32 %v3716_v10, %v1332_v45  ;;  %v1394_v58 = vmul.f32 %v3716_v10, %v1333_v9  ;;  %v1395_v31 = vmul.f32 %v3716_v10, %v1334_v2 }
 0x3d9   :  { %v1396_v30 = vmul.f32 %v3716_v10, %v1335_v52  ;;  %v1397_v34 = vmul.f32 %v3716_v10, %v1336_v12  ;;  %v1398_v41 = vmul.f32 %v3716_v10, %v1337_v47  ;;  %v1399_v45 = vmul.f32 %v3716_v10, %v1338_v17 }
 0x3da   :  { %v1400_v9 = vmul.f32 %v3716_v10, %v1339_v40  ;;  %v1401_v2 = vmul.f32 %v3716_v10, %v1340_v8  ;;  %v1402_v52 = vmul.f32 %v3716_v10, %v1341_v38  ;;  %v1403_v12 = vmul.f32 %v3716_v10, %v1342_v36 }
 0x3db   :  { %v1404_v47 = vmul.f32 %v3716_v10, %v1343_v44  ;;  %v1405_v17 = vmul.f32 %v3716_v10, %v1344_v18  ;;  %v1406_v40 = vmul.f32 %v3716_v10, %v1345_v43  ;;  %v1407_v8 = vmul.f32 %v3716_v10, %v1346_v37 }
 0x3dc   :  { %v1408_v38 = vmul.f32 %v3716_v10, %v1347_v46  ;;  %v1409_v36 = vmul.f32 %v3716_v10, %v1348_v63  ;;  %v1410_v44 = vmul.f32 %v3716_v10, %v1349_v0  ;;  %v1411_v18 = vmul.f32 %v3716_v10, %v1350_v49 }
 0x3dd   :  { %v1412_v43 = vmul.f32 %v3716_v10, %v1351_v28  ;;  %v1413_v37 = vmul.f32 %v3716_v10, %v1352_v6  ;;  %v1414_v46 = vmul.f32 %v3716_v10, %v1353_v42  ;;  %v3284_v63 = vmul.f32 %v3716_v10, %v1354_v13 }
 0x3de   :  { %v3287_v0 = vmul.f32 %v3716_v10, %v1355_v50  ;;  %v3290_v49 = vmul.f32 %v3716_v10, %v1356_v35  ;;  %v3293_v28 = vmul.f32 %v3716_v10, %v1357_v57  ;;  %v3296_v6 = vmul.f32 %v3716_v10, %v1358_v24  ;;  %v3307_v50 = vld [vmem:[%s3636_s8] ss:$0 sm:$0xff] }
 0x3df   :  { %v3299_v42 = vmul.f32 %v3716_v10, %v1359_v39  ;;  %v3302_v13 = vmul.f32 %v3716_v10, %v1360_v27  ;;  %v3310_v35 = vmul.f32 %v3716_v10, %v1361_v20  ;;  %v3313_v57 = vmul.f32 %v3716_v10, %v1362_v33 }
 0x3e0   :  { %v3316_v24 = vmul.f32 %v3716_v10, %v1363_v5  ;;  %v3319_v39 = vmul.f32 %v3716_v10, %v1364_v23  ;;  %v3322_v27 = vmul.f32 %v3716_v10, %v1365_v56  ;;  %v3331_v20 = vmul.f32 %v3716_v10, %v1368_v22 }
 0x3e1   :  { %3717 = vst [vmem:[#allocation8_spill] sm:$0xff] %v3299_v42  ;;  %v3328_v42 = vmul.f32 %v3716_v10, %v1367_v54  ;;  %v3334_v33 = vmul.f32 %v3716_v10, %v1369_v51  ;;  %v3337_v5 = vmul.f32 %v3716_v10, %v1370_v1  ;;  %v3340_v23 = vmul.f32 %v3716_v10, %v1371_v19 }
 0x3e2   :  { %3718 = vst [vmem:[#allocation9_spill] sm:$0xff] %v3302_v13  ;;  %v3325_v13 = vmul.f32 %v3716_v10, %v1366_v14  ;;  %v3343_v56 = vmul.f32 %v3716_v10, %v1372_v16  ;;  %v3346_v14 = vmul.f32 %v3716_v10, %v1373_v11  ;;  %v3349_v54 = vmul.f32 %v3716_v10, %v1374_v21 }
 0x3e3   :  { %3719 = vst [vmem:[#allocation10_spill] sm:$0xff] %v3340_v23  ;;  %v3352_v22 = vmul.f32 %v3716_v10, %v1375_v25  ;;  %v3355_v51 = vmul.f32 %v3716_v10, %v1376_v15  ;;  %v1442_v1 = vadd.f32 %v3307_v50, %v1381_v7  ;;  %v1443_v19 = vadd.f32 %v3307_v50, %v1382_v59 }
 0x3e4   :  { %3720 = vst [vmem:[#allocation11_spill] sm:$0xff] %v3346_v14  ;;  %v1444_v23 = vadd.f32 %v3307_v50, %v1383_v3  ;;  %v1445_v16 = vadd.f32 %v3307_v50, %v1384_v55  ;;  %v1446_v11 = vadd.f32 %v3307_v50, %v1385_v32  ;;  %v1447_v14 = vadd.f32 %v3307_v50, %v1386_v62 }
 0x3e5   :  { %3721 = vst [vmem:[#allocation12_spill] sm:$0xff] %v3349_v54  ;;  %v1448_v21 = vadd.f32 %v3307_v50, %v1387_v48  ;;  %v1449_v25 = vadd.f32 %v3307_v50, %v1388_v61  ;;  %v1451_v15 = vadd.f32 %v3307_v50, %v1390_v60  ;;  %v1452_v10 = vadd.f32 %v3307_v50, %v1391_v29 }
 0x3e6   :  { %3722 = vst [vmem:[#allocation13_spill] sm:$0xff] %v3352_v22  ;;  %v1450_v22 = vadd.f32 %v3307_v50, %v1389_v4  ;;  %v1453_v7 = vadd.f32 %v3307_v50, %v1392_v53  ;;  %v3370_v59 = vadd.f32 %v3307_v50, %v1393_v26  ;;  %v3373_v3 = vadd.f32 %v3307_v50, %v1394_v58 }
 0x3e7   :  { %3723 = vst [vmem:[#allocation4_spill] sm:$0xff] %v3355_v51  ;;  %v3376_v55 = vadd.f32 %v3307_v50, %v1395_v31  ;;  %v3379_v32 = vadd.f32 %v3307_v50, %v1396_v30  ;;  %v3382_v62 = vadd.f32 %v3307_v50, %v1397_v34  ;;  %v3385_v48 = vadd.f32 %v3307_v50, %v1398_v41 }
 0x3e8   :  { %v3388_v61 = vadd.f32 %v3307_v50, %v1399_v45  ;;  %v3391_v4 = vadd.f32 %v3307_v50, %v1400_v9  ;;  %v3394_v60 = vadd.f32 %v3307_v50, %v1401_v2  ;;  %v3397_v29 = vadd.f32 %v3307_v50, %v1402_v52  ;;  %v3724_v51 = vld [vmem:[#allocation8_spill] sm:$0xff] }
 0x3e9   :  { %v3400_v53 = vadd.f32 %v3307_v50, %v1403_v12  ;;  %v3403_v26 = vadd.f32 %v3307_v50, %v1404_v47  ;;  %v3406_v58 = vadd.f32 %v3307_v50, %v1405_v17  ;;  %v3409_v31 = vadd.f32 %v3307_v50, %v1406_v40 }
 0x3ea   :  { %v3412_v30 = vadd.f32 %v3307_v50, %v1407_v8  ;;  %v3415_v34 = vadd.f32 %v3307_v50, %v1408_v38  ;;  %v3418_v41 = vadd.f32 %v3307_v50, %v1409_v36  ;;  %v3421_v45 = vadd.f32 %v3307_v50, %v1410_v44 }
 0x3eb   :  { %v3424_v9 = vadd.f32 %v3307_v50, %v1411_v18  ;;  %v3427_v2 = vadd.f32 %v3307_v50, %v1412_v43  ;;  %v3430_v52 = vadd.f32 %v3307_v50, %v1413_v37  ;;  %v3433_v12 = vadd.f32 %v3307_v50, %v1414_v46 }
 0x3ec   :  { %v1499_v47 = vmax.f32 %v1442_v1, 0.0  ;;  %v1500_v17 = vmax.f32 %v1443_v19, 0.0  ;;  %v1501_v40 = vmax.f32 %v1444_v23, 0.0  ;;  %v1502_v8 = vmax.f32 %v1445_v16, 0.0 }
 0x3ed   :  { %v1503_v38 = vmax.f32 %v1446_v11, 0.0  ;;  %v1504_v36 = vmax.f32 %v1447_v14, 0.0  ;;  %v3437_v44 = vadd.f32 %v3307_v50, %v3284_v63  ;;  %v3441_v18 = vadd.f32 %v3307_v50, %v3287_v0 }
 0x3ee   :  { %v1505_v43 = vmax.f32 %v1448_v21, 0.0  ;;  %v1506_v37 = vmax.f32 %v1449_v25, 0.0  ;;  %v3445_v46 = vadd.f32 %v3307_v50, %v3290_v49  ;;  %v3449_v23 = vadd.f32 %v3307_v50, %v3293_v28 }
 0x3ef   :  { %v1507_v1 = vmax.f32 %v1450_v22, 0.0  ;;  %v1508_v14 = vmax.f32 %v1451_v15, 0.0  ;;  %v3453_v63 = vadd.f32 %v3307_v50, %v3296_v6  ;;  %v1509_v19 = vmax.f32 %v1452_v10, 0.0  ;;  %v3725_v6 = vld [vmem:[#allocation9_spill] sm:$0xff] }
 0x3f0   :  { %v1510_v16 = vmax.f32 %v1453_v7, 0.0  ;;  %v1511_v0 = vmax.f32 %v3370_v59, 0.0  ;;  %v1512_v11 = vmax.f32 %v3373_v3, 0.0  ;;  %v1866_v21 = vpack.c.bf16 %v1500_v17, %v1499_v47 }
 0x3f1   :  { %v1871_v25 = vpack.c.bf16 %v1502_v8, %v1501_v40  ;;  %v1876_v49 = vpack.c.bf16 %v1504_v36, %v1503_v38  ;;  %v3459_v54 = vadd.f32 %v3307_v50, %v3724_v51  ;;  %v1513_v28 = vmax.f32 %v3376_v55, 0.0 }
 0x3f2   :  { %v1514_v22 = vmax.f32 %v3379_v32, 0.0  ;;  %v1881_v15 = vpack.c.bf16 %v1506_v37, %v1505_v43  ;;  %v3465_v10 = vadd.f32 %v3307_v50, %v3725_v6  ;;  %v1515_v7 = vmax.f32 %v3382_v62, 0.0  ;;  %1867 = vst [vmem:[%s3638_s9] sm:$0xff] %v1866_v21  }
 0x3f3   :  { %v1516_v59 = vmax.f32 %v3385_v48, 0.0  ;;  %v1886_v3 = vpack.c.bf16 %v1508_v14, %v1507_v1  ;;  %v3474_v51 = vadd.f32 %v3307_v50, %v3310_v35  ;;  %v1517_v55 = vmax.f32 %v3388_v61, 0.0  ;;  %2003 = vst [vmem:[%s3638_s9 + $0x8] sm:$0xff] %v1871_v25  }
 0x3f4   :  { %v1518_v32 = vmax.f32 %v3391_v4, 0.0  ;;  %v1891_v62 = vpack.c.bf16 %v1510_v16, %v1509_v19  ;;  %v3483_v48 = vadd.f32 %v3307_v50, %v3313_v57  ;;  %v1519_v47 = vmax.f32 %v3394_v60, 0.0  ;;  %2004 = vst [vmem:[%s3638_s9 + $0x10] sm:$0xff] %v1876_v49   ;;  %v3728_v49 = vld [vmem:[#allocation12_spill] sm:$0xff] }
 0x3f5   :  { %v1520_v17 = vmax.f32 %v3397_v29, 0.0  ;;  %v1896_v35 = vpack.c.bf16 %v1512_v11, %v1511_v0  ;;  %v3492_v61 = vadd.f32 %v3307_v50, %v3316_v24  ;;  %v1521_v4 = vmax.f32 %v3400_v53, 0.0  ;;  %2005 = vst [vmem:[%s3638_s9 + $0x18] sm:$0xff] %v1881_v15  }
 0x3f6   :  { %v1522_v40 = vmax.f32 %v3403_v26, 0.0  ;;  %v1901_v57 = vpack.c.bf16 %v1514_v22, %v1513_v28  ;;  %v3501_v60 = vadd.f32 %v3307_v50, %v3319_v39  ;;  %v1523_v29 = vmax.f32 %v3406_v58, 0.0  ;;  %2006 = vst [vmem:[%s3638_s9 + $0x20] sm:$0xff] %v1886_v3  }
 0x3f7   :  { %v1524_v8 = vmax.f32 %v3409_v31, 0.0  ;;  %v1906_v24 = vpack.c.bf16 %v1516_v59, %v1515_v7  ;;  %v3510_v53 = vadd.f32 %v3307_v50, %v3322_v27  ;;  %v1525_v26 = vmax.f32 %v3412_v30, 0.0  ;;  %2007 = vst [vmem:[%s3638_s9 + $0x28] sm:$0xff] %v1891_v62  }
 0x3f8   :  { %v1526_v38 = vmax.f32 %v3415_v34, 0.0  ;;  %v1911_v39 = vpack.c.bf16 %v1518_v32, %v1517_v55  ;;  %v3519_v58 = vadd.f32 %v3307_v50, %v3325_v13  ;;  %v1527_v31 = vmax.f32 %v3418_v41, 0.0  ;;  %2008 = vst [vmem:[%s3638_s9 + $0x30] sm:$0xff] %v1896_v35   ;;  %v3730_v55 = vld [vmem:[#allocation4_spill] sm:$0xff] }
 0x3f9   :  { %v1528_v36 = vmax.f32 %v3421_v45, 0.0  ;;  %v1916_v27 = vpack.c.bf16 %v1520_v17, %v1519_v47  ;;  %v1489_v30 = vadd.f32 %v3307_v50, %v3328_v42  ;;  %v1529_v34 = vmax.f32 %v3424_v9, 0.0  ;;  %2009 = vst [vmem:[%s3638_s9 + $0x38] sm:$0xff] %v1901_v57  }
 0x3fa   :  { %v1530_v43 = vmax.f32 %v3427_v2, 0.0  ;;  %v1921_v13 = vpack.c.bf16 %v1522_v40, %v1521_v4  ;;  %v1490_v41 = vadd.f32 %v3307_v50, %v3331_v20  ;;  %v1531_v45 = vmax.f32 %v3430_v52, 0.0  ;;  %2010 = vst [vmem:[%s3638_s9 + $0x40] sm:$0xff] %v1906_v24  }
 0x3fb   :  { %v1532_v37 = vmax.f32 %v3433_v12, 0.0  ;;  %v1926_v42 = vpack.c.bf16 %v1524_v8, %v1523_v29  ;;  %v1491_v9 = vadd.f32 %v3307_v50, %v3334_v33  ;;  %v1533_v2 = vmax.f32 %v3437_v44, 0.0  ;;  %2011 = vst [vmem:[%s3638_s9 + $0x48] sm:$0xff] %v1911_v39   ;;  %v3726_v44 = vld [vmem:[#allocation10_spill] sm:$0xff] }
 0x3fc   :  { %v1534_v1 = vmax.f32 %v3441_v18, 0.0  ;;  %v1931_v20 = vpack.c.bf16 %v1526_v38, %v1525_v26  ;;  %v1492_v52 = vadd.f32 %v3307_v50, %v3337_v5  ;;  %v1535_v12 = vmax.f32 %v3445_v46, 0.0  ;;  %2012 = vst [vmem:[%s3638_s9 + $0x50] sm:$0xff] %v1916_v27  }
 0x3fd   :  { %v1536_v14 = vmax.f32 %v3449_v23, 0.0  ;;  %v1936_v33 = vpack.c.bf16 %v1528_v36, %v1527_v31  ;;  %v1493_v18 = vadd.f32 %v3307_v50, %v3726_v44  ;;  %v1537_v19 = vmax.f32 %v3453_v63, 0.0  ;;  %2013 = vst [vmem:[%s3638_s9 + $0x58] sm:$0xff] %v1921_v13   ;;  %v3727_v63 = vld [vmem:[#allocation11_spill] sm:$0xff] }
 0x3fe   :  { %v1538_v16 = vmax.f32 %v3459_v54, 0.0  ;;  %v1941_v5 = vpack.c.bf16 %v1530_v43, %v1529_v34  ;;  %v1494_v46 = vadd.f32 %v3307_v50, %v3343_v56  ;;  %v1539_v23 = vmax.f32 %v3465_v10, 0.0  ;;  %2014 = vst [vmem:[%s3638_s9 + $0x60] sm:$0xff] %v1926_v42   ;;  %v3729_v10 = vld [vmem:[#allocation13_spill] sm:$0xff] }
 0x3ff   :  { %v1540_v0 = vmax.f32 %v3474_v51, 0.0  ;;  %v1946_v11 = vpack.c.bf16 %v1532_v37, %v1531_v45  ;;  %v1495_v54 = vadd.f32 %v3307_v50, %v3727_v63  ;;  %v1541_v21 = vmax.f32 %v3483_v48, 0.0  ;;  %2015 = vst [vmem:[%s3638_s9 + $0x68] sm:$0xff] %v1931_v20  }
 0x400   :  { %v1542_v25 = vmax.f32 %v3492_v61, 0.0  ;;  %v1951_v56 = vpack.c.bf16 %v1534_v1, %v1533_v2  ;;  %v1496_v28 = vadd.f32 %v3307_v50, %v3728_v49  ;;  %v1543_v22 = vmax.f32 %v3501_v60, 0.0  ;;  %2016 = vst [vmem:[%s3638_s9 + $0x70] sm:$0xff] %v1936_v33  }
 0x401   :  { %v1544_v15 = vmax.f32 %v3510_v53, 0.0  ;;  %v1956_v6 = vpack.c.bf16 %v1536_v14, %v1535_v12  ;;  %v1497_v7 = vadd.f32 %v3307_v50, %v3729_v10  ;;  %v1545_v59 = vmax.f32 %v3519_v58, 0.0  ;;  %2017 = vst [vmem:[%s3638_s9 + $0x78] sm:$0xff] %v1941_v5  }
 0x402   :  { %v1546_v3 = vmax.f32 %v1489_v30, 0.0  ;;  %v1961_v51 = vpack.c.bf16 %v1538_v16, %v1537_v19  ;;  %v1498_v32 = vadd.f32 %v3307_v50, %v3730_v55  ;;  %v1547_v62 = vmax.f32 %v1490_v41, 0.0  ;;  %2018 = vst [vmem:[%s3638_s9 + $0x80] sm:$0xff] %v1946_v11  }
 0x403   :  { %v1548_v48 = vmax.f32 %v1491_v9, 0.0  ;;  %v1966_v47 = vpack.c.bf16 %v1540_v0, %v1539_v23  ;;  %v1549_v17 = vmax.f32 %v1492_v52, 0.0  ;;  %v1550_v35 = vmax.f32 %v1493_v18, 0.0  ;;  %2019 = vst [vmem:[%s3638_s9 + $0x88] sm:$0xff] %v1951_v56  }
 0x404   :  { %v1971_v61 = vpack.c.bf16 %v1542_v25, %v1541_v21  ;;  %v1551_v4 = vmax.f32 %v1494_v46, 0.0  ;;  %v1552_v40 = vmax.f32 %v1495_v54, 0.0  ;;  %2020 = vst [vmem:[%s3638_s9 + $0x90] sm:$0xff] %v1956_v6   ;;  %v1976_v50 = vpack.c.bf16 %v1544_v15, %v1543_v22 }
 0x405   :  { %v1553_v57 = vmax.f32 %v1496_v28, 0.0  ;;  %v1554_v60 = vmax.f32 %v1497_v7, 0.0  ;;  %2021 = vst [vmem:[%s3638_s9 + $0x98] sm:$0xff] %v1961_v51   ;;  %v1981_v29 = vpack.c.bf16 %v1546_v3, %v1545_v59  ;;  %v1555_v8 = vmax.f32 %v1498_v32, 0.0 }
 0x406   :  { %2022 = vst [vmem:[%s3638_s9 + $0xa0] sm:$0xff] %v1966_v47   ;;  %v1986_v24 = vpack.c.bf16 %v1548_v48, %v1547_v62  ;;  %v1991_v53 = vpack.c.bf16 %v1550_v35, %v1549_v17  ;;  %v1996_v26 = vpack.c.bf16 %v1552_v40, %v1551_v4 }
 0x407   :  { %2023 = vst [vmem:[%s3638_s9 + $0xa8] sm:$0xff] %v1971_v61   ;;  %v2001_v38 = vpack.c.bf16 %v1554_v60, %v1553_v57  ;;  %v1612_v39 = vpack.c.bf16 %v1555_v8, %v1555_v8 }
 0x408   :  { %2024 = vst [vmem:[%s3638_s9 + $0xb0] sm:$0xff] %v1976_v50  }
 0x409   :  { %2025 = vst [vmem:[%s3638_s9 + $0xb8] sm:$0xff] %v1981_v29  }
 0x40a   :  { %2026 = vst [vmem:[%s3638_s9 + $0xc0] sm:$0xff] %v1986_v24  }
 0x40b   :  { %2027 = vst [vmem:[%s3638_s9 + $0xc8] sm:$0xff] %v1991_v53  }
 0x40c   :  { %2028 = vst [vmem:[%s3638_s9 + $0xd0] sm:$0xff] %v1996_v26  }
 0x40d   :  { %2029 = vst [vmem:[%s3638_s9 + $0xd8] sm:$0xff] %v2001_v38  }
 0x40e   :  { %1669 = vst [vmem:[%s3638_s9 + $0xe0] sm:$0x1] %v1612_v39 }

// kernel: a2c_value_forward.5
= control target key start
LH: loop header
LB: loop body
LE: loop exit
PB: predicated region body
PF: predicated region fallthrough
CT: control target
= control target key end

     0   :  { %s4102_s1 = inlined_call_operand.vmem [shape: bf16[2048,128], index: 1, kind: input, shape index: {}]   ;;  %s4103_s2 = inlined_call_operand.vmem [shape: f32[1,128], index: 2, kind: input, shape index: {}]   ;;  %s4104_s0 = inlined_call_operand.vmem [shape: bf16[72,2048], index: 0, kind: input, shape index: {}]   ;;  %s4105_s3 = inlined_call_operand.vmem [shape: f32[1,128], index: 3, kind: input, shape index: {}]   ;;  %s4106_s4 = inlined_call_operand.vmem [shape: f32[1,128], index: 4, kind: input, shape index: {}]   ;;  %s4107_s5 = inlined_call_operand.vmem [shape: bf16[72,128], index: 5, kind: output, shape index: {}]  }
   0x1   :  { %v2995_v0 = vld [vmem:[%s4102_s1 + $0x38] sm:$0xff]  ;;  %v2994_v4 = vld [vmem:[%s4102_s1 + $0x30] sm:$0xff]  ;;  %v2993_v8 = vld [vmem:[%s4102_s1 + $0x28] sm:$0xff] }
   0x2   :  { %v3003_v1 = vld [vmem:[%s4102_s1 + $0x78] sm:$0xff]  ;;  %1496 = vmatpush.bf16.msra.mxu0 %v2995_v0  ;;  %v3002_v5 = vld [vmem:[%s4102_s1 + $0x70] sm:$0xff]  ;;  %v3001_v9 = vld [vmem:[%s4102_s1 + $0x68] sm:$0xff] }
   0x3   :  { %v3011_v2 = vld [vmem:[%s4102_s1 + $0xb8] sm:$0xff]  ;;  %1529 = vmatpush.bf16.msra.mxu1 %v3003_v1  ;;  %v3010_v6 = vld [vmem:[%s4102_s1 + $0xb0] sm:$0xff]  ;;  %v3009_v10 = vld [vmem:[%s4102_s1 + $0xa8] sm:$0xff] }
   0x4   :  { %v3019_v3 = vld [vmem:[%s4102_s1 + $0xf8] sm:$0xff]  ;;  %1562 = vmatpush.bf16.msra.mxu2 %v3011_v2  ;;  %v3018_v7 = vld [vmem:[%s4102_s1 + $0xf0] sm:$0xff]  ;;  %v3017_v11 = vld [vmem:[%s4102_s1 + $0xe8] sm:$0xff] }
   0x5   :  { %1595 = vmatpush.bf16.msra.mxu3 %v3019_v3  ;;  %v2992_v12 = vld [vmem:[%s4102_s1 + $0x20] sm:$0xff]  ;;  %v2991_v16 = vld [vmem:[%s4102_s1 + $0x18] sm:$0xff]  ;;  %v2990_v20 = vld [vmem:[%s4102_s1 + $0x10] sm:$0xff] }
   0x6   :  { %1497 = vmatpush.bf16.msra.mxu0 %v2994_v4  ;;  %v3000_v13 = vld [vmem:[%s4102_s1 + $0x60] sm:$0xff]  ;;  %v2999_v17 = vld [vmem:[%s4102_s1 + $0x58] sm:$0xff]  ;;  %v2998_v21 = vld [vmem:[%s4102_s1 + $0x50] sm:$0xff] }
   0x7   :  { %1530 = vmatpush.bf16.msra.mxu1 %v3002_v5  ;;  %v3008_v14 = vld [vmem:[%s4102_s1 + $0xa0] sm:$0xff]  ;;  %v3007_v18 = vld [vmem:[%s4102_s1 + $0x98] sm:$0xff]  ;;  %v3006_v22 = vld [vmem:[%s4102_s1 + $0x90] sm:$0xff] }
   0x8   :  { %1563 = vmatpush.bf16.msra.mxu2 %v3010_v6  ;;  %v3016_v15 = vld [vmem:[%s4102_s1 + $0xe0] sm:$0xff]  ;;  %v3015_v19 = vld [vmem:[%s4102_s1 + $0xd8] sm:$0xff]  ;;  %v3014_v23 = vld [vmem:[%s4102_s1 + $0xd0] sm:$0xff] }
   0x9   :  { %1596 = vmatpush.bf16.msra.mxu3 %v3018_v7  ;;  %v2989_v24 = vld [vmem:[%s4102_s1 + $0x8] sm:$0xff]  ;;  %v2988_v28 = vld [vmem:[%s4102_s1] sm:$0xff]  ;;  %v3043_v40 = vld [vmem:[%s4102_s1 + $0x1b8] sm:$0xff] }
   0xa   :  { %1498 = vmatpush.bf16.msra.mxu0 %v2993_v8  ;;  %v2997_v25 = vld [vmem:[%s4102_s1 + $0x48] sm:$0xff]  ;;  %v2996_v29 = vld [vmem:[%s4102_s1 + $0x40] sm:$0xff]  ;;  %v3027_v41 = vld [vmem:[%s4102_s1 + $0x138] sm:$0xff] }
   0xb   :  { %1531 = vmatpush.bf16.msra.mxu1 %v3001_v9  ;;  %v3005_v26 = vld [vmem:[%s4102_s1 + $0x88] sm:$0xff]  ;;  %v3004_v30 = vld [vmem:[%s4102_s1 + $0x80] sm:$0xff]  ;;  %v3051_v46 = vld [vmem:[%s4102_s1 + $0x1f8] sm:$0xff] }
   0xc   :  { %1564 = vmatpush.bf16.msra.mxu2 %v3009_v10  ;;  %v3013_v27 = vld [vmem:[%s4102_s1 + $0xc8] sm:$0xff]  ;;  %v3012_v31 = vld [vmem:[%s4102_s1 + $0xc0] sm:$0xff]  ;;  %v3035_v47 = vld [vmem:[%s4102_s1 + $0x178] sm:$0xff] }
   0xd   :  { %1597 = vmatpush.bf16.msra.mxu3 %v3017_v11  ;;  %v2158_v32 = vld [vmem:[%s4104_s0] sm:$0xf]  ;;  %v2924_v34 = vld [vmem:[%s4104_s0 + $0x4] sm:$0xf]  ;;  %v2166_v36 = vld [vmem:[%s4104_s0 + $0x8] sm:$0xf] }
   0xe   :  { %1499 = vmatpush.bf16.msra.mxu0 %v2992_v12  ;;  %v2932_v33 = vld [vmem:[%s4104_s0 + $0x3c] sm:$0xf0]  ;;  %v2160_v35 = vld [vmem:[%s4104_s0 + $0x40] sm:$0xf0]  ;;  %v2933_v37 = vld [vmem:[%s4104_s0 + $0x44] sm:$0xf0] }
   0xf   :  { %1532 = vmatpush.bf16.msra.mxu1 %v3000_v13  ;;  %v2925_v38 = vld [vmem:[%s4104_s0 + $0xc] sm:$0xf]  ;;  %v2159_v42 = vor.u32 %v2932_v33, %v2158_v32  ;;  %v2163_v43 = vor.u32 %v2924_v34, %v2160_v35  ;;  %v2167_v44 = vor.u32 %v2933_v37, %v2166_v36  ;;  %v3042_v48 = vld [vmem:[%s4102_s1 + $0x1b0] sm:$0xff]  ;;  %v2222_v56 = vld [vmem:[%s4104_s0 + $0x80] sm:$0xf] }
  0x10   :  { %1565 = vmatpush.bf16.msra.mxu2 %v3008_v14  ;;  %v2168_v39 = vld [vmem:[%s4104_s0 + $0x48] sm:$0xf0]  ;;  %v3026_v49 = vld [vmem:[%s4102_s1 + $0x130] sm:$0xff]  ;;  %v3040_v57 = vld [vmem:[%s4102_s1 + $0x1a0] sm:$0xff] }
  0x11   :  { %1598 = vmatpush.bf16.msra.mxu3 %v3016_v15  ;;  %v2171_v45 = vor.u32 %v2925_v38, %v2168_v39  ;;  %v3050_v50 = vld [vmem:[%s4102_s1 + $0x1f0] sm:$0xff]  ;;  %v3041_v52 = vld [vmem:[%s4102_s1 + $0x1a8] sm:$0xff]  ;;  %v3024_v58 = vld [vmem:[%s4102_s1 + $0x120] sm:$0xff] }
  0x12   :  { %1500 = vmatpush.bf16.msra.mxu0 %v2991_v16  ;;  %v3034_v51 = vld [vmem:[%s4102_s1 + $0x170] sm:$0xff]  ;;  %v3025_v53 = vld [vmem:[%s4102_s1 + $0x128] sm:$0xff]  ;;  %v2948_v59 = vld [vmem:[%s4104_s0 + $0xbc] sm:$0xf0] }
  0x13   :  { %1533 = vmatpush.bf16.msra.mxu1 %v2999_v17  ;;  %v3049_v54 = vld [vmem:[%s4102_s1 + $0x1e8] sm:$0xff]  ;;  %v2940_v60 = vld [vmem:[%s4104_s0 + $0x84] sm:$0xf]  ;;  %v3039_v4 = vld [vmem:[%s4102_s1 + $0x198] sm:$0xff]  ;;  %v2223_v6 = vor.u32 %v2948_v59, %v2222_v56 }
  0x14   :  { %1566 = vmatpush.bf16.msra.mxu2 %v3007_v18  ;;  %v3033_v55 = vld [vmem:[%s4102_s1 + $0x168] sm:$0xff]  ;;  %v2224_v61 = vld [vmem:[%s4104_s0 + $0xc0] sm:$0xf0]  ;;  %v3023_v5 = vld [vmem:[%s4102_s1 + $0x118] sm:$0xff] }
  0x15   :  { %1599 = vmatpush.bf16.msra.mxu3 %v3015_v19  ;;  %v2230_v62 = vld [vmem:[%s4104_s0 + $0x88] sm:$0xf]  ;;  %v2941_v0 = vld [vmem:[%s4104_s0 + $0x8c] sm:$0xf]  ;;  %v3048_v2 = vld [vmem:[%s4102_s1 + $0x1e0] sm:$0xff]  ;;  %v2227_v7 = vor.u32 %v2940_v60, %v2224_v61 }
  0x16   :  { %1501 = vmatpush.bf16.msra.mxu0 %v2990_v20  ;;  %v2949_v63 = vld [vmem:[%s4104_s0 + $0xc4] sm:$0xf0]  ;;  %v2232_v1 = vld [vmem:[%s4104_s0 + $0xc8] sm:$0xf0]  ;;  %v3032_v3 = vld [vmem:[%s4102_s1 + $0x160] sm:$0xff] }
  0x17   :  { %1534 = vmatpush.bf16.msra.mxu1 %v2998_v21  ;;  %v2231_v8 = vor.u32 %v2949_v63, %v2230_v62  ;;  %v2235_v9 = vor.u32 %v2941_v0, %v2232_v1  ;;  %v3047_v10 = vld [vmem:[%s4102_s1 + $0x1d8] sm:$0xff]  ;;  %v3038_v12 = vld [vmem:[%s4102_s1 + $0x190] sm:$0xff]  ;;  %v3037_v16 = vld [vmem:[%s4102_s1 + $0x188] sm:$0xff] }
  0x18   :  { %1567 = vmatpush.bf16.msra.mxu2 %v3006_v22  ;;  %v3031_v11 = vld [vmem:[%s4102_s1 + $0x158] sm:$0xff]  ;;  %v3022_v13 = vld [vmem:[%s4102_s1 + $0x110] sm:$0xff]  ;;  %v3021_v17 = vld [vmem:[%s4102_s1 + $0x108] sm:$0xff] }
  0x19   :  { %1600 = vmatpush.bf16.msra.mxu3 %v3014_v23  ;;  %v3046_v14 = vld [vmem:[%s4102_s1 + $0x1d0] sm:$0xff]  ;;  %v3045_v18 = vld [vmem:[%s4102_s1 + $0x1c8] sm:$0xff]  ;;  %v2286_v19 = vld [vmem:[%s4104_s0 + $0x100] sm:$0xf] }
  0x1a   :  { %1502 = vmatpush.bf16.msra.mxu0 %v2989_v24  ;;  %v3030_v15 = vld [vmem:[%s4102_s1 + $0x150] sm:$0xff]  ;;  %v2964_v20 = vld [vmem:[%s4104_s0 + $0x13c] sm:$0xf0]  ;;  %v2956_v21 = vld [vmem:[%s4104_s0 + $0x104] sm:$0xf] }
  0x1b   :  { %1535 = vmatpush.bf16.msra.mxu1 %v2997_v25  ;;  %v2288_v22 = vld [vmem:[%s4104_s0 + $0x140] sm:$0xf0]  ;;  %v2294_v23 = vld [vmem:[%s4104_s0 + $0x108] sm:$0xf]  ;;  %v2957_v25 = vld [vmem:[%s4104_s0 + $0x10c] sm:$0xf] }
  0x1c   :  { %1568 = vmatpush.bf16.msra.mxu2 %v3005_v26  ;;  %v2965_v24 = vld [vmem:[%s4104_s0 + $0x144] sm:$0xf0]  ;;  %v2296_v26 = vld [vmem:[%s4104_s0 + $0x148] sm:$0xf0]  ;;  %v3036_v32 = vld [vmem:[%s4102_s1 + $0x180] sm:$0xff] }
  0x1d   :  { %1601 = vmatpush.bf16.msra.mxu3 %v3013_v27  ;;  %v2287_v27 = vor.u32 %v2964_v20, %v2286_v19  ;;  %v3020_v33 = vld [vmem:[%s4102_s1 + $0x100] sm:$0xff] }
  0x1e   :  { %1503 = vmatpush.bf16.msra.mxu0 %v2988_v28  ;;  %v2291_v28 = vor.u32 %v2956_v21, %v2288_v22  ;;  %v3044_v34 = vld [vmem:[%s4102_s1 + $0x1c0] sm:$0xff]  ;;  %v3071_v22 = vld [vmem:[%s4102_s1 + $0x298] sm:$0xff] }
  0x1f   :  { %1536 = vmatpush.bf16.msra.mxu1 %v2996_v29  ;;  %v2295_v29 = vor.u32 %v2965_v24, %v2294_v23  ;;  %v3028_v35 = vld [vmem:[%s4102_s1 + $0x140] sm:$0xff]  ;;  %v3055_v23 = vld [vmem:[%s4102_s1 + $0x218] sm:$0xff] }
  0x20   :  { %1569 = vmatpush.bf16.msra.mxu2 %v3004_v30  ;;  %v2299_v30 = vor.u32 %v2957_v25, %v2296_v26  ;;  %v2350_v36 = vld [vmem:[%s4104_s0 + $0x180] sm:$0xf]  ;;  %v2972_v38 = vld [vmem:[%s4104_s0 + $0x184] sm:$0xf]  ;;  %v3079_v24 = vld [vmem:[%s4102_s1 + $0x2d8] sm:$0xff] }
  0x21   :  { %1602 = vmatpush.bf16.msra.mxu3 %v3012_v31  ;;  %1504 = vmatmul.bf16.vlgmr.msra.gmra.mxu0 %v2159_v42  ;;  %v3029_v31 = vld [vmem:[%s4102_s1 + $0x148] sm:$0xff]  ;;  %v2980_v37 = vld [vmem:[%s4104_s0 + $0x1bc] sm:$0xf0]  ;;  %v2352_v39 = vld [vmem:[%s4104_s0 + $0x1c0] sm:$0xf0] }
  0x22   :  { %1628 = vmatpush.bf16.msrb.mxu0 %v3027_v41  ;;  %1537 = vmatmul.bf16.vlgmr.msra.gmra.mxu1 %v2163_v43  ;;  %v2981_v41 = vld [vmem:[%s4104_s0 + $0x1c4] sm:$0xf0]  ;;  %v2973_v42 = vld [vmem:[%s4104_s0 + $0x18c] sm:$0xf]  ;;  %v84_v56 = vld [vmem:[%s4104_s0 + $0x200] sm:$0xff] }
  0x23   :  { %1570 = vmatmul.bf16.vlgmr.msra.gmra.mxu2 %v2167_v44  ;;  %1661 = vmatpush.bf16.msrb.mxu1 %v3035_v47  ;;  %v2360_v43 = vld [vmem:[%s4104_s0 + $0x1c8] sm:$0xf0]  ;;  %v2351_v44 = vor.u32 %v2980_v37, %v2350_v36  ;;  %v553_v59 = vunpack.c.h.b16 %v84_v56  ;;  %v3056_v19 = vld [vmem:[%s4102_s1 + $0x220] sm:$0xff]  ;;  %v3063_v25 = vld [vmem:[%s4102_s1 + $0x258] sm:$0xff] }
  0x24   :  { %1694 = vmatpush.bf16.msrb.mxu2 %v3043_v40  ;;  %1603 = vmatmul.bf16.vlgmr.msra.gmra.mxu3 %v2171_v45  ;;  %v2358_v40 = vld [vmem:[%s4104_s0 + $0x188] sm:$0xf]  ;;  %v2355_v45 = vor.u32 %v2972_v38, %v2352_v39  ;;  %v2363_v47 = vor.u32 %v2973_v42, %v2360_v43  ;;  %v3080_v20 = vld [vmem:[%s4102_s1 + $0x2e0] sm:$0xff]  ;;  %v2238_v26 = vld [vmem:[%s4104_s0 + $0x90] sm:$0xf] }
  0x25   :  { %1727 = vmatpush.bf16.msrb.mxu3 %v3051_v46  ;;  %v2359_v46 = vor.u32 %v2981_v41, %v2358_v40  ;;  %v633_v63 = vpack.c.b16 %v553_v59, %v553_v59  ;;  %v3064_v21 = vld [vmem:[%s4102_s1 + $0x260] sm:$0xff]  ;;  %v3070_v38 = vld [vmem:[%s4102_s1 + $0x290] sm:$0xff] }
  0x26   :  { %1629 = vmatpush.bf16.msrb.mxu0 %v3026_v49  ;;  %v3059_v49 = vld [vmem:[%s4102_s1 + $0x238] sm:$0xff]  ;;  %v3054_v39 = vld [vmem:[%s4102_s1 + $0x210] sm:$0xff] }
  0x27   :  { %1662 = vmatpush.bf16.msrb.mxu1 %v3034_v51  ;;  %v3067_v51 = vld [vmem:[%s4102_s1 + $0x278] sm:$0xff]  ;;  %v3078_v40 = vld [vmem:[%s4102_s1 + $0x2d0] sm:$0xff] }
  0x28   :  { %1695 = vmatpush.bf16.msrb.mxu2 %v3042_v48  ;;  %v3075_v48 = vld [vmem:[%s4102_s1 + $0x2b8] sm:$0xff]  ;;  %v2302_v41 = vld [vmem:[%s4104_s0 + $0x110] sm:$0xf] }
  0x29   :  { %1728 = vmatpush.bf16.msrb.mxu3 %v3050_v50  ;;  %v3083_v50 = vld [vmem:[%s4102_s1 + $0x2f8] sm:$0xff]  ;;  %v2966_v42 = vld [vmem:[%s4104_s0 + $0x14c] sm:$0xf0] }
  0x2a   :  { %1630 = vmatpush.bf16.msrb.mxu0 %v3025_v53  ;;  %v3058_v53 = vld [vmem:[%s4102_s1 + $0x230] sm:$0xff] }
  0x2b   :  { %1663 = vmatpush.bf16.msrb.mxu1 %v3033_v55  ;;  %v3066_v55 = vld [vmem:[%s4102_s1 + $0x270] sm:$0xff] }
  0x2c   :  { %1696 = vmatpush.bf16.msrb.mxu2 %v3041_v52  ;;  %v3074_v52 = vld [vmem:[%s4102_s1 + $0x2b0] sm:$0xff] }
  0x2d   :  { %1729 = vmatpush.bf16.msrb.mxu3 %v3049_v54  ;;  %v3082_v54 = vld [vmem:[%s4102_s1 + $0x2f0] sm:$0xff] }
  0x2e   :  { %1631 = vmatpush.bf16.msrb.mxu0 %v3024_v58  ;;  %v552_v58 = vunpack.c.l.b16 %v84_v56  ;;  %v3062_v43 = vld [vmem:[%s4102_s1 + $0x250] sm:$0xff]  ;;  %v3077_v56 = vld [vmem:[%s4102_s1 + $0x2c8] sm:$0xff] }
  0x2f   :  { %1664 = vmatpush.bf16.msrb.mxu1 %v3032_v3  ;;  %v3057_v3 = vld [vmem:[%s4102_s1 + $0x228] sm:$0xff]  ;;  %v2982_v59 = vld [vmem:[%s4104_s0 + $0x1cc] sm:$0xf0] }
  0x30   :  { %1697 = vmatpush.bf16.msrb.mxu2 %v3040_v57  ;;  %v85_v57 = vld [vmem:[%s4104_s0 + $0x208] sm:$0xff]  ;;  %v632_v62 = vpack.c.b16 %v552_v58, %v552_v58  ;;  %v2366_v58 = vld [vmem:[%s4104_s0 + $0x190] sm:$0xf] }
  0x31   :  { %1730 = vmatpush.bf16.msrb.mxu3 %v3048_v2  ;;  %1509 = vmatmul.bf16.gmra.mxu0 %v2223_v6  ;;  %v554_v60 = vunpack.c.l.b16 %v85_v57  ;;  %v555_v61 = vunpack.c.h.b16 %v85_v57  ;;  %v3073_v2 = vld [vmem:[%s4102_s1 + $0x2a8] sm:$0xff]  ;;  %v3072_v6 = vld [vmem:[%s4102_s1 + $0x2a0] sm:$0xff] }
  0x32   :  { %1632 = vmatpush.bf16.msrb.mxu0 %v3023_v5  ;;  %1542 = vmatmul.bf16.gmra.mxu1 %v2227_v7  ;;  %v3065_v5 = vld [vmem:[%s4102_s1 + $0x268] sm:$0xff]  ;;  %v2174_v7 = vld [vmem:[%s4104_s0 + $0x10] sm:$0xf] }
  0x33   :  { %1575 = vmatmul.bf16.gmra.mxu2 %v2231_v8  ;;  %1665 = vmatpush.bf16.msrb.mxu1 %v3031_v11  ;;  %v634_v0 = vpack.c.b16 %v554_v60, %v554_v60  ;;  %v635_v1 = vpack.c.b16 %v555_v61, %v555_v61  ;;  %v2934_v8 = vld [vmem:[%s4104_s0 + $0x4c] sm:$0xf0]  ;;  %v2182_v11 = vld [vmem:[%s4104_s0 + $0x18] sm:$0xf]  ;;  %v3061_v57 = vld [vmem:[%s4102_s1 + $0x248] sm:$0xff] }
  0x34   :  { %1698 = vmatpush.bf16.msrb.mxu2 %v3039_v4  ;;  %1608 = vmatmul.bf16.gmra.mxu3 %v2235_v9  ;;  %v3081_v4 = vld [vmem:[%s4102_s1 + $0x2e8] sm:$0xff]  ;;  %v2926_v9 = vld [vmem:[%s4104_s0 + $0x14] sm:$0xf]  ;;  %v3640_v61 = vld [vmem:[%s4103_s2] ss:$0 sm:$0xff] }
  0x35   :  { %1731 = vmatpush.bf16.msrb.mxu3 %v3047_v10  ;;  %v2176_v10 = vld [vmem:[%s4104_s0 + $0x50] sm:$0xf0] }
  0x36   :  { %1633 = vmatpush.bf16.msrb.mxu0 %v3022_v13  ;;  %v2927_v13 = vld [vmem:[%s4104_s0 + $0x1c] sm:$0xf]  ;;  %v2974_v60 = vld [vmem:[%s4104_s0 + $0x194] sm:$0xf] }
  0x37   :  { %1666 = vmatpush.bf16.msrb.mxu1 %v3030_v15  ;;  %v2175_v15 = vor.u32 %v2934_v8, %v2174_v7  ;;  %v2367_v7 = vor.u32 %v2982_v59, %v2366_v58  ;;  %v3105_v58 = vld [vmem:[%s4102_s1 + $0x3a8] sm:$0xff] }
  0x38   :  { %1699 = vmatpush.bf16.msrb.mxu2 %v3038_v12  ;;  %v2935_v12 = vld [vmem:[%s4104_s0 + $0x54] sm:$0xf0] }
  0x39   :  { %1732 = vmatpush.bf16.msrb.mxu3 %v3046_v14  ;;  %v2184_v14 = vld [vmem:[%s4104_s0 + $0x58] sm:$0xf0] }
  0x3a   :  { %1634 = vmatpush.bf16.msrb.mxu0 %v3021_v17  ;;  %v2183_v17 = vor.u32 %v2935_v12, %v2182_v11 }
  0x3b   :  { %1667 = vmatpush.bf16.msrb.mxu1 %v3029_v31  ;;  %v2951_v31 = vld [vmem:[%s4104_s0 + $0xd4] sm:$0xf0] }
  0x3c   :  { %1700 = vmatpush.bf16.msrb.mxu2 %v3037_v16  ;;  %v2179_v16 = vor.u32 %v2926_v9, %v2176_v10 }
  0x3d   :  { %1733 = vmatpush.bf16.msrb.mxu3 %v3045_v18  ;;  %v2187_v18 = vor.u32 %v2927_v13, %v2184_v14 }
  0x3e   :  { %1635 = vmatpush.bf16.msrb.mxu0 %v3020_v33  ;;  %v2248_v33 = vld [vmem:[%s4104_s0 + $0xd8] sm:$0xf0] }
  0x3f   :  { %1668 = vmatpush.bf16.msrb.mxu1 %v3028_v35 }
  0x40   :  { %1701 = vmatpush.bf16.msrb.mxu2 %v3036_v32  ;;  %v2943_v32 = vld [vmem:[%s4104_s0 + $0x9c] sm:$0xf] }
  0x41   :  { %1514 = vmatmul.bf16.gmra.mxu0 %v2287_v27  ;;  %1734 = vmatpush.bf16.msrb.mxu3 %v3044_v34  ;;  %v2950_v27 = vld [vmem:[%s4104_s0 + $0xcc] sm:$0xf0]  ;;  %v2251_v37 = vor.u32 %v2943_v32, %v2248_v33 }
  0x42   :  { %1547 = vmatmul.bf16.gmra.mxu1 %v2291_v28  ;;  %1760 = vmatpush.bf16.msra.mxu0 %v3059_v49  ;;  %v2942_v28 = vld [vmem:[%s4104_s0 + $0x94] sm:$0xf]  ;;  %v2239_v34 = vor.u32 %v2950_v27, %v2238_v26  ;;  %v2312_v49 = vld [vmem:[%s4104_s0 + $0x158] sm:$0xf0] }
  0x43   :  { %1580 = vmatmul.bf16.gmra.mxu2 %v2295_v29  ;;  %1793 = vmatpush.bf16.msra.mxu1 %v3067_v51  ;;  %v2240_v29 = vld [vmem:[%s4104_s0 + $0xd0] sm:$0xf0]  ;;  %v3099_v27 = vld [vmem:[%s4102_s1 + $0x378] sm:$0xff] }
  0x44   :  { %1613 = vmatmul.bf16.gmra.mxu3 %v2299_v30  ;;  %1826 = vmatpush.bf16.msra.mxu2 %v3075_v48  ;;  %v2246_v30 = vld [vmem:[%s4104_s0 + $0x98] sm:$0xf]  ;;  %v2243_v35 = vor.u32 %v2942_v28, %v2240_v29  ;;  %v2959_v48 = vld [vmem:[%s4104_s0 + $0x11c] sm:$0xf] }
  0x45   :  { %1859 = vmatpush.bf16.msra.mxu3 %v3083_v50  ;;  %v2247_v36 = vor.u32 %v2951_v31, %v2246_v30  ;;  %v2303_v50 = vor.u32 %v2966_v42, %v2302_v41  ;;  %v3106_v31 = vld [vmem:[%s4102_s1 + $0x3b0] sm:$0xff] }
  0x46   :  { %1761 = vmatpush.bf16.msra.mxu0 %v3058_v53  ;;  %v2315_v53 = vor.u32 %v2959_v48, %v2312_v49  ;;  %v3098_v48 = vld [vmem:[%s4102_s1 + $0x370] sm:$0xff] }
  0x47   :  { %1794 = vmatpush.bf16.msra.mxu1 %v3066_v55  ;;  %v3053_v55 = vld [vmem:[%s4102_s1 + $0x208] sm:$0xff] }
  0x48   :  { %1827 = vmatpush.bf16.msra.mxu2 %v3074_v52 }
  0x49   :  { %1860 = vmatpush.bf16.msra.mxu3 %v3082_v54  ;;  %v3069_v54 = vld [vmem:[%s4102_s1 + $0x288] sm:$0xff] }
  0x4a   :  { %1762 = vmatpush.bf16.msra.mxu0 %v3057_v3  ;;  %v3060_v3 = vld [vmem:[%s4102_s1 + $0x240] sm:$0xff] }
  0x4b   :  { %1795 = vmatpush.bf16.msra.mxu1 %v3065_v5  ;;  %v2975_v5 = vld [vmem:[%s4104_s0 + $0x19c] sm:$0xf] }
  0x4c   :  { %1828 = vmatpush.bf16.msra.mxu2 %v3073_v2  ;;  %v2374_v2 = vld [vmem:[%s4104_s0 + $0x198] sm:$0xf] }
  0x4d   :  { %1861 = vmatpush.bf16.msra.mxu3 %v3081_v4  ;;  %v2983_v4 = vld [vmem:[%s4104_s0 + $0x1d4] sm:$0xf0] }
  0x4e   :  { %1763 = vmatpush.bf16.msra.mxu0 %v3056_v19  ;;  %v2375_v11 = vor.u32 %v2983_v4, %v2374_v2  ;;  %v2198_v2 = vld [vmem:[%s4104_s0 + $0x28] sm:$0xf]  ;;  %v2929_v4 = vld [vmem:[%s4104_s0 + $0x2c] sm:$0xf] }
  0x4f   :  { %1796 = vmatpush.bf16.msra.mxu1 %v3064_v21 }
  0x50   :  { %1829 = vmatpush.bf16.msra.mxu2 %v3072_v6  ;;  %v2376_v6 = vld [vmem:[%s4104_s0 + $0x1d8] sm:$0xf0] }
  0x51   :  { %1519 = vmatmul.bf16.gmra.mxu0 %v2351_v44  ;;  %1862 = vmatpush.bf16.msra.mxu3 %v3080_v20  ;;  %v2958_v44 = vld [vmem:[%s4104_s0 + $0x114] sm:$0xf]  ;;  %v2379_v12 = vor.u32 %v2975_v5, %v2376_v6  ;;  %v2200_v5 = vld [vmem:[%s4104_s0 + $0x68] sm:$0xf0] }
  0x52   :  { %1552 = vmatmul.bf16.gmra.mxu1 %v2355_v45  ;;  %1764 = vmatpush.bf16.msra.mxu0 %v3055_v23  ;;  %v2304_v45 = vld [vmem:[%s4104_s0 + $0x150] sm:$0xf0] }
  0x53   :  { %1585 = vmatmul.bf16.gmra.mxu2 %v2359_v46  ;;  %1797 = vmatpush.bf16.msra.mxu1 %v3063_v25  ;;  %v2310_v46 = vld [vmem:[%s4104_s0 + $0x118] sm:$0xf]  ;;  %v2307_v51 = vor.u32 %v2958_v44, %v2304_v45  ;;  %v86_v23 = vld [vmem:[%s4104_s0 + $0x210] sm:$0xff] }
  0x54   :  { %1618 = vmatmul.bf16.gmra.mxu3 %v2363_v47  ;;  %1830 = vmatpush.bf16.msra.mxu2 %v3071_v22  ;;  %v2967_v47 = vld [vmem:[%s4104_s0 + $0x154] sm:$0xf0]  ;;  %v556_v29 = vunpack.c.l.b16 %v86_v23  ;;  %v557_v30 = vunpack.c.h.b16 %v86_v23  ;;  %v3090_v45 = vld [vmem:[%s4102_s1 + $0x330] sm:$0xff] }
  0x55   :  { %1863 = vmatpush.bf16.msra.mxu3 %v3079_v24  ;;  %v2311_v52 = vor.u32 %v2967_v47, %v2310_v46  ;;  %v87_v25 = vld [vmem:[%s4104_s0 + $0x218] sm:$0xff]  ;;  %v3114_v46 = vld [vmem:[%s4102_s1 + $0x3f0] sm:$0xff] }
  0x56   :  { %1765 = vmatpush.bf16.msra.mxu0 %v3054_v39  ;;  %v558_v32 = vunpack.c.l.b16 %v87_v25  ;;  %v559_v33 = vunpack.c.h.b16 %v87_v25 }
  0x57   :  { %1798 = vmatpush.bf16.msra.mxu1 %v3062_v43 }
  0x58   :  { %1831 = vmatpush.bf16.msra.mxu2 %v3070_v38  ;;  %v638_v41 = vpack.c.b16 %v558_v32, %v558_v32  ;;  %v639_v42 = vpack.c.b16 %v559_v33, %v559_v33  ;;  %v3111_v32 = vld [vmem:[%s4102_s1 + $0x3d8] sm:$0xff] }
  0x59   :  { %1864 = vmatpush.bf16.msra.mxu3 %v3078_v40 }
  0x5a   :  { %1766 = vmatpush.bf16.msra.mxu0 %v3053_v55 }
  0x5b   :  { %1799 = vmatpush.bf16.msra.mxu1 %v3061_v57  ;;  %v2936_v57 = vld [vmem:[%s4104_s0 + $0x5c] sm:$0xf0] }
  0x5c   :  { %1832 = vmatpush.bf16.msra.mxu2 %v3069_v54 }
  0x5d   :  { %1865 = vmatpush.bf16.msra.mxu3 %v3077_v56  ;;  %v2190_v56 = vld [vmem:[%s4104_s0 + $0x20] sm:$0xf] }
  0x5f   :  { %1800 = vmatpush.bf16.msra.mxu1 %v3060_v3  ;;  %v2937_v3 = vld [vmem:[%s4104_s0 + $0x64] sm:$0xf0] }
  0x61   :  { %1524 = vmatmul.bf16.gmra.mxu0 %v632_v62  ;;  %v3068_v62 = vld [vmem:[%s4102_s1 + $0x280] sm:$0xff] }
  0x62   :  { %1557 = vmatmul.bf16.gmra.mxu1 %v633_v63  ;;  %v3052_v63 = vld [vmem:[%s4102_s1 + $0x200] sm:$0xff]  ;;  %1833 = vmatpush.bf16.msra.mxu2 %v3068_v62  ;;  %v3113_v62 = vld [vmem:[%s4102_s1 + $0x3e8] sm:$0xff] }
  0x63   :  { %1590 = vmatmul.bf16.gmra.mxu2 %v634_v0  ;;  %v3076_v0 = vld [vmem:[%s4102_s1 + $0x2c0] sm:$0xff]  ;;  %1767 = vmatpush.bf16.msra.mxu0 %v3052_v63  ;;  %v3097_v63 = vld [vmem:[%s4102_s1 + $0x368] sm:$0xff] }
  0x64   :  { %1623 = vmatmul.bf16.gmra.mxu3 %v635_v1  ;;  %v2368_v1 = vld [vmem:[%s4104_s0 + $0x1d0] sm:$0xf0] }
  0x65   :  { %1866 = vmatpush.bf16.msra.mxu3 %v3076_v0  ;;  %v2371_v8 = vor.u32 %v2974_v60, %v2368_v1  ;;  %v3089_v60 = vld [vmem:[%s4102_s1 + $0x328] sm:$0xff]  ;;  %v2928_v0 = vld [vmem:[%s4104_s0 + $0x24] sm:$0xf] }
  0x66   :  { %v2192_v1 = vld [vmem:[%s4104_s0 + $0x60] sm:$0xf0] }
  0x71   :  { %1636 = vmatmul.bf16.vlgmr.msrb.gmra.mxu0 %v2175_v15  ;;  %v3107_v15 = vld [vmem:[%s4102_s1 + $0x3b8] sm:$0xff] }
  0x72   :  { %1669 = vmatmul.bf16.vlgmr.msrb.gmra.mxu1 %v2179_v16  ;;  %v3091_v16 = vld [vmem:[%s4102_s1 + $0x338] sm:$0xff] }
  0x73   :  { %1702 = vmatmul.bf16.vlgmr.msrb.gmra.mxu2 %v2183_v17  ;;  %v3115_v17 = vld [vmem:[%s4102_s1 + $0x3f8] sm:$0xff]  ;;  %1892 = vmatpush.bf16.msrb.mxu0 %v3091_v16 }
  0x74   :  { %1735 = vmatmul.bf16.vlgmr.msrb.gmra.mxu3 %v2187_v18  ;;  %1958 = vmatpush.bf16.msrb.mxu2 %v3107_v15 }
  0x75   :  { %1991 = vmatpush.bf16.msrb.mxu3 %v3115_v17  ;;  %1925 = vmatpush.bf16.msrb.mxu1 %v3099_v27 }
  0x77   :  { %1893 = vmatpush.bf16.msrb.mxu0 %v3090_v45 }
  0x78   :  { %1959 = vmatpush.bf16.msrb.mxu2 %v3106_v31  ;;  %v3087_v31 = vld [vmem:[%s4102_s1 + $0x318] sm:$0xff] }
  0x79   :  { %1992 = vmatpush.bf16.msrb.mxu3 %v3114_v46  ;;  %1926 = vmatpush.bf16.msrb.mxu1 %v3098_v48 }
  0x7b   :  { %1894 = vmatpush.bf16.msrb.mxu0 %v3089_v60 }
  0x7c   :  { %1960 = vmatpush.bf16.msrb.mxu2 %v3105_v58 }
  0x7d   :  { %1993 = vmatpush.bf16.msrb.mxu3 %v3113_v62  ;;  %1927 = vmatpush.bf16.msrb.mxu1 %v3097_v63 }
  0x81   :  { %1641 = vmatmul.bf16.gmra.mxu0 %v2239_v34 }
  0x82   :  { %1674 = vmatmul.bf16.gmra.mxu1 %v2243_v35 }
  0x83   :  { %1707 = vmatmul.bf16.gmra.mxu2 %v2247_v36  ;;  %v636_v36 = vpack.c.b16 %v556_v29, %v556_v29 }
  0x84   :  { %1740 = vmatmul.bf16.gmra.mxu3 %v2251_v37  ;;  %v637_v37 = vpack.c.b16 %v557_v30, %v557_v30  ;;  %v3103_v30 = vld [vmem:[%s4102_s1 + $0x398] sm:$0xff] }
  0x91   :  { %1646 = vmatmul.bf16.gmra.mxu0 %v2303_v50 }
  0x92   :  { %1679 = vmatmul.bf16.gmra.mxu1 %v2307_v51 }
  0x93   :  { %1712 = vmatmul.bf16.gmra.mxu2 %v2311_v52 }
  0x94   :  { %1745 = vmatmul.bf16.gmra.mxu3 %v2315_v53 }
  0x9e   :  { %v1505_v9 = vpop.f32.mrf.mxu0 }
  0x9f   :  { %v1538_v10 = vpop.f32.mrf.mxu1  ;;  %v1506_v13 = vadd.f32 %v3640_v61, %v1505_v9  ;;  %v2195_v9 = vor.u32 %v2928_v0, %v2192_v1 }
  0xa1   :  { %v1539_v14 = vadd.f32 %v1538_v10, %v1506_v13  ;;  %1651 = vmatmul.bf16.gmra.mxu0 %v2367_v7  ;;  %v2199_v13 = vor.u32 %v2937_v3, %v2198_v2  ;;  %v3086_v2 = vld [vmem:[%s4102_s1 + $0x310] sm:$0xff] }
  0xa2   :  { %1684 = vmatmul.bf16.gmra.mxu1 %v2371_v8  ;;  %v2191_v8 = vor.u32 %v2936_v57, %v2190_v56  ;;  %v3102_v57 = vld [vmem:[%s4102_s1 + $0x390] sm:$0xff] }
  0xa3   :  { %1717 = vmatmul.bf16.gmra.mxu2 %v2375_v11  ;;  %v3110_v3 = vld [vmem:[%s4102_s1 + $0x3d0] sm:$0xff] }
  0xa4   :  { %1750 = vmatmul.bf16.gmra.mxu3 %v2379_v12 }
  0xa6   :  { %v1571_v18 = vpop.f32.mrf.mxu2  ;;  %v1507_v21 = vpop.f32.mrf.mxu0 }
  0xa7   :  { %v1604_v19 = vpop.f32.mrf.mxu3  ;;  %v1572_v20 = vadd.f32 %v1571_v18, %v1539_v14  ;;  %v1540_v22 = vpop.f32.mrf.mxu1  ;;  %v1508_v24 = vadd.f32 %v3640_v61, %v1507_v21  ;;  %v2203_v14 = vor.u32 %v2929_v4, %v2200_v5  ;;  %v3104_v18 = vld [vmem:[%s4102_s1 + $0x3a0] sm:$0xff] }
  0xa8   :  { %v3096_v21 = vld [vmem:[%s4102_s1 + $0x360] sm:$0xff]  ;;  %1961 = vmatpush.bf16.msrb.mxu2 %v3104_v18 }
  0xa9   :  { %v3686_v26 = vadd.f32 %v1604_v19, %v1572_v20  ;;  %v1541_v28 = vadd.f32 %v1540_v22, %v1508_v24  ;;  %v3088_v19 = vld [vmem:[%s4102_s1 + $0x320] sm:$0xff]  ;;  %1928 = vmatpush.bf16.msrb.mxu1 %v3096_v21 }
  0xaa   :  { %v3112_v20 = vld [vmem:[%s4102_s1 + $0x3e0] sm:$0xff]  ;;  %1895 = vmatpush.bf16.msrb.mxu0 %v3088_v19 }
  0xab   :  { %1994 = vmatpush.bf16.msrb.mxu3 %v3112_v20  ;;  %v2318_v5 = vld [vmem:[%s4104_s0 + $0x120] sm:$0xf] }
  0xac   :  { %1962 = vmatpush.bf16.msrb.mxu2 %v3103_v30  ;;  %v3085_v30 = vld [vmem:[%s4102_s1 + $0x308] sm:$0xff] }
  0xae   :  { %v1573_v34 = vpop.f32.mrf.mxu2  ;;  %v1510_v39 = vpop.f32.mrf.mxu0  ;;  %1896 = vmatpush.bf16.msrb.mxu0 %v3087_v31  ;;  %v3109_v31 = vld [vmem:[%s4102_s1 + $0x3c8] sm:$0xff] }
  0xaf   :  { %v1606_v35 = vpop.f32.mrf.mxu3  ;;  %v1574_v38 = vadd.f32 %v1573_v34, %v1541_v28  ;;  %v1543_v40 = vpop.f32.mrf.mxu1  ;;  %v1511_v43 = vadd.f32 %v3640_v61, %v1510_v39  ;;  %v2254_v34 = vld [vmem:[%s4104_s0 + $0xa0] sm:$0xf]  ;;  %v2953_v39 = vld [vmem:[%s4104_s0 + $0xe4] sm:$0xf0]  ;;  %1995 = vmatpush.bf16.msrb.mxu3 %v3111_v32 }
  0xb0   :  { %1963 = vmatpush.bf16.msrb.mxu2 %v3102_v57 }
  0xb1   :  { %v3695_v44 = vadd.f32 %v1606_v35, %v1574_v38  ;;  %v1544_v47 = vadd.f32 %v1543_v40, %v1511_v43  ;;  %1656 = vmatmul.bf16.gmra.mxu0 %v636_v36  ;;  %v2952_v35 = vld [vmem:[%s4104_s0 + $0xdc] sm:$0xf0]  ;;  %v2944_v36 = vld [vmem:[%s4104_s0 + $0xa4] sm:$0xf]  ;;  %v2262_v38 = vld [vmem:[%s4104_s0 + $0xa8] sm:$0xf] }
  0xb2   :  { %1689 = vmatmul.bf16.gmra.mxu1 %v637_v37  ;;  %v2256_v37 = vld [vmem:[%s4104_s0 + $0xe0] sm:$0xf0]  ;;  %v2945_v40 = vld [vmem:[%s4104_s0 + $0xac] sm:$0xf]  ;;  %v2255_v45 = vor.u32 %v2952_v35, %v2254_v34  ;;  %1897 = vmatpush.bf16.msrb.mxu0 %v3086_v2 }
  0xb3   :  { %1722 = vmatmul.bf16.gmra.mxu2 %v638_v41  ;;  %v2264_v41 = vld [vmem:[%s4104_s0 + $0xe8] sm:$0xf0]  ;;  %v2259_v46 = vor.u32 %v2944_v36, %v2256_v37  ;;  %1996 = vmatpush.bf16.msrb.mxu3 %v3110_v3 }
  0xb4   :  { %1755 = vmatmul.bf16.gmra.mxu3 %v639_v42 }
  0xb6   :  { %v1576_v49 = vpop.f32.mrf.mxu2  ;;  %v1512_v52 = vpop.f32.mrf.mxu0  ;;  %1898 = vmatpush.bf16.msrb.mxu0 %v3085_v30 }
  0xb7   :  { %v1609_v50 = vpop.f32.mrf.mxu3  ;;  %v1577_v51 = vadd.f32 %v1576_v49, %v1544_v47  ;;  %v1545_v53 = vpop.f32.mrf.mxu1  ;;  %v1513_v54 = vadd.f32 %v3640_v61, %v1512_v52  ;;  %v3095_v47 = vld [vmem:[%s4102_s1 + $0x358] sm:$0xff]  ;;  %v2267_v52 = vor.u32 %v2945_v40, %v2264_v41  ;;  %1997 = vmatpush.bf16.msrb.mxu3 %v3109_v31  ;;  %v2976_v40 = vld [vmem:[%s4104_s0 + $0x1a4] sm:$0xf] }
  0xb8   :  { %1929 = vmatpush.bf16.msrb.mxu1 %v3095_v47  ;;  %v3100_v41 = vld [vmem:[%s4102_s1 + $0x380] sm:$0xff] }
  0xb9   :  { %v3707_v55 = vadd.f32 %v1609_v50, %v1577_v51  ;;  %v1546_v59 = vadd.f32 %v1545_v53, %v1513_v54  ;;  %v2263_v51 = vor.u32 %v2953_v39, %v2262_v38  ;;  %v2382_v38 = vld [vmem:[%s4104_s0 + $0x1a0] sm:$0xf] }
  0xba   :  { %v2984_v39 = vld [vmem:[%s4104_s0 + $0x1dc] sm:$0xf0] }
  0xbb   :  { %v3092_v47 = vld [vmem:[%s4102_s1 + $0x340] sm:$0xff] }
  0xbe   :  { %v1578_v6 = vpop.f32.mrf.mxu2  ;;  %v1515_v11 = vpop.f32.mrf.mxu0 }
  0xbf   :  { %v1611_v7 = vpop.f32.mrf.mxu3  ;;  %v1579_v10 = vadd.f32 %v1578_v6, %v1546_v59  ;;  %v1548_v12 = vpop.f32.mrf.mxu1  ;;  %v1516_v15 = vadd.f32 %v3640_v61, %v1515_v11  ;;  %v2968_v6 = vld [vmem:[%s4104_s0 + $0x15c] sm:$0xf0]  ;;  %v2969_v11 = vld [vmem:[%s4104_s0 + $0x164] sm:$0xf0] }
  0xc1   :  { %v3746_v16 = vadd.f32 %v1611_v7, %v1579_v10  ;;  %v1549_v17 = vadd.f32 %v1548_v12, %v1516_v15  ;;  %1768 = vmatmul.bf16.vlgmr.msra.gmra.mxu0 %v2191_v8  ;;  %v3094_v7 = vld [vmem:[%s4102_s1 + $0x350] sm:$0xff]  ;;  %v2960_v8 = vld [vmem:[%s4104_s0 + $0x124] sm:$0xf]  ;;  %v2326_v10 = vld [vmem:[%s4104_s0 + $0x128] sm:$0xf] }
  0xc2   :  { %1801 = vmatmul.bf16.vlgmr.msra.gmra.mxu1 %v2195_v9  ;;  %v2320_v9 = vld [vmem:[%s4104_s0 + $0x160] sm:$0xf0]  ;;  %v2961_v12 = vld [vmem:[%s4104_s0 + $0x12c] sm:$0xf] }
  0xc3   :  { %1834 = vmatmul.bf16.vlgmr.msra.gmra.mxu2 %v2199_v13  ;;  %v2328_v13 = vld [vmem:[%s4104_s0 + $0x168] sm:$0xf0]  ;;  %1930 = vmatpush.bf16.msrb.mxu1 %v3094_v7  ;;  %v2323_v18 = vor.u32 %v2960_v8, %v2320_v9 }
  0xc4   :  { %1867 = vmatmul.bf16.vlgmr.msra.gmra.mxu3 %v2203_v14 }
  0xc6   :  { %v1581_v22 = vpop.f32.mrf.mxu2  ;;  %v1517_v25 = vpop.f32.mrf.mxu0 }
  0xc7   :  { %v1614_v23 = vpop.f32.mrf.mxu3  ;;  %v1582_v24 = vadd.f32 %v1581_v22, %v1549_v17  ;;  %v1550_v27 = vpop.f32.mrf.mxu1  ;;  %v1518_v28 = vadd.f32 %v3640_v61, %v1517_v25  ;;  %v2319_v17 = vor.u32 %v2968_v6, %v2318_v5  ;;  %v2327_v22 = vor.u32 %v2969_v11, %v2326_v10  ;;  %v88_v6 = vld [vmem:[%s4104_s0 + $0x220] sm:$0xff] }
  0xc8   :  { %v560_v10 = vunpack.c.l.b16 %v88_v6  ;;  %v561_v11 = vunpack.c.h.b16 %v88_v6  ;;  %v2272_v6 = vld [vmem:[%s4104_s0 + $0xf0] sm:$0xf0] }
  0xc9   :  { %v3761_v29 = vadd.f32 %v1614_v23, %v1582_v24  ;;  %v1551_v33 = vadd.f32 %v1550_v27, %v1518_v28  ;;  %v2331_v23 = vor.u32 %v2961_v12, %v2328_v13  ;;  %v3101_v27 = vld [vmem:[%s4102_s1 + $0x388] sm:$0xff] }
  0xca   :  { %1964 = vmatpush.bf16.msrb.mxu2 %v3101_v27 }
  0xce   :  { %v1583_v42 = vpop.f32.mrf.mxu2  ;;  %v1520_v49 = vpop.f32.mrf.mxu0  ;;  %1965 = vmatpush.bf16.msrb.mxu2 %v3100_v41  ;;  %v2931_v41 = vld [vmem:[%s4104_s0 + $0x3c] sm:$0xf] }
  0xcf   :  { %v1616_v43 = vpop.f32.mrf.mxu3  ;;  %v1584_v48 = vadd.f32 %v1583_v42, %v1551_v33  ;;  %v1553_v50 = vpop.f32.mrf.mxu1  ;;  %v1521_v53 = vadd.f32 %v3640_v61, %v1520_v49  ;;  %v3084_v42 = vld [vmem:[%s4102_s1 + $0x300] sm:$0xff]  ;;  %v2977_v49 = vld [vmem:[%s4104_s0 + $0x1ac] sm:$0xf] }
  0xd0   :  { %1899 = vmatpush.bf16.msrb.mxu0 %v3084_v42  ;;  %v2216_v42 = vld [vmem:[%s4104_s0 + $0x78] sm:$0xf0] }
  0xd1   :  { %v3800_v54 = vadd.f32 %v1616_v43, %v1584_v48  ;;  %v1554_v56 = vadd.f32 %v1553_v50, %v1521_v53  ;;  %1773 = vmatmul.bf16.gmra.mxu0 %v2255_v45  ;;  %v3108_v43 = vld [vmem:[%s4102_s1 + $0x3c0] sm:$0xff]  ;;  %v2985_v48 = vld [vmem:[%s4104_s0 + $0x1e4] sm:$0xf0]  ;;  %v2392_v50 = vld [vmem:[%s4104_s0 + $0x1e8] sm:$0xf0]  ;;  %v2383_v53 = vor.u32 %v2984_v39, %v2382_v38 }
  0xd2   :  { %1806 = vmatmul.bf16.gmra.mxu1 %v2259_v46  ;;  %v2384_v45 = vld [vmem:[%s4104_s0 + $0x1e0] sm:$0xf0]  ;;  %v2390_v46 = vld [vmem:[%s4104_s0 + $0x1a8] sm:$0xf]  ;;  %1998 = vmatpush.bf16.msrb.mxu3 %v3108_v43  ;;  %v2930_v38 = vld [vmem:[%s4104_s0 + $0x34] sm:$0xf] }
  0xd3   :  { %1839 = vmatmul.bf16.gmra.mxu2 %v2263_v51  ;;  %v2208_v39 = vld [vmem:[%s4104_s0 + $0x70] sm:$0xf0] }
  0xd4   :  { %1872 = vmatmul.bf16.gmra.mxu3 %v2267_v52 }
  0xd6   :  { %v1586_v58 = vpop.f32.mrf.mxu2  ;;  %v1522_v62 = vpop.f32.mrf.mxu0 }
  0xd7   :  { %v1619_v59 = vpop.f32.mrf.mxu3  ;;  %v1587_v60 = vadd.f32 %v1586_v58, %v1554_v56  ;;  %v1555_v63 = vpop.f32.mrf.mxu1  ;;  %v1523_v0 = vadd.f32 %v3640_v61, %v1522_v62  ;;  %v2387_v56 = vor.u32 %v2976_v40, %v2384_v45  ;;  %v2939_v40 = vld [vmem:[%s4104_s0 + $0x74] sm:$0xf0] }
  0xd9   :  { %v3806_v1 = vadd.f32 %v1619_v59, %v1587_v60  ;;  %v1556_v4 = vadd.f32 %v1555_v63, %v1523_v0  ;;  %v2391_v59 = vor.u32 %v2985_v48, %v2390_v46  ;;  %v2395_v60 = vor.u32 %v2977_v49, %v2392_v50 }
  0xde   :  { %v1588_v14 = vpop.f32.mrf.mxu2  ;;  %v1525_v20 = vpop.f32.mrf.mxu0 }
  0xdf   :  { %v1621_v15 = vpop.f32.mrf.mxu3  ;;  %v1589_v19 = vadd.f32 %v1588_v14, %v1556_v4  ;;  %v1558_v21 = vpop.f32.mrf.mxu1  ;;  %v1526_v24 = vadd.f32 %v3640_v61, %v1525_v20  ;;  %v3093_v61 = vld [vmem:[%s4102_s1 + $0x348] sm:$0xff] }
  0xe0   :  { %1931 = vmatpush.bf16.msrb.mxu1 %v3093_v61 }
  0xe1   :  { %v3842_v25 = vadd.f32 %v1621_v15, %v1589_v19  ;;  %v1559_v28 = vadd.f32 %v1558_v21, %v1526_v24  ;;  %1778 = vmatmul.bf16.gmra.mxu0 %v2319_v17  ;;  %v640_v17 = vpack.c.b16 %v560_v10, %v560_v10 }
  0xe2   :  { %1811 = vmatmul.bf16.gmra.mxu1 %v2323_v18  ;;  %v641_v18 = vpack.c.b16 %v561_v11, %v561_v11 }
  0xe3   :  { %1844 = vmatmul.bf16.gmra.mxu2 %v2327_v22 }
  0xe4   :  { %1877 = vmatmul.bf16.gmra.mxu3 %v2331_v23  ;;  %1932 = vmatpush.bf16.msrb.mxu1 %v3092_v47  ;;  %v2211_v47 = vor.u32 %v2930_v38, %v2208_v39  ;;  %v2963_v38 = vld [vmem:[%s4104_s0 + $0x13c] sm:$0xf] }
  0xe5   :  { %v2344_v39 = vld [vmem:[%s4104_s0 + $0x178] sm:$0xf0] }
  0xe6   :  { %v1591_v32 = vpop.f32.mrf.mxu2  ;;  %v1527_v35 = vpop.f32.mrf.mxu0 }
  0xe7   :  { %v1624_v33 = vpop.f32.mrf.mxu3  ;;  %v1592_v34 = vadd.f32 %v1591_v32, %v1559_v28  ;;  %v1560_v36 = vpop.f32.mrf.mxu1 }
  0xe8   :  { %v2938_v36 = vld [vmem:[%s4104_s0 + $0x6c] sm:$0xf0] }
  0xe9   :  { %v3856_v37 = vadd.f32 %v1624_v33, %v1592_v34 }
  0xee   :  { %v1593_v51 = vpop.f32.mrf.mxu2  ;;  %v1637_v57 = vpop.f32.mrf.mxu0 }
  0xef   :  { %v1626_v52 = vpop.f32.mrf.mxu3  ;;  %v1670_v58 = vpop.f32.mrf.mxu1  ;;  %v1638_v62 = vadd.f32 %v1637_v57, %v3686_v26  ;;  %v89_v26 = vld [vmem:[%s4104_s0 + $0x228] sm:$0xff] }
  0xf0   :  { %v562_v12 = vunpack.c.l.b16 %v89_v26  ;;  %v563_v13 = vunpack.c.h.b16 %v89_v26  ;;  %v2219_v52 = vor.u32 %v2931_v41, %v2216_v42  ;;  %v2947_v26 = vld [vmem:[%s4104_s0 + $0xbc] sm:$0xf] }
  0xf1   :  { %v1671_v63 = vadd.f32 %v1670_v58, %v1638_v62  ;;  %1783 = vmatmul.bf16.gmra.mxu0 %v2383_v53 }
  0xf2   :  { %1816 = vmatmul.bf16.gmra.mxu1 %v2387_v56  ;;  %v642_v22 = vpack.c.b16 %v562_v12, %v562_v12 }
  0xf3   :  { %1849 = vmatmul.bf16.gmra.mxu2 %v2391_v59 }
  0xf4   :  { %1882 = vmatmul.bf16.gmra.mxu3 %v2395_v60 }
  0xf6   :  { %v1703_v0 = vpop.f32.mrf.mxu2  ;;  %v1639_v4 = vpop.f32.mrf.mxu0 }
  0xf7   :  { %v1736_v2 = vpop.f32.mrf.mxu3  ;;  %v1704_v3 = vadd.f32 %v1703_v0, %v1671_v63  ;;  %v1672_v5 = vpop.f32.mrf.mxu1  ;;  %v1640_v7 = vadd.f32 %v1639_v4, %v3695_v44  ;;  %v643_v44 = vpack.c.b16 %v563_v13, %v563_v13  ;;  %v2954_v4 = vld [vmem:[%s4104_s0 + $0xec] sm:$0xf0] }
  0xf9   :  { %v3902_v8 = vadd.f32 %v1736_v2, %v1704_v3  ;;  %v1673_v9 = vadd.f32 %v1672_v5, %v1640_v7  ;;  %v2946_v5 = vld [vmem:[%s4104_s0 + $0xb4] sm:$0xf]  ;;  %v2955_v7 = vld [vmem:[%s4104_s0 + $0xf4] sm:$0xf0] }
  0xfa   :  { %v2275_v13 = vor.u32 %v2946_v5, %v2272_v6  ;;  %v2408_v5 = vld [vmem:[%s4104_s0 + $0x1f8] sm:$0xf0] }
  0xfe   :  { %v1705_v14 = vpop.f32.mrf.mxu2  ;;  %v1642_v20 = vpop.f32.mrf.mxu0 }
  0xff   :  { %v1738_v15 = vpop.f32.mrf.mxu3  ;;  %v1706_v19 = vadd.f32 %v1705_v14, %v1673_v9  ;;  %v1675_v21 = vpop.f32.mrf.mxu1  ;;  %v1643_v23 = vadd.f32 %v1642_v20, %v3707_v55  ;;  %v2206_v55 = vld [vmem:[%s4104_s0 + $0x30] sm:$0xf]  ;;  %v2280_v9 = vld [vmem:[%s4104_s0 + $0xf8] sm:$0xf0] }
 0x100   :  { %v2207_v46 = vor.u32 %v2938_v36, %v2206_v55  ;;  %v2336_v55 = vld [vmem:[%s4104_s0 + $0x170] sm:$0xf0]  ;;  %v2971_v36 = vld [vmem:[%s4104_s0 + $0x174] sm:$0xf0] }
 0x101   :  { %v3905_v24 = vadd.f32 %v1738_v15, %v1706_v19  ;;  %v1676_v27 = vadd.f32 %v1675_v21, %v1643_v23  ;;  %1788 = vmatmul.bf16.gmra.mxu0 %v640_v17  ;;  %v2283_v19 = vor.u32 %v2947_v26, %v2280_v9 }
 0x102   :  { %1821 = vmatmul.bf16.gmra.mxu1 %v641_v18 }
 0x103   :  { %1854 = vmatmul.bf16.gmra.mxu2 %v642_v22 }
 0x104   :  { %1887 = vmatmul.bf16.gmra.mxu3 %v643_v44 }
 0x106   :  { %v1708_v28 = vpop.f32.mrf.mxu2  ;;  %v1644_v61 = vpop.f32.mrf.mxu0 }
 0x107   :  { %v1741_v30 = vpop.f32.mrf.mxu3  ;;  %v1709_v31 = vadd.f32 %v1708_v28, %v1676_v27  ;;  %v1677_v32 = vpop.f32.mrf.mxu1  ;;  %v1645_v33 = vadd.f32 %v1644_v61, %v3746_v16  ;;  %v2214_v16 = vld [vmem:[%s4104_s0 + $0x38] sm:$0xf] }
 0x108   :  { %v2215_v51 = vor.u32 %v2939_v40, %v2214_v16 }
 0x109   :  { %v3908_v34 = vadd.f32 %v1741_v30, %v1709_v31  ;;  %v1678_v35 = vadd.f32 %v1677_v32, %v1645_v33  ;;  %v2970_v33 = vld [vmem:[%s4104_s0 + $0x16c] sm:$0xf0] }
 0x10e   :  { %v1710_v43 = vpop.f32.mrf.mxu2  ;;  %v1647_v49 = vpop.f32.mrf.mxu0 }
 0x10f   :  { %v1743_v45 = vpop.f32.mrf.mxu3  ;;  %v1711_v48 = vadd.f32 %v1710_v43, %v1678_v35  ;;  %v1680_v50 = vpop.f32.mrf.mxu1  ;;  %v1648_v53 = vadd.f32 %v1647_v49, %v3761_v29  ;;  %v2270_v29 = vld [vmem:[%s4104_s0 + $0xb0] sm:$0xf]  ;;  %v2962_v35 = vld [vmem:[%s4104_s0 + $0x134] sm:$0xf] }
 0x110   :  { %v2271_v12 = vor.u32 %v2954_v4, %v2270_v29  ;;  %v2339_v42 = vor.u32 %v2962_v35, %v2336_v55  ;;  %v2987_v29 = vld [vmem:[%s4104_s0 + $0x1f4] sm:$0xf0]  ;;  %v2979_v4 = vld [vmem:[%s4104_s0 + $0x1bc] sm:$0xf] }
 0x111   :  { %v3935_v56 = vadd.f32 %v1743_v45, %v1711_v48  ;;  %v1681_v57 = vadd.f32 %v1680_v50, %v1648_v53  ;;  %1900 = vmatmul.bf16.vlgmr.msrb.gmra.mxu0 %v2207_v46  ;;  %v2347_v48 = vor.u32 %v2963_v38, %v2344_v39 }
 0x112   :  { %1933 = vmatmul.bf16.vlgmr.msrb.gmra.mxu1 %v2211_v47 }
 0x113   :  { %1966 = vmatmul.bf16.vlgmr.msrb.gmra.mxu2 %v2215_v51 }
 0x114   :  { %1999 = vmatmul.bf16.vlgmr.msrb.gmra.mxu3 %v2219_v52 }
 0x116   :  { %v1713_v58 = vpop.f32.mrf.mxu2  ;;  %v1649_v62 = vpop.f32.mrf.mxu0 }
 0x117   :  { %v1746_v59 = vpop.f32.mrf.mxu3  ;;  %v1714_v60 = vadd.f32 %v1713_v58, %v1681_v57  ;;  %v1682_v63 = vpop.f32.mrf.mxu1  ;;  %v1650_v0 = vadd.f32 %v1649_v62, %v3800_v54  ;;  %v2278_v54 = vld [vmem:[%s4104_s0 + $0xb8] sm:$0xf]  ;;  %v2398_v62 = vld [vmem:[%s4104_s0 + $0x1b0] sm:$0xf] }
 0x118   :  { %v2279_v18 = vor.u32 %v2955_v7, %v2278_v54 }
 0x119   :  { %v3938_v2 = vadd.f32 %v1746_v59, %v1714_v60  ;;  %v1683_v3 = vadd.f32 %v1682_v63, %v1650_v0  ;;  %v2978_v63 = vld [vmem:[%s4104_s0 + $0x1b4] sm:$0xf] }
 0x11a   :  { %v2400_v0 = vld [vmem:[%s4104_s0 + $0x1f0] sm:$0xf0] }
 0x11b   :  { %v2403_v26 = vor.u32 %v2978_v63, %v2400_v0 }
 0x11e   :  { %v1715_v10 = vpop.f32.mrf.mxu2  ;;  %v1652_v15 = vpop.f32.mrf.mxu0 }
 0x11f   :  { %v1748_v11 = vpop.f32.mrf.mxu3  ;;  %v1716_v14 = vadd.f32 %v1715_v10, %v1683_v3  ;;  %v1685_v17 = vpop.f32.mrf.mxu1  ;;  %v1653_v20 = vadd.f32 %v1652_v15, %v3806_v1  ;;  %v2334_v1 = vld [vmem:[%s4104_s0 + $0x130] sm:$0xf]  ;;  %v2406_v3 = vld [vmem:[%s4104_s0 + $0x1b8] sm:$0xf] }
 0x120   :  { %v2335_v41 = vor.u32 %v2970_v33, %v2334_v1 }
 0x121   :  { %v3965_v21 = vadd.f32 %v1748_v11, %v1716_v14  ;;  %v1686_v22 = vadd.f32 %v1685_v17, %v1653_v20  ;;  %1905 = vmatmul.bf16.gmra.mxu0 %v2271_v12  ;;  %v2407_v11 = vor.u32 %v2987_v29, %v2406_v3  ;;  %v2411_v12 = vor.u32 %v2979_v4, %v2408_v5 }
 0x122   :  { %1938 = vmatmul.bf16.gmra.mxu1 %v2275_v13 }
 0x123   :  { %1971 = vmatmul.bf16.gmra.mxu2 %v2279_v18 }
 0x124   :  { %2004 = vmatmul.bf16.gmra.mxu3 %v2283_v19 }
 0x126   :  { %v1718_v44 = vpop.f32.mrf.mxu2  ;;  %v1654_v28 = vpop.f32.mrf.mxu0 }
 0x127   :  { %v1751_v23 = vpop.f32.mrf.mxu3  ;;  %v1719_v27 = vadd.f32 %v1718_v44, %v1686_v22  ;;  %v1687_v30 = vpop.f32.mrf.mxu1  ;;  %v1655_v31 = vadd.f32 %v1654_v28, %v3842_v25  ;;  %v2342_v25 = vld [vmem:[%s4104_s0 + $0x138] sm:$0xf]  ;;  %v90_v22 = vld [vmem:[%s4104_s0 + $0x230] sm:$0xff] }
 0x128   :  { %v2343_v47 = vor.u32 %v2971_v36, %v2342_v25  ;;  %v564_v28 = vunpack.c.l.b16 %v90_v22 }
 0x129   :  { %v3968_v61 = vadd.f32 %v1751_v23, %v1719_v27  ;;  %v1688_v32 = vadd.f32 %v1687_v30, %v1655_v31  ;;  %v565_v30 = vunpack.c.h.b16 %v90_v22 }
 0x12a   :  { %v644_v35 = vpack.c.b16 %v564_v28, %v564_v28 }
 0x12b   :  { %v645_v55 = vpack.c.b16 %v565_v30, %v565_v30 }
 0x12e   :  { %v1720_v16 = vpop.f32.mrf.mxu2  ;;  %v1657_v45 = vpop.f32.mrf.mxu0 }
 0x12f   :  { %v1753_v40 = vpop.f32.mrf.mxu3  ;;  %v1721_v43 = vadd.f32 %v1720_v16, %v1688_v32  ;;  %v1690_v46 = vpop.f32.mrf.mxu1  ;;  %v1658_v49 = vadd.f32 %v1657_v45, %v3856_v37  ;;  %v2986_v37 = vld [vmem:[%s4104_s0 + $0x1ec] sm:$0xf0] }
 0x130   :  { %v2399_v7 = vor.u32 %v2986_v37, %v2398_v62 }
 0x131   :  { %v3995_v50 = vadd.f32 %v1753_v40, %v1721_v43  ;;  %v1691_v51 = vadd.f32 %v1690_v46, %v1658_v49  ;;  %1910 = vmatmul.bf16.gmra.mxu0 %v2335_v41 }
 0x132   :  { %1943 = vmatmul.bf16.gmra.mxu1 %v2339_v42 }
 0x133   :  { %1976 = vmatmul.bf16.gmra.mxu2 %v2343_v47 }
 0x134   :  { %2009 = vmatmul.bf16.gmra.mxu3 %v2347_v48 }
 0x136   :  { %v1723_v52 = vpop.f32.mrf.mxu2  ;;  %v1659_v58 = vpop.f32.mrf.mxu0 }
 0x137   :  { %v1756_v53 = vpop.f32.mrf.mxu3  ;;  %v1724_v57 = vadd.f32 %v1723_v52, %v1691_v51  ;;  %v1692_v59 = vpop.f32.mrf.mxu1 }
 0x139   :  { %v3997_v60 = vadd.f32 %v1756_v53, %v1724_v57 }
 0x13e   :  { %v1725_v6 = vpop.f32.mrf.mxu2  ;;  %v1769_v9 = vpop.f32.mrf.mxu0 }
 0x13f   :  { %v1758_v54 = vpop.f32.mrf.mxu3  ;;  %v1802_v10 = vpop.f32.mrf.mxu1  ;;  %v1770_v13 = vadd.f32 %v1769_v9, %v3902_v8  ;;  %v91_v8 = vld [vmem:[%s4104_s0 + $0x238] sm:$0xff] }
 0x140   :  { %v566_v31 = vunpack.c.l.b16 %v91_v8  ;;  %v567_v32 = vunpack.c.h.b16 %v91_v8 }
 0x141   :  { %v1803_v14 = vadd.f32 %v1802_v10, %v1770_v13  ;;  %1915 = vmatmul.bf16.gmra.mxu0 %v2399_v7 }
 0x142   :  { %1948 = vmatmul.bf16.gmra.mxu1 %v2403_v26  ;;  %v646_v39 = vpack.c.b16 %v566_v31, %v566_v31 }
 0x143   :  { %1981 = vmatmul.bf16.gmra.mxu2 %v2407_v11 }
 0x144   :  { %2014 = vmatmul.bf16.gmra.mxu3 %v2411_v12 }
 0x146   :  { %v1835_v15 = vpop.f32.mrf.mxu2  ;;  %v1771_v19 = vpop.f32.mrf.mxu0 }
 0x147   :  { %v1868_v17 = vpop.f32.mrf.mxu3  ;;  %v1836_v18 = vadd.f32 %v1835_v15, %v1803_v14  ;;  %v1804_v20 = vpop.f32.mrf.mxu1  ;;  %v1772_v44 = vadd.f32 %v1771_v19, %v3905_v24  ;;  %v647_v24 = vpack.c.b16 %v567_v32, %v567_v32 }
 0x149   :  { %v4031_v23 = vadd.f32 %v1868_v17, %v1836_v18  ;;  %v1805_v27 = vadd.f32 %v1804_v20, %v1772_v44 }
 0x14e   :  { %v1837_v1 = vpop.f32.mrf.mxu2  ;;  %v1774_v36 = vpop.f32.mrf.mxu0 }
 0x14f   :  { %v1870_v33 = vpop.f32.mrf.mxu3  ;;  %v1838_v25 = vadd.f32 %v1837_v1, %v1805_v27  ;;  %v1807_v38 = vpop.f32.mrf.mxu1  ;;  %v1775_v16 = vadd.f32 %v1774_v36, %v3908_v34 }
 0x151   :  { %v4034_v40 = vadd.f32 %v1870_v33, %v1838_v25  ;;  %v1808_v41 = vadd.f32 %v1807_v38, %v1775_v16  ;;  %1920 = vmatmul.bf16.gmra.mxu0 %v644_v35 }
 0x152   :  { %1953 = vmatmul.bf16.gmra.mxu1 %v645_v55 }
 0x153   :  { %1986 = vmatmul.bf16.gmra.mxu2 %v646_v39 }
 0x154   :  { %2019 = vmatmul.bf16.gmra.mxu3 %v647_v24 }
 0x156   :  { %v1840_v42 = vpop.f32.mrf.mxu2  ;;  %v1776_v46 = vpop.f32.mrf.mxu0 }
 0x157   :  { %v1873_v43 = vpop.f32.mrf.mxu3  ;;  %v1841_v45 = vadd.f32 %v1840_v42, %v1808_v41  ;;  %v1809_v47 = vpop.f32.mrf.mxu1  ;;  %v1777_v48 = vadd.f32 %v1776_v46, %v3935_v56 }
 0x159   :  { %v4037_v49 = vadd.f32 %v1873_v43, %v1841_v45  ;;  %v1810_v51 = vadd.f32 %v1809_v47, %v1777_v48 }
 0x15e   :  { %v1842_v52 = vpop.f32.mrf.mxu2  ;;  %v1779_v57 = vpop.f32.mrf.mxu0 }
 0x15f   :  { %v1875_v53 = vpop.f32.mrf.mxu3  ;;  %v1843_v34 = vadd.f32 %v1842_v52, %v1810_v51  ;;  %v1812_v58 = vpop.f32.mrf.mxu1  ;;  %v1780_v59 = vadd.f32 %v1779_v57, %v3938_v2 }
 0x161   :  { %v4040_v62 = vadd.f32 %v1875_v53, %v1843_v34  ;;  %v1813_v37 = vadd.f32 %v1812_v58, %v1780_v59 }
 0x166   :  { %v1845_v63 = vpop.f32.mrf.mxu2  ;;  %v1781_v29 = vpop.f32.mrf.mxu0 }
 0x167   :  { %v1878_v0 = vpop.f32.mrf.mxu3  ;;  %v1846_v3 = vadd.f32 %v1845_v63, %v1813_v37  ;;  %v1814_v4 = vpop.f32.mrf.mxu1  ;;  %v1782_v56 = vadd.f32 %v1781_v29, %v3965_v21 }
 0x169   :  { %v4043_v5 = vadd.f32 %v1878_v0, %v1846_v3  ;;  %v1815_v6 = vadd.f32 %v1814_v4, %v1782_v56 }
 0x16e   :  { %v1847_v54 = vpop.f32.mrf.mxu2  ;;  %v1784_v9 = vpop.f32.mrf.mxu0 }
 0x16f   :  { %v1880_v7 = vpop.f32.mrf.mxu3  ;;  %v1848_v26 = vadd.f32 %v1847_v54, %v1815_v6  ;;  %v1817_v10 = vpop.f32.mrf.mxu1  ;;  %v1785_v2 = vadd.f32 %v1784_v9, %v3968_v61 }
 0x171   :  { %v4046_v11 = vadd.f32 %v1880_v7, %v1848_v26  ;;  %v1818_v12 = vadd.f32 %v1817_v10, %v1785_v2 }
 0x176   :  { %v1850_v13 = vpop.f32.mrf.mxu2  ;;  %v1786_v17 = vpop.f32.mrf.mxu0 }
 0x177   :  { %v1883_v14 = vpop.f32.mrf.mxu3  ;;  %v1851_v15 = vadd.f32 %v1850_v13, %v1818_v12  ;;  %v1819_v18 = vpop.f32.mrf.mxu1  ;;  %v1787_v21 = vadd.f32 %v1786_v17, %v3995_v50 }
 0x179   :  { %v4049_v19 = vadd.f32 %v1883_v14, %v1851_v15  ;;  %v1820_v20 = vadd.f32 %v1819_v18, %v1787_v21 }
 0x17e   :  { %v1852_v22 = vpop.f32.mrf.mxu2  ;;  %v1789_v27 = vpop.f32.mrf.mxu0 }
 0x17f   :  { %v1885_v44 = vpop.f32.mrf.mxu3  ;;  %v1853_v8 = vadd.f32 %v1852_v22, %v1820_v20  ;;  %v1822_v28 = vpop.f32.mrf.mxu1  ;;  %v1790_v61 = vadd.f32 %v1789_v27, %v3997_v60 }
 0x181   :  { %v4052_v30 = vadd.f32 %v1885_v44, %v1853_v8  ;;  %v1823_v31 = vadd.f32 %v1822_v28, %v1790_v61 }
 0x186   :  { %v1855_v32 = vpop.f32.mrf.mxu2  ;;  %v1791_v35 = vpop.f32.mrf.mxu0 }
 0x187   :  { %v1888_v1 = vpop.f32.mrf.mxu3  ;;  %v1856_v33 = vadd.f32 %v1855_v32, %v1823_v31  ;;  %v1824_v55 = vpop.f32.mrf.mxu1 }
 0x189   :  { %v4054_v25 = vadd.f32 %v1888_v1, %v1856_v33 }
 0x18e   :  { %v1857_v50 = vpop.f32.mrf.mxu2  ;;  %v1901_v38 = vpop.f32.mrf.mxu0 }
 0x18f   :  { %v1890_v36 = vpop.f32.mrf.mxu3  ;;  %v1934_v39 = vpop.f32.mrf.mxu1  ;;  %v1902_v41 = vadd.f32 %v1901_v38, %v4031_v23 }
 0x191   :  { %v1935_v45 = vadd.f32 %v1934_v39, %v1902_v41 }
 0x196   :  { %v1967_v24 = vpop.f32.mrf.mxu2  ;;  %v1903_v42 = vpop.f32.mrf.mxu0 }
 0x197   :  { %v2000_v16 = vpop.f32.mrf.mxu3  ;;  %v1936_v60 = vpop.f32.mrf.mxu1  ;;  %v1904_v43 = vadd.f32 %v1903_v42, %v4034_v40  ;;  %v1968_v46 = vadd.f32 %v1967_v24, %v1935_v45  ;;  %v3147_v42 = vmov 72.0  }
 0x198   :  { %3143 = vrcp.f32 %v3147_v42 }
 0x199   :  { %v1937_v47 = vadd.f32 %v1936_v60, %v1904_v43  ;;  %v4058_v57 = vadd.f32 %v2000_v16, %v1968_v46 }
 0x19e   :  { %v1969_v48 = vpop.f32.mrf.mxu2  ;;  %v1906_v53 = vpop.f32.mrf.mxu0 }
 0x19f   :  { %v2002_v51 = vpop.f32.mrf.mxu3  ;;  %v1970_v52 = vadd.f32 %v1969_v48, %v1937_v47  ;;  %v1939_v34 = vpop.f32.mrf.mxu1  ;;  %v1907_v59 = vadd.f32 %v1906_v53, %v4037_v49 }
 0x1a1   :  { %v4060_v58 = vadd.f32 %v2002_v51, %v1970_v52  ;;  %v1940_v37 = vadd.f32 %v1939_v34, %v1907_v59  ;;  %v3144_v51 = vpop.eup %3143 }
 0x1a2   :  { %vm2043_vm0 = vweird.f32 %v3144_v51 }
 0x1a3   :  { %v2024_v23 = vadd.f32 %v4060_v58, %v4058_v57 }
 0x1a6   :  { %v1972_v63 = vpop.f32.mrf.mxu2  ;;  %v1908_v3 = vpop.f32.mrf.mxu0 }
 0x1a7   :  { %v2005_v40 = vpop.f32.mrf.mxu3  ;;  %v1973_v0 = vadd.f32 %v1972_v63, %v1940_v37  ;;  %v1941_v29 = vpop.f32.mrf.mxu1  ;;  %v1909_v56 = vadd.f32 %v1908_v3, %v4040_v62 }
 0x1a9   :  { %v4065_v4 = vadd.f32 %v2005_v40, %v1973_v0  ;;  %v1942_v54 = vadd.f32 %v1941_v29, %v1909_v56 }
 0x1ab   :  { %v2025_v6 = vadd.f32 %v2024_v23, %v4065_v4  ;;  %v2039_v23 = vmul.f32 72.0, %v3144_v51 }
 0x1ad   :  { %v2040_v0 = vsub.f32 1.0, %v2039_v23 }
 0x1ae   :  { %v1974_v7 = vpop.f32.mrf.mxu2  ;;  %v1911_v49 = vpop.f32.mrf.mxu0 }
 0x1af   :  { %v2007_v26 = vpop.f32.mrf.mxu3  ;;  %v1975_v9 = vadd.f32 %v1974_v7, %v1942_v54  ;;  %v1944_v10 = vpop.f32.mrf.mxu1  ;;  %v1912_v12 = vadd.f32 %v1911_v49, %v4043_v5  ;;  %v2041_v56 = vmul.f32 %v3144_v51, %v2040_v0 }
 0x1b1   :  { %v4069_v2 = vadd.f32 %v2007_v26, %v1975_v9  ;;  %v1945_v14 = vadd.f32 %v1944_v10, %v1912_v12  ;;  %v2042_v9 = vadd.f32 %v3144_v51, %v2041_v56 }
 0x1b3   :  { %v2026_v13 = vadd.f32 %v2025_v6, %v4069_v2  ;;  %v2044_v10 = vsel %vm2043_vm0, %v3144_v51, %v2042_v9  ;;  %v3141_v51 = vld [vmem:[%s4105_s3] ss:$0 sm:$0xff] }
 0x1b6   :  { %v1977_v15 = vpop.f32.mrf.mxu2  ;;  %v1913_v21 = vpop.f32.mrf.mxu0 }
 0x1b7   :  { %v2010_v17 = vpop.f32.mrf.mxu3  ;;  %v1978_v18 = vadd.f32 %v1977_v15, %v1945_v14  ;;  %v1946_v62 = vpop.f32.mrf.mxu1  ;;  %v1914_v22 = vadd.f32 %v1913_v21, %v4046_v11 }
 0x1b9   :  { %v2011_v20 = vadd.f32 %v2010_v17, %v1978_v18  ;;  %v1947_v8 = vadd.f32 %v1946_v62, %v1914_v22 }
 0x1bb   :  { %v2027_v44 = vadd.f32 %v2026_v13, %v2011_v20 }
 0x1be   :  { %v1979_v27 = vpop.f32.mrf.mxu2  ;;  %v1916_v31 = vpop.f32.mrf.mxu0 }
 0x1bf   :  { %v2012_v28 = vpop.f32.mrf.mxu3  ;;  %v1980_v61 = vadd.f32 %v1979_v27, %v1947_v8  ;;  %v1949_v32 = vpop.f32.mrf.mxu1  ;;  %v1917_v5 = vadd.f32 %v1916_v31, %v4049_v19 }
 0x1c1   :  { %v2013_v1 = vadd.f32 %v2012_v28, %v1980_v61  ;;  %v1950_v35 = vadd.f32 %v1949_v32, %v1917_v5 }
 0x1c3   :  { %v2028_v33 = vadd.f32 %v2027_v44, %v2013_v1 }
 0x1c6   :  { %v1982_v55 = vpop.f32.mrf.mxu2  ;;  %v1918_v38 = vpop.f32.mrf.mxu0 }
 0x1c7   :  { %v2015_v50 = vpop.f32.mrf.mxu3  ;;  %v1983_v36 = vadd.f32 %v1982_v55, %v1950_v35  ;;  %v1951_v39 = vpop.f32.mrf.mxu1  ;;  %v1919_v11 = vadd.f32 %v1918_v38, %v4052_v30 }
 0x1c9   :  { %v2016_v24 = vadd.f32 %v2015_v50, %v1983_v36  ;;  %v1952_v41 = vadd.f32 %v1951_v39, %v1919_v11 }
 0x1cb   :  { %v2029_v16 = vadd.f32 %v2028_v33, %v2016_v24 }
 0x1ce   :  { %v1984_v60 = vpop.f32.mrf.mxu2  ;;  %v1921_v46 = vpop.f32.mrf.mxu0 }
 0x1cf   :  { %v2017_v43 = vpop.f32.mrf.mxu3  ;;  %v1985_v45 = vadd.f32 %v1984_v60, %v1952_v41  ;;  %v1954_v47 = vpop.f32.mrf.mxu1  ;;  %v1922_v48 = vadd.f32 %v1921_v46, %v4054_v25 }
 0x1d1   :  { %v2018_v19 = vadd.f32 %v2017_v43, %v1985_v45  ;;  %v1955_v53 = vadd.f32 %v1954_v47, %v1922_v48 }
 0x1d3   :  { %v2030_v52 = vadd.f32 %v2029_v16, %v2018_v19 }
 0x1d6   :  { %v1987_v34 = vpop.f32.mrf.mxu2  ;;  %v1923_v30 = vpop.f32.mrf.mxu0 }
 0x1d7   :  { %v2020_v59 = vpop.f32.mrf.mxu3  ;;  %v1988_v37 = vadd.f32 %v1987_v34, %v1955_v53  ;;  %v1956_v63 = vpop.f32.mrf.mxu1 }
 0x1d9   :  { %v2021_v40 = vadd.f32 %v2020_v59, %v1988_v37  ;;  %v3142_v37 = vld [vmem:[%s4106_s4] ss:$0 sm:$0xff] }
 0x1db   :  { %v2031_v3 = vadd.f32 %v2030_v52, %v2021_v40 }
 0x1dd   :  { %v2032_v29 = vrot.slane %v2031_v3, 4 }
 0x1de   :  { %v1989_v6 = vpop.f32.mrf.mxu2 }
 0x1df   :  { %v2022_v54 = vpop.f32.mrf.mxu3  ;;  %v2033_v7 = vadd.f32 %v2032_v29, %v2031_v3 }
 0x1e1   :  { %v2034_v26 = vrot.slane %v2033_v7, 2 }
 0x1e3   :  { %v2035_v25 = vadd.f32 %v2034_v26, %v2033_v7 }
 0x1e5   :  { %v2036_v49 = vrot.slane %v2035_v25, 1 }
 0x1e7   :  { %v2037_v12 = vadd.f32 %v2036_v49, %v2035_v25 }
 0x1e9   :  { %v2045_v13 = vmul.f32 %v2044_v10, %v2037_v12 }
 0x1eb   :  { %v2046_v14 = vsub.f32 %v4058_v57, %v2045_v13  ;;  %v2047_v15 = vsub.f32 %v4060_v58, %v2045_v13  ;;  %v2048_v17 = vsub.f32 %v4065_v4, %v2045_v13  ;;  %v2049_v18 = vsub.f32 %v4069_v2, %v2045_v13 }
 0x1ec   :  { %v2050_v21 = vsub.f32 %v2011_v20, %v2045_v13  ;;  %v2051_v62 = vsub.f32 %v2013_v1, %v2045_v13  ;;  %v2052_v22 = vsub.f32 %v2016_v24, %v2045_v13  ;;  %v2053_v44 = vsub.f32 %v2018_v19, %v2045_v13 }
 0x1ed   :  { %v2054_v8 = vsub.f32 %v2021_v40, %v2045_v13  ;;  %v2055_v27 = vmul.f32 %v2046_v14, %v2046_v14  ;;  %v2056_v28 = vmul.f32 %v2047_v15, %v2047_v15  ;;  %v2057_v61 = vmul.f32 %v2048_v17, %v2048_v17 }
 0x1ee   :  { %v2058_v32 = vmul.f32 %v2049_v18, %v2049_v18  ;;  %v2059_v33 = vmul.f32 %v2050_v21, %v2050_v21  ;;  %v2060_v57 = vmul.f32 %v2051_v62, %v2051_v62  ;;  %v2061_v58 = vmul.f32 %v2052_v22, %v2052_v22 }
 0x1ef   :  { %v2064_v31 = vadd.f32 %v2056_v28, %v2055_v27  ;;  %v2062_v4 = vmul.f32 %v2053_v44, %v2053_v44  ;;  %v2063_v2 = vmul.f32 %v2054_v8, %v2054_v8 }
 0x1f1   :  { %v2065_v5 = vadd.f32 %v2064_v31, %v2057_v61 }
 0x1f3   :  { %v2066_v35 = vadd.f32 %v2065_v5, %v2058_v32 }
 0x1f5   :  { %v2067_v55 = vadd.f32 %v2066_v35, %v2059_v33 }
 0x1f7   :  { %v2068_v50 = vadd.f32 %v2067_v55, %v2060_v57 }
 0x1f9   :  { %v2069_v36 = vadd.f32 %v2068_v50, %v2061_v58 }
 0x1fb   :  { %v2070_v20 = vadd.f32 %v2069_v36, %v2062_v4 }
 0x1fd   :  { %v2071_v1 = vadd.f32 %v2070_v20, %v2063_v2 }
 0x1ff   :  { %v2072_v38 = vrot.slane %v2071_v1, 4 }
 0x201   :  { %v2073_v39 = vadd.f32 %v2072_v38, %v2071_v1 }
 0x203   :  { %v2074_v24 = vrot.slane %v2073_v39, 2 }
 0x205   :  { %v2075_v11 = vadd.f32 %v2074_v24, %v2073_v39 }
 0x207   :  { %v2076_v16 = vrot.slane %v2075_v11, 1 }
 0x209   :  { %v2077_v41 = vadd.f32 %v2076_v16, %v2075_v11 }
 0x20b   :  { %v2078_v42 = vmul.f32 %v2077_v41, %v2044_v10 }
 0x20d   :  { %v2079_v60 = vadd.f32 1e-05, %v2078_v42 }
 0x20f   :  { %3145 = vrsqrt.f32 %v2079_v60  ;;  %vm2086_vm2 = vweird.f32 %v2079_v60 }
 0x215   :  { %v3146_v43 = vpop.eup %3145 }
 0x216   :  { %v2081_v45 = vmul.f32 %v3146_v43, %v2079_v60  ;;  %vm2087_vm1 = vweird.f32 %v3146_v43 }
 0x217   :  { %vm2088_vm3 = vmor %vm2086_vm2, %vm2087_vm1 }
 0x218   :  { %v2082_v46 = vmul.f32 %v3146_v43, %v2081_v45 }
 0x21a   :  { %v2083_v47 = vmul.f32 0.5, %v2082_v46 }
 0x21c   :  { %v2084_v19 = vsub.f32 1.5, %v2083_v47 }
 0x21e   :  { %v2085_v48 = vmul.f32 %v3146_v43, %v2084_v19 }
 0x220   :  { %v2089_v52 = vsel %vm2088_vm3, %v3146_v43, %v2085_v48 }
 0x221   :  { %v2090_v53 = vmul.f32 %v2089_v52, %v2046_v14  ;;  %v2091_v34 = vmul.f32 %v2089_v52, %v2047_v15  ;;  %v2092_v59 = vmul.f32 %v2089_v52, %v2048_v17  ;;  %v2093_v23 = vmul.f32 %v2089_v52, %v2049_v18 }
 0x222   :  { %v2094_v30 = vmul.f32 %v2089_v52, %v2050_v21  ;;  %v2095_v63 = vmul.f32 %v2089_v52, %v2051_v62  ;;  %v2096_v40 = vmul.f32 %v2089_v52, %v2052_v22  ;;  %v2097_v0 = vmul.f32 %v2089_v52, %v2053_v44 }
 0x223   :  { %v2098_v3 = vmul.f32 %v2089_v52, %v2054_v8  ;;  %v2103_v29 = vmul.f32 %v3141_v51, %v2090_v53  ;;  %v2104_v56 = vmul.f32 %v3141_v51, %v2091_v34  ;;  %v2105_v6 = vmul.f32 %v3141_v51, %v2092_v59 }
 0x224   :  { %v2106_v54 = vmul.f32 %v3141_v51, %v2093_v23  ;;  %v2107_v7 = vmul.f32 %v3141_v51, %v2094_v30  ;;  %v2108_v26 = vmul.f32 %v3141_v51, %v2095_v63  ;;  %v2109_v9 = vmul.f32 %v3141_v51, %v2096_v40 }
 0x225   :  { %v2110_v25 = vmul.f32 %v3141_v51, %v2097_v0  ;;  %v2111_v49 = vmul.f32 %v3141_v51, %v2098_v3  ;;  %v2116_v10 = vadd.f32 %v3142_v37, %v2103_v29  ;;  %v2117_v12 = vadd.f32 %v3142_v37, %v2104_v56 }
 0x226   :  { %v2118_v13 = vadd.f32 %v3142_v37, %v2105_v6  ;;  %v2119_v14 = vadd.f32 %v3142_v37, %v2106_v54  ;;  %v2120_v15 = vadd.f32 %v3142_v37, %v2107_v7  ;;  %v2121_v17 = vadd.f32 %v3142_v37, %v2108_v26 }
 0x227   :  { %v2122_v18 = vadd.f32 %v3142_v37, %v2109_v9  ;;  %v2123_v21 = vadd.f32 %v3142_v37, %v2110_v25  ;;  %v2124_v62 = vadd.f32 %v3142_v37, %v2111_v49  ;;  %v2125_v22 = vmax.f32 %v2116_v10, 0.0 }
 0x228   :  { %v2126_v44 = vmax.f32 %v2117_v12, 0.0  ;;  %v2127_v8 = vmax.f32 %v2118_v13, 0.0  ;;  %v2128_v27 = vmax.f32 %v2119_v14, 0.0  ;;  %v2129_v28 = vmax.f32 %v2120_v15, 0.0 }
 0x229   :  { %v2130_v61 = vmax.f32 %v2121_v17, 0.0  ;;  %v2131_v31 = vmax.f32 %v2122_v18, 0.0  ;;  %v2132_v32 = vmax.f32 %v2123_v21, 0.0  ;;  %v2133_v5 = vmax.f32 %v2124_v62, 0.0 }
 0x22a   :  { %v3119_v33 = vpack.c.bf16 %v2126_v44, %v2125_v22  ;;  %v3124_v35 = vpack.c.bf16 %v2128_v27, %v2127_v8 }
 0x22b   :  { %v3129_v57 = vpack.c.bf16 %v2130_v61, %v2129_v28  ;;  %v3134_v55 = vpack.c.bf16 %v2132_v32, %v2131_v31  ;;  %v2142_v58 = vpack.c.bf16 %v2133_v5, %v2133_v5 }
 0x22c   :  { %3120 = vst [vmem:[%s4107_s5] sm:$0xff] %v3119_v33  }
 0x22d   :  { %3136 = vst [vmem:[%s4107_s5 + $0x8] sm:$0xff] %v3124_v35  }
 0x22e   :  { %3137 = vst [vmem:[%s4107_s5 + $0x10] sm:$0xff] %v3129_v57  }
 0x22f   :  { %3138 = vst [vmem:[%s4107_s5 + $0x18] sm:$0xff] %v3134_v55  }
 0x230   :  { %2151 = vst [vmem:[%s4107_s5 + $0x20] sm:$0xf] %v2142_v58 }

// kernel: a2c_value_forward.6
= control target key start
LH: loop header
LB: loop body
LE: loop exit
PB: predicated region body
PF: predicated region fallthrough
CT: control target
= control target key end

     0   :  { %s2471_s1 = inlined_call_operand.vmem [shape: bf16[2048,128], index: 1, kind: input, shape index: {}]   ;;  %s2472_s2 = inlined_call_operand.vmem [shape: f32[1,128], index: 2, kind: input, shape index: {}]   ;;  %s2473_s0 = inlined_call_operand.vmem [shape: bf16[8,2048], index: 0, kind: input, shape index: {}]   ;;  %s2474_s3 = inlined_call_operand.vmem [shape: f32[1,128], index: 3, kind: input, shape index: {}]   ;;  %s2475_s4 = inlined_call_operand.vmem [shape: f32[1,128], index: 4, kind: input, shape index: {}]   ;;  %s2476_s5 = inlined_call_operand.vmem [shape: bf16[8,128], index: 5, kind: output, shape index: {}]  }
   0x1   :  { %v1891_v0 = vld [vmem:[%s2471_s1 + $0x38] sm:$0xff]  ;;  %v1890_v4 = vld [vmem:[%s2471_s1 + $0x30] sm:$0xff]  ;;  %v1889_v8 = vld [vmem:[%s2471_s1 + $0x28] sm:$0xff] }
   0x2   :  { %v1899_v1 = vld [vmem:[%s2471_s1 + $0x78] sm:$0xff]  ;;  %1112 = vmatpush.bf16.msra.mxu0 %v1891_v0  ;;  %v1898_v5 = vld [vmem:[%s2471_s1 + $0x70] sm:$0xff]  ;;  %v1897_v9 = vld [vmem:[%s2471_s1 + $0x68] sm:$0xff] }
   0x3   :  { %v1907_v2 = vld [vmem:[%s2471_s1 + $0xb8] sm:$0xff]  ;;  %1125 = vmatpush.bf16.msra.mxu1 %v1899_v1  ;;  %v1906_v6 = vld [vmem:[%s2471_s1 + $0xb0] sm:$0xff]  ;;  %v1905_v10 = vld [vmem:[%s2471_s1 + $0xa8] sm:$0xff] }
   0x4   :  { %v1915_v3 = vld [vmem:[%s2471_s1 + $0xf8] sm:$0xff]  ;;  %1138 = vmatpush.bf16.msra.mxu2 %v1907_v2  ;;  %v1914_v7 = vld [vmem:[%s2471_s1 + $0xf0] sm:$0xff]  ;;  %v1913_v11 = vld [vmem:[%s2471_s1 + $0xe8] sm:$0xff] }
   0x5   :  { %1151 = vmatpush.bf16.msra.mxu3 %v1915_v3  ;;  %v1888_v12 = vld [vmem:[%s2471_s1 + $0x20] sm:$0xff]  ;;  %v1887_v16 = vld [vmem:[%s2471_s1 + $0x18] sm:$0xff]  ;;  %v1886_v20 = vld [vmem:[%s2471_s1 + $0x10] sm:$0xff] }
   0x6   :  { %1113 = vmatpush.bf16.msra.mxu0 %v1890_v4  ;;  %v1896_v13 = vld [vmem:[%s2471_s1 + $0x60] sm:$0xff]  ;;  %v1895_v17 = vld [vmem:[%s2471_s1 + $0x58] sm:$0xff]  ;;  %v1894_v21 = vld [vmem:[%s2471_s1 + $0x50] sm:$0xff] }
   0x7   :  { %1126 = vmatpush.bf16.msra.mxu1 %v1898_v5  ;;  %v1904_v14 = vld [vmem:[%s2471_s1 + $0xa0] sm:$0xff]  ;;  %v1903_v18 = vld [vmem:[%s2471_s1 + $0x98] sm:$0xff]  ;;  %v1902_v22 = vld [vmem:[%s2471_s1 + $0x90] sm:$0xff] }
   0x8   :  { %1139 = vmatpush.bf16.msra.mxu2 %v1906_v6  ;;  %v1912_v15 = vld [vmem:[%s2471_s1 + $0xe0] sm:$0xff]  ;;  %v1911_v19 = vld [vmem:[%s2471_s1 + $0xd8] sm:$0xff]  ;;  %v1910_v23 = vld [vmem:[%s2471_s1 + $0xd0] sm:$0xff] }
   0x9   :  { %1152 = vmatpush.bf16.msra.mxu3 %v1914_v7  ;;  %v1885_v24 = vld [vmem:[%s2471_s1 + $0x8] sm:$0xff]  ;;  %v20_v29 = vld [vmem:[%s2473_s0] sm:$0xff]  ;;  %v1923_v38 = vld [vmem:[%s2471_s1 + $0x138] sm:$0xff] }
   0xa   :  { %1114 = vmatpush.bf16.msra.mxu0 %v1889_v8  ;;  %v1893_v25 = vld [vmem:[%s2471_s1 + $0x48] sm:$0xff]  ;;  %v1884_v30 = vld [vmem:[%s2471_s1] sm:$0xff]  ;;  %v296_v33 = vunpack.c.l.b16 %v20_v29  ;;  %v297_v37 = vunpack.c.h.b16 %v20_v29  ;;  %v1931_v39 = vld [vmem:[%s2471_s1 + $0x178] sm:$0xff] }
   0xb   :  { %1127 = vmatpush.bf16.msra.mxu1 %v1897_v9  ;;  %v1901_v26 = vld [vmem:[%s2471_s1 + $0x88] sm:$0xff]  ;;  %v1892_v31 = vld [vmem:[%s2471_s1 + $0x40] sm:$0xff]  ;;  %v1939_v40 = vld [vmem:[%s2471_s1 + $0x1b8] sm:$0xff] }
   0xc   :  { %1140 = vmatpush.bf16.msra.mxu2 %v1905_v10  ;;  %v1909_v27 = vld [vmem:[%s2471_s1 + $0xc8] sm:$0xff]  ;;  %v1900_v34 = vld [vmem:[%s2471_s1 + $0x80] sm:$0xff]  ;;  %v1947_v41 = vld [vmem:[%s2471_s1 + $0x1f8] sm:$0xff]  ;;  %v312_v43 = vpack.c.b16 %v296_v33, %v296_v33  ;;  %v313_v45 = vpack.c.b16 %v297_v37, %v297_v37 }
   0xd   :  { %1153 = vmatpush.bf16.msra.mxu3 %v1913_v11  ;;  %v21_v28 = vld [vmem:[%s2473_s0 + $0x8] sm:$0xff]  ;;  %v1908_v35 = vld [vmem:[%s2471_s1 + $0xc0] sm:$0xff]  ;;  %v1922_v46 = vld [vmem:[%s2471_s1 + $0x130] sm:$0xff] }
   0xe   :  { %1115 = vmatpush.bf16.msra.mxu0 %v1888_v12  ;;  %v298_v32 = vunpack.c.l.b16 %v21_v28  ;;  %v299_v36 = vunpack.c.h.b16 %v21_v28  ;;  %v1930_v47 = vld [vmem:[%s2471_s1 + $0x170] sm:$0xff]  ;;  %v1921_v50 = vld [vmem:[%s2471_s1 + $0x128] sm:$0xff]  ;;  %v1920_v54 = vld [vmem:[%s2471_s1 + $0x120] sm:$0xff] }
   0xf   :  { %1128 = vmatpush.bf16.msra.mxu1 %v1896_v13  ;;  %v1938_v48 = vld [vmem:[%s2471_s1 + $0x1b0] sm:$0xff]  ;;  %v1929_v51 = vld [vmem:[%s2471_s1 + $0x168] sm:$0xff]  ;;  %v1928_v55 = vld [vmem:[%s2471_s1 + $0x160] sm:$0xff] }
  0x10   :  { %1141 = vmatpush.bf16.msra.mxu2 %v1904_v14  ;;  %v314_v42 = vpack.c.b16 %v298_v32, %v298_v32  ;;  %v315_v44 = vpack.c.b16 %v299_v36, %v299_v36  ;;  %v1946_v49 = vld [vmem:[%s2471_s1 + $0x1f0] sm:$0xff]  ;;  %v1937_v52 = vld [vmem:[%s2471_s1 + $0x1a8] sm:$0xff]  ;;  %v1936_v56 = vld [vmem:[%s2471_s1 + $0x1a0] sm:$0xff] }
  0x11   :  { %1154 = vmatpush.bf16.msra.mxu3 %v1912_v15  ;;  %v1945_v53 = vld [vmem:[%s2471_s1 + $0x1e8] sm:$0xff]  ;;  %v1944_v57 = vld [vmem:[%s2471_s1 + $0x1e0] sm:$0xff]  ;;  %v1919_v58 = vld [vmem:[%s2471_s1 + $0x118] sm:$0xff] }
  0x12   :  { %1116 = vmatpush.bf16.msra.mxu0 %v1887_v16  ;;  %v1927_v59 = vld [vmem:[%s2471_s1 + $0x158] sm:$0xff]  ;;  %v1918_v62 = vld [vmem:[%s2471_s1 + $0x110] sm:$0xff]  ;;  %v1917_v2 = vld [vmem:[%s2471_s1 + $0x108] sm:$0xff] }
  0x13   :  { %1129 = vmatpush.bf16.msra.mxu1 %v1895_v17  ;;  %v1935_v60 = vld [vmem:[%s2471_s1 + $0x198] sm:$0xff]  ;;  %v1926_v63 = vld [vmem:[%s2471_s1 + $0x150] sm:$0xff]  ;;  %v1925_v3 = vld [vmem:[%s2471_s1 + $0x148] sm:$0xff] }
  0x14   :  { %1142 = vmatpush.bf16.msra.mxu2 %v1903_v18  ;;  %v1943_v61 = vld [vmem:[%s2471_s1 + $0x1d8] sm:$0xff]  ;;  %v1934_v0 = vld [vmem:[%s2471_s1 + $0x190] sm:$0xff]  ;;  %v1933_v4 = vld [vmem:[%s2471_s1 + $0x188] sm:$0xff] }
  0x15   :  { %1155 = vmatpush.bf16.msra.mxu3 %v1911_v19  ;;  %v1942_v1 = vld [vmem:[%s2471_s1 + $0x1d0] sm:$0xff]  ;;  %v1941_v5 = vld [vmem:[%s2471_s1 + $0x1c8] sm:$0xff]  ;;  %v23_v6 = vld [vmem:[%s2473_s0 + $0x18] sm:$0xff] }
  0x16   :  { %1117 = vmatpush.bf16.msra.mxu0 %v1886_v20  ;;  %v22_v7 = vld [vmem:[%s2473_s0 + $0x10] sm:$0xff]  ;;  %v1916_v8 = vld [vmem:[%s2471_s1 + $0x100] sm:$0xff]  ;;  %v302_v10 = vunpack.c.l.b16 %v23_v6  ;;  %v303_v14 = vunpack.c.h.b16 %v23_v6  ;;  %v1955_v16 = vld [vmem:[%s2471_s1 + $0x238] sm:$0xff] }
  0x17   :  { %1130 = vmatpush.bf16.msra.mxu1 %v1894_v21  ;;  %v1924_v9 = vld [vmem:[%s2471_s1 + $0x140] sm:$0xff]  ;;  %v300_v11 = vunpack.c.l.b16 %v22_v7  ;;  %v301_v15 = vunpack.c.h.b16 %v22_v7  ;;  %v1963_v17 = vld [vmem:[%s2471_s1 + $0x278] sm:$0xff]  ;;  %v1953_v28 = vld [vmem:[%s2471_s1 + $0x228] sm:$0xff] }
  0x18   :  { %1143 = vmatpush.bf16.msra.mxu2 %v1902_v22  ;;  %v1932_v12 = vld [vmem:[%s2471_s1 + $0x180] sm:$0xff]  ;;  %v1971_v18 = vld [vmem:[%s2471_s1 + $0x2b8] sm:$0xff]  ;;  %v318_v20 = vpack.c.b16 %v302_v10, %v302_v10  ;;  %v319_v22 = vpack.c.b16 %v303_v14, %v303_v14  ;;  %v1961_v29 = vld [vmem:[%s2471_s1 + $0x268] sm:$0xff] }
  0x19   :  { %1156 = vmatpush.bf16.msra.mxu3 %v1910_v23  ;;  %v1940_v13 = vld [vmem:[%s2471_s1 + $0x1c0] sm:$0xff]  ;;  %v1979_v19 = vld [vmem:[%s2471_s1 + $0x2f8] sm:$0xff]  ;;  %v316_v21 = vpack.c.b16 %v300_v11, %v300_v11  ;;  %v317_v23 = vpack.c.b16 %v301_v15, %v301_v15  ;;  %v1985_v6 = vld [vmem:[%s2471_s1 + $0x328] sm:$0xff] }
  0x1a   :  { %1118 = vmatpush.bf16.msra.mxu0 %v1885_v24  ;;  %v1954_v24 = vld [vmem:[%s2471_s1 + $0x230] sm:$0xff]  ;;  %v1952_v32 = vld [vmem:[%s2471_s1 + $0x220] sm:$0xff]  ;;  %v1951_v36 = vld [vmem:[%s2471_s1 + $0x218] sm:$0xff] }
  0x1b   :  { %1131 = vmatpush.bf16.msra.mxu1 %v1893_v25  ;;  %v1962_v25 = vld [vmem:[%s2471_s1 + $0x270] sm:$0xff]  ;;  %v1960_v33 = vld [vmem:[%s2471_s1 + $0x260] sm:$0xff]  ;;  %v1959_v37 = vld [vmem:[%s2471_s1 + $0x258] sm:$0xff] }
  0x1c   :  { %1144 = vmatpush.bf16.msra.mxu2 %v1901_v26  ;;  %v1970_v26 = vld [vmem:[%s2471_s1 + $0x2b0] sm:$0xff]  ;;  %v1993_v7 = vld [vmem:[%s2471_s1 + $0x368] sm:$0xff]  ;;  %v1984_v10 = vld [vmem:[%s2471_s1 + $0x320] sm:$0xff] }
  0x1d   :  { %1157 = vmatpush.bf16.msra.mxu3 %v1909_v27  ;;  %v1978_v27 = vld [vmem:[%s2471_s1 + $0x2f0] sm:$0xff]  ;;  %v1992_v11 = vld [vmem:[%s2471_s1 + $0x360] sm:$0xff]  ;;  %v1983_v14 = vld [vmem:[%s2471_s1 + $0x318] sm:$0xff] }
  0x1e   :  { %1119 = vmatpush.bf16.msra.mxu0 %v1884_v30  ;;  %v1969_v30 = vld [vmem:[%s2471_s1 + $0x2a8] sm:$0xff]  ;;  %v1991_v15 = vld [vmem:[%s2471_s1 + $0x358] sm:$0xff] }
  0x1f   :  { %1132 = vmatpush.bf16.msra.mxu1 %v1892_v31  ;;  %v1977_v31 = vld [vmem:[%s2471_s1 + $0x2e8] sm:$0xff] }
  0x20   :  { %1145 = vmatpush.bf16.msra.mxu2 %v1900_v34  ;;  %v1968_v34 = vld [vmem:[%s2471_s1 + $0x2a0] sm:$0xff] }
  0x21   :  { %1158 = vmatpush.bf16.msra.mxu3 %v1908_v35  ;;  %1120 = vmatmul.bf16.vlgmr.msra.gmra.mxu0 %v312_v43  ;;  %v1976_v35 = vld [vmem:[%s2471_s1 + $0x2e0] sm:$0xff]  ;;  %v1974_v43 = vld [vmem:[%s2471_s1 + $0x2d0] sm:$0xff] }
  0x22   :  { %1164 = vmatpush.bf16.msrb.mxu0 %v1923_v38  ;;  %1133 = vmatmul.bf16.vlgmr.msra.gmra.mxu1 %v313_v45  ;;  %v1967_v38 = vld [vmem:[%s2471_s1 + $0x298] sm:$0xff]  ;;  %v1957_v45 = vld [vmem:[%s2471_s1 + $0x248] sm:$0xff] }
  0x23   :  { %1177 = vmatpush.bf16.msrb.mxu1 %v1931_v39  ;;  %1146 = vmatmul.bf16.vlgmr.msra.gmra.mxu2 %v314_v42  ;;  %v1975_v39 = vld [vmem:[%s2471_s1 + $0x2d8] sm:$0xff]  ;;  %v1966_v42 = vld [vmem:[%s2471_s1 + $0x290] sm:$0xff] }
  0x24   :  { %1190 = vmatpush.bf16.msrb.mxu2 %v1939_v40  ;;  %1159 = vmatmul.bf16.vlgmr.msra.gmra.mxu3 %v315_v44  ;;  %v1950_v40 = vld [vmem:[%s2471_s1 + $0x210] sm:$0xff]  ;;  %v1949_v44 = vld [vmem:[%s2471_s1 + $0x208] sm:$0xff] }
  0x25   :  { %1203 = vmatpush.bf16.msrb.mxu3 %v1947_v41  ;;  %v1958_v41 = vld [vmem:[%s2471_s1 + $0x250] sm:$0xff] }
  0x26   :  { %1165 = vmatpush.bf16.msrb.mxu0 %v1922_v46  ;;  %v1965_v46 = vld [vmem:[%s2471_s1 + $0x288] sm:$0xff] }
  0x27   :  { %1178 = vmatpush.bf16.msrb.mxu1 %v1930_v47  ;;  %v1973_v47 = vld [vmem:[%s2471_s1 + $0x2c8] sm:$0xff] }
  0x28   :  { %1191 = vmatpush.bf16.msrb.mxu2 %v1938_v48  ;;  %v24_v48 = vld [vmem:[%s2473_s0 + $0x20] sm:$0xff] }
  0x29   :  { %1204 = vmatpush.bf16.msrb.mxu3 %v1946_v49  ;;  %v25_v49 = vld [vmem:[%s2473_s0 + $0x28] sm:$0xff] }
  0x2a   :  { %1166 = vmatpush.bf16.msrb.mxu0 %v1921_v50  ;;  %v1948_v50 = vld [vmem:[%s2471_s1 + $0x200] sm:$0xff] }
  0x2b   :  { %1179 = vmatpush.bf16.msrb.mxu1 %v1929_v51  ;;  %v1956_v51 = vld [vmem:[%s2471_s1 + $0x240] sm:$0xff] }
  0x2c   :  { %1192 = vmatpush.bf16.msrb.mxu2 %v1937_v52  ;;  %v304_v52 = vunpack.c.l.b16 %v24_v48 }
  0x2d   :  { %1205 = vmatpush.bf16.msrb.mxu3 %v1945_v53  ;;  %v306_v53 = vunpack.c.l.b16 %v25_v49 }
  0x2e   :  { %1167 = vmatpush.bf16.msrb.mxu0 %v1920_v54  ;;  %v1964_v54 = vld [vmem:[%s2471_s1 + $0x280] sm:$0xff] }
  0x2f   :  { %1180 = vmatpush.bf16.msrb.mxu1 %v1928_v55  ;;  %v1972_v55 = vld [vmem:[%s2471_s1 + $0x2c0] sm:$0xff] }
  0x30   :  { %1193 = vmatpush.bf16.msrb.mxu2 %v1936_v56  ;;  %v305_v56 = vunpack.c.h.b16 %v24_v48 }
  0x31   :  { %1206 = vmatpush.bf16.msrb.mxu3 %v1944_v57  ;;  %v307_v57 = vunpack.c.h.b16 %v25_v49 }
  0x32   :  { %1168 = vmatpush.bf16.msrb.mxu0 %v1919_v58  ;;  %v1987_v58 = vld [vmem:[%s2471_s1 + $0x338] sm:$0xff] }
  0x33   :  { %1181 = vmatpush.bf16.msrb.mxu1 %v1927_v59  ;;  %v1995_v59 = vld [vmem:[%s2471_s1 + $0x378] sm:$0xff] }
  0x34   :  { %1194 = vmatpush.bf16.msrb.mxu2 %v1935_v60  ;;  %v2003_v60 = vld [vmem:[%s2471_s1 + $0x3b8] sm:$0xff] }
  0x35   :  { %1207 = vmatpush.bf16.msrb.mxu3 %v1943_v61  ;;  %v2011_v61 = vld [vmem:[%s2471_s1 + $0x3f8] sm:$0xff] }
  0x36   :  { %1169 = vmatpush.bf16.msrb.mxu0 %v1918_v62  ;;  %v320_v62 = vpack.c.b16 %v304_v52, %v304_v52 }
  0x37   :  { %1182 = vmatpush.bf16.msrb.mxu1 %v1926_v63  ;;  %v322_v63 = vpack.c.b16 %v306_v53, %v306_v53 }
  0x38   :  { %1195 = vmatpush.bf16.msrb.mxu2 %v1934_v0  ;;  %v321_v0 = vpack.c.b16 %v305_v56, %v305_v56 }
  0x39   :  { %1208 = vmatpush.bf16.msrb.mxu3 %v1942_v1  ;;  %v323_v1 = vpack.c.b16 %v307_v57, %v307_v57 }
  0x3a   :  { %1170 = vmatpush.bf16.msrb.mxu0 %v1917_v2  ;;  %v1986_v2 = vld [vmem:[%s2471_s1 + $0x330] sm:$0xff] }
  0x3b   :  { %1183 = vmatpush.bf16.msrb.mxu1 %v1925_v3  ;;  %v1994_v3 = vld [vmem:[%s2471_s1 + $0x370] sm:$0xff] }
  0x3c   :  { %1196 = vmatpush.bf16.msrb.mxu2 %v1933_v4  ;;  %v2002_v4 = vld [vmem:[%s2471_s1 + $0x3b0] sm:$0xff] }
  0x3d   :  { %1209 = vmatpush.bf16.msrb.mxu3 %v1941_v5  ;;  %v2010_v5 = vld [vmem:[%s2471_s1 + $0x3f0] sm:$0xff] }
  0x3e   :  { %1171 = vmatpush.bf16.msrb.mxu0 %v1916_v8  ;;  %v2001_v8 = vld [vmem:[%s2471_s1 + $0x3a8] sm:$0xff] }
  0x3f   :  { %1184 = vmatpush.bf16.msrb.mxu1 %v1924_v9  ;;  %v2009_v9 = vld [vmem:[%s2471_s1 + $0x3e8] sm:$0xff] }
  0x40   :  { %1197 = vmatpush.bf16.msrb.mxu2 %v1932_v12  ;;  %v2000_v12 = vld [vmem:[%s2471_s1 + $0x3a0] sm:$0xff] }
  0x41   :  { %1210 = vmatpush.bf16.msrb.mxu3 %v1940_v13  ;;  %1172 = vmatmul.bf16.vlgmr.msrb.gmra.mxu0 %v316_v21  ;;  %v2008_v13 = vld [vmem:[%s2471_s1 + $0x3e0] sm:$0xff]  ;;  %v2006_v21 = vld [vmem:[%s2471_s1 + $0x3d0] sm:$0xff] }
  0x42   :  { %1216 = vmatpush.bf16.msra.mxu0 %v1955_v16  ;;  %1185 = vmatmul.bf16.vlgmr.msrb.gmra.mxu1 %v317_v23  ;;  %v1999_v16 = vld [vmem:[%s2471_s1 + $0x398] sm:$0xff]  ;;  %v1989_v23 = vld [vmem:[%s2471_s1 + $0x348] sm:$0xff] }
  0x43   :  { %1229 = vmatpush.bf16.msra.mxu1 %v1963_v17  ;;  %1198 = vmatmul.bf16.vlgmr.msrb.gmra.mxu2 %v318_v20  ;;  %v2007_v17 = vld [vmem:[%s2471_s1 + $0x3d8] sm:$0xff]  ;;  %v1998_v20 = vld [vmem:[%s2471_s1 + $0x390] sm:$0xff] }
  0x44   :  { %1242 = vmatpush.bf16.msra.mxu2 %v1971_v18  ;;  %1211 = vmatmul.bf16.vlgmr.msrb.gmra.mxu3 %v319_v22  ;;  %v1982_v18 = vld [vmem:[%s2471_s1 + $0x310] sm:$0xff]  ;;  %v1981_v22 = vld [vmem:[%s2471_s1 + $0x308] sm:$0xff] }
  0x45   :  { %1255 = vmatpush.bf16.msra.mxu3 %v1979_v19  ;;  %v1990_v19 = vld [vmem:[%s2471_s1 + $0x350] sm:$0xff] }
  0x46   :  { %1217 = vmatpush.bf16.msra.mxu0 %v1954_v24  ;;  %v26_v24 = vld [vmem:[%s2473_s0 + $0x30] sm:$0xff] }
  0x47   :  { %1230 = vmatpush.bf16.msra.mxu1 %v1962_v25  ;;  %v1997_v25 = vld [vmem:[%s2471_s1 + $0x388] sm:$0xff] }
  0x48   :  { %1243 = vmatpush.bf16.msra.mxu2 %v1970_v26  ;;  %v2005_v26 = vld [vmem:[%s2471_s1 + $0x3c8] sm:$0xff] }
  0x49   :  { %1256 = vmatpush.bf16.msra.mxu3 %v1978_v27  ;;  %v27_v27 = vld [vmem:[%s2473_s0 + $0x38] sm:$0xff] }
  0x4a   :  { %1218 = vmatpush.bf16.msra.mxu0 %v1953_v28  ;;  %v308_v28 = vunpack.c.l.b16 %v26_v24 }
  0x4b   :  { %1231 = vmatpush.bf16.msra.mxu1 %v1961_v29  ;;  %v309_v29 = vunpack.c.h.b16 %v26_v24 }
  0x4c   :  { %1244 = vmatpush.bf16.msra.mxu2 %v1969_v30  ;;  %v1980_v30 = vld [vmem:[%s2471_s1 + $0x300] sm:$0xff] }
  0x4d   :  { %1257 = vmatpush.bf16.msra.mxu3 %v1977_v31  ;;  %v1988_v31 = vld [vmem:[%s2471_s1 + $0x340] sm:$0xff] }
  0x4e   :  { %1219 = vmatpush.bf16.msra.mxu0 %v1952_v32  ;;  %v310_v32 = vunpack.c.l.b16 %v27_v27 }
  0x4f   :  { %1232 = vmatpush.bf16.msra.mxu1 %v1960_v33  ;;  %v311_v33 = vunpack.c.h.b16 %v27_v27 }
  0x50   :  { %1245 = vmatpush.bf16.msra.mxu2 %v1968_v34  ;;  %v1996_v34 = vld [vmem:[%s2471_s1 + $0x380] sm:$0xff] }
  0x51   :  { %1258 = vmatpush.bf16.msra.mxu3 %v1976_v35  ;;  %v2004_v35 = vld [vmem:[%s2471_s1 + $0x3c0] sm:$0xff] }
  0x52   :  { %1220 = vmatpush.bf16.msra.mxu0 %v1951_v36  ;;  %v324_v36 = vpack.c.b16 %v308_v28, %v308_v28 }
  0x53   :  { %1233 = vmatpush.bf16.msra.mxu1 %v1959_v37  ;;  %v325_v37 = vpack.c.b16 %v309_v29, %v309_v29 }
  0x54   :  { %1246 = vmatpush.bf16.msra.mxu2 %v1967_v38  ;;  %v326_v38 = vpack.c.b16 %v310_v32, %v310_v32 }
  0x55   :  { %1259 = vmatpush.bf16.msra.mxu3 %v1975_v39  ;;  %v327_v39 = vpack.c.b16 %v311_v33, %v311_v33 }
  0x56   :  { %1221 = vmatpush.bf16.msra.mxu0 %v1950_v40  ;;  %v2013_v40 = vld [vmem:[%s2472_s2] ss:$0 sm:$0xff] }
  0x57   :  { %1234 = vmatpush.bf16.msra.mxu1 %v1958_v41 }
  0x58   :  { %1247 = vmatpush.bf16.msra.mxu2 %v1966_v42 }
  0x59   :  { %1260 = vmatpush.bf16.msra.mxu3 %v1974_v43 }
  0x5a   :  { %1222 = vmatpush.bf16.msra.mxu0 %v1949_v44 }
  0x5b   :  { %1235 = vmatpush.bf16.msra.mxu1 %v1957_v45 }
  0x5c   :  { %1248 = vmatpush.bf16.msra.mxu2 %v1965_v46 }
  0x5d   :  { %1261 = vmatpush.bf16.msra.mxu3 %v1973_v47 }
  0x5e   :  { %1223 = vmatpush.bf16.msra.mxu0 %v1948_v50 }
  0x5f   :  { %1236 = vmatpush.bf16.msra.mxu1 %v1956_v51 }
  0x60   :  { %1249 = vmatpush.bf16.msra.mxu2 %v1964_v54 }
  0x61   :  { %1262 = vmatpush.bf16.msra.mxu3 %v1972_v55  ;;  %1224 = vmatmul.bf16.vlgmr.msra.gmra.mxu0 %v320_v62 }
  0x62   :  { %1268 = vmatpush.bf16.msrb.mxu0 %v1987_v58  ;;  %1237 = vmatmul.bf16.vlgmr.msra.gmra.mxu1 %v321_v0 }
  0x63   :  { %1281 = vmatpush.bf16.msrb.mxu1 %v1995_v59  ;;  %1250 = vmatmul.bf16.vlgmr.msra.gmra.mxu2 %v322_v63 }
  0x64   :  { %1294 = vmatpush.bf16.msrb.mxu2 %v2003_v60  ;;  %1263 = vmatmul.bf16.vlgmr.msra.gmra.mxu3 %v323_v1 }
  0x65   :  { %1307 = vmatpush.bf16.msrb.mxu3 %v2011_v61 }
  0x66   :  { %1269 = vmatpush.bf16.msrb.mxu0 %v1986_v2 }
  0x67   :  { %1282 = vmatpush.bf16.msrb.mxu1 %v1994_v3 }
  0x68   :  { %1295 = vmatpush.bf16.msrb.mxu2 %v2002_v4 }
  0x69   :  { %1308 = vmatpush.bf16.msrb.mxu3 %v2010_v5 }
  0x6a   :  { %1270 = vmatpush.bf16.msrb.mxu0 %v1985_v6 }
  0x6b   :  { %1283 = vmatpush.bf16.msrb.mxu1 %v1993_v7 }
  0x6c   :  { %1296 = vmatpush.bf16.msrb.mxu2 %v2001_v8 }
  0x6d   :  { %1309 = vmatpush.bf16.msrb.mxu3 %v2009_v9 }
  0x6e   :  { %1271 = vmatpush.bf16.msrb.mxu0 %v1984_v10 }
  0x6f   :  { %1284 = vmatpush.bf16.msrb.mxu1 %v1992_v11 }
  0x70   :  { %1297 = vmatpush.bf16.msrb.mxu2 %v2000_v12  ;;  %v2020_v12 = vmov 8.0  }
  0x71   :  { %1310 = vmatpush.bf16.msrb.mxu3 %v2008_v13  ;;  %2016 = vrcp.f32 %v2020_v12 }
  0x72   :  { %1272 = vmatpush.bf16.msrb.mxu0 %v1983_v14 }
  0x73   :  { %1285 = vmatpush.bf16.msrb.mxu1 %v1991_v15 }
  0x74   :  { %1298 = vmatpush.bf16.msrb.mxu2 %v1999_v16 }
  0x75   :  { %1311 = vmatpush.bf16.msrb.mxu3 %v2007_v17 }
  0x76   :  { %1273 = vmatpush.bf16.msrb.mxu0 %v1982_v18 }
  0x77   :  { %1286 = vmatpush.bf16.msrb.mxu1 %v1990_v19  ;;  %v2017_v16 = vpop.eup %2016 }
  0x78   :  { %1299 = vmatpush.bf16.msrb.mxu2 %v1998_v20  ;;  %v1327_v18 = vmul.f32 8.0, %v2017_v16  ;;  %vm1331_vm0 = vweird.f32 %v2017_v16 }
  0x79   :  { %1312 = vmatpush.bf16.msrb.mxu3 %v2006_v21 }
  0x7a   :  { %1274 = vmatpush.bf16.msrb.mxu0 %v1981_v22 }
  0x7b   :  { %1287 = vmatpush.bf16.msrb.mxu1 %v1989_v23 }
  0x7c   :  { %1300 = vmatpush.bf16.msrb.mxu2 %v1997_v25  ;;  %v1328_v25 = vsub.f32 1.0, %v1327_v18 }
  0x7d   :  { %1313 = vmatpush.bf16.msrb.mxu3 %v2005_v26 }
  0x7e   :  { %1275 = vmatpush.bf16.msrb.mxu0 %v1980_v30  ;;  %v1329_v28 = vmul.f32 %v2017_v16, %v1328_v25 }
  0x7f   :  { %1288 = vmatpush.bf16.msrb.mxu1 %v1988_v31 }
  0x80   :  { %1301 = vmatpush.bf16.msrb.mxu2 %v1996_v34  ;;  %v1330_v33 = vadd.f32 %v2017_v16, %v1329_v28 }
  0x81   :  { %1314 = vmatpush.bf16.msrb.mxu3 %v2004_v35  ;;  %1276 = vmatmul.bf16.vlgmr.msrb.gmra.mxu0 %v324_v36 }
  0x82   :  { %1289 = vmatmul.bf16.vlgmr.msrb.gmra.mxu1 %v325_v37  ;;  %v1332_v36 = vsel %vm1331_vm0, %v2017_v16, %v1330_v33 }
  0x83   :  { %1302 = vmatmul.bf16.vlgmr.msrb.gmra.mxu2 %v326_v38 }
  0x84   :  { %1315 = vmatmul.bf16.vlgmr.msrb.gmra.mxu3 %v327_v39 }
  0x9e   :  { %v1121_v41 = vpop.f32.mrf.mxu0 }
  0x9f   :  { %v1122_v42 = vadd.f32 %v2013_v40, %v1121_v41  ;;  %v1134_v43 = vpop.f32.mrf.mxu1 }
  0xa1   :  { %v1135_v44 = vadd.f32 %v1134_v43, %v1122_v42 }
  0xa6   :  { %v1147_v45 = vpop.f32.mrf.mxu2  ;;  %v1123_v48 = vpop.f32.mrf.mxu0 }
  0xa7   :  { %v1148_v46 = vadd.f32 %v1147_v45, %v1135_v44  ;;  %v1160_v47 = vpop.f32.mrf.mxu3  ;;  %v1136_v50 = vpop.f32.mrf.mxu1 }
  0xa9   :  { %v1161_v49 = vadd.f32 %v1160_v47, %v1148_v46 }
  0xae   :  { %v1149_v51 = vpop.f32.mrf.mxu2 }
  0xaf   :  { %v1162_v52 = vpop.f32.mrf.mxu3 }
  0xbe   :  { %v1173_v53 = vpop.f32.mrf.mxu0 }
  0xbf   :  { %v1186_v54 = vpop.f32.mrf.mxu1  ;;  %v1174_v63 = vadd.f32 %v1173_v53, %v1161_v49 }
  0xc1   :  { %v1187_v3 = vadd.f32 %v1186_v54, %v1174_v63 }
  0xc6   :  { %v1199_v55 = vpop.f32.mrf.mxu2  ;;  %v1175_v57 = vpop.f32.mrf.mxu0 }
  0xc7   :  { %v1212_v56 = vpop.f32.mrf.mxu3  ;;  %v1188_v58 = vpop.f32.mrf.mxu1  ;;  %v1200_v5 = vadd.f32 %v1199_v55, %v1187_v3  ;;  %v2014_v55 = vld [vmem:[%s2474_s3] ss:$0 sm:$0xff] }
  0xc8   :  { %v2015_v58 = vld [vmem:[%s2475_s4] ss:$0 sm:$0xff] }
  0xc9   :  { %v1213_v8 = vadd.f32 %v1212_v56, %v1200_v5 }
  0xce   :  { %v1201_v59 = vpop.f32.mrf.mxu2 }
  0xcf   :  { %v1214_v60 = vpop.f32.mrf.mxu3 }
  0xde   :  { %v1225_v61 = vpop.f32.mrf.mxu0 }
  0xdf   :  { %v1238_v62 = vpop.f32.mrf.mxu1  ;;  %v1226_v9 = vadd.f32 %v1225_v61, %v1213_v8 }
  0xe1   :  { %v1239_v10 = vadd.f32 %v1238_v62, %v1226_v9 }
  0xe6   :  { %v1251_v0 = vpop.f32.mrf.mxu2  ;;  %v1227_v2 = vpop.f32.mrf.mxu0 }
  0xe7   :  { %v1264_v1 = vpop.f32.mrf.mxu3  ;;  %v1240_v4 = vpop.f32.mrf.mxu1  ;;  %v1252_v11 = vadd.f32 %v1251_v0, %v1239_v10 }
  0xe9   :  { %v1265_v13 = vadd.f32 %v1264_v1, %v1252_v11 }
  0xee   :  { %v1253_v6 = vpop.f32.mrf.mxu2 }
  0xef   :  { %v1266_v7 = vpop.f32.mrf.mxu3 }
  0xfe   :  { %v1277_v14 = vpop.f32.mrf.mxu0 }
  0xff   :  { %v1290_v15 = vpop.f32.mrf.mxu1  ;;  %v1278_v17 = vadd.f32 %v1277_v14, %v1265_v13 }
 0x101   :  { %v1291_v19 = vadd.f32 %v1290_v15, %v1278_v17 }
 0x106   :  { %v1303_v20 = vpop.f32.mrf.mxu2  ;;  %v1279_v23 = vpop.f32.mrf.mxu0 }
 0x107   :  { %v1316_v21 = vpop.f32.mrf.mxu3  ;;  %v1304_v22 = vadd.f32 %v1303_v20, %v1291_v19  ;;  %v1292_v24 = vpop.f32.mrf.mxu1 }
 0x109   :  { %v1317_v26 = vadd.f32 %v1316_v21, %v1304_v22 }
 0x10b   :  { %v1320_v27 = vrot.slane %v1317_v26, 4 }
 0x10d   :  { %v1321_v29 = vadd.f32 %v1320_v27, %v1317_v26 }
 0x10e   :  { %v1305_v30 = vpop.f32.mrf.mxu2 }
 0x10f   :  { %v1318_v31 = vpop.f32.mrf.mxu3  ;;  %v1322_v32 = vrot.slane %v1321_v29, 2 }
 0x111   :  { %v1323_v34 = vadd.f32 %v1322_v32, %v1321_v29 }
 0x113   :  { %v1324_v35 = vrot.slane %v1323_v34, 1 }
 0x115   :  { %v1325_v37 = vadd.f32 %v1324_v35, %v1323_v34 }
 0x117   :  { %v1333_v38 = vmul.f32 %v1332_v36, %v1325_v37 }
 0x119   :  { %v1334_v39 = vsub.f32 %v1317_v26, %v1333_v38 }
 0x11b   :  { %v1335_v40 = vmul.f32 %v1334_v39, %v1334_v39 }
 0x11d   :  { %v1336_v41 = vrot.slane %v1335_v40, 4 }
 0x11f   :  { %v1337_v42 = vadd.f32 %v1336_v41, %v1335_v40 }
 0x121   :  { %v1338_v43 = vrot.slane %v1337_v42, 2 }
 0x123   :  { %v1339_v44 = vadd.f32 %v1338_v43, %v1337_v42 }
 0x125   :  { %v1340_v45 = vrot.slane %v1339_v44, 1 }
 0x127   :  { %v1341_v46 = vadd.f32 %v1340_v45, %v1339_v44 }
 0x129   :  { %v1342_v47 = vmul.f32 %v1341_v46, %v1332_v36 }
 0x12b   :  { %v1343_v48 = vadd.f32 1e-05, %v1342_v47 }
 0x12d   :  { %2018 = vrsqrt.f32 %v1343_v48  ;;  %vm1350_vm2 = vweird.f32 %v1343_v48 }
 0x133   :  { %v2019_v49 = vpop.eup %2018 }
 0x134   :  { %v1345_v50 = vmul.f32 %v2019_v49, %v1343_v48  ;;  %vm1351_vm1 = vweird.f32 %v2019_v49 }
 0x135   :  { %vm1352_vm3 = vmor %vm1350_vm2, %vm1351_vm1 }
 0x136   :  { %v1346_v51 = vmul.f32 %v2019_v49, %v1345_v50 }
 0x138   :  { %v1347_v52 = vmul.f32 0.5, %v1346_v51 }
 0x13a   :  { %v1348_v53 = vsub.f32 1.5, %v1347_v52 }
 0x13c   :  { %v1349_v54 = vmul.f32 %v2019_v49, %v1348_v53 }
 0x13e   :  { %v1353_v56 = vsel %vm1352_vm3, %v2019_v49, %v1349_v54 }
 0x13f   :  { %v1354_v57 = vmul.f32 %v1353_v56, %v1334_v39 }
 0x141   :  { %v1359_v59 = vmul.f32 %v2014_v55, %v1354_v57 }
 0x143   :  { %v1364_v60 = vadd.f32 %v2015_v58, %v1359_v59 }
 0x145   :  { %v1365_v61 = vmax.f32 %v1364_v60, 0.0 }
 0x147   :  { %v1366_v62 = vpack.c.bf16 %v1365_v61, %v1365_v61 }
 0x149   :  { %1367 = vst [vmem:[%s2476_s5] sm:$0xf] %v1366_v62 }

// kernel: a2c_value_forward.7
= control target key start
LH: loop header
LB: loop body
LE: loop exit
PB: predicated region body
PF: predicated region fallthrough
CT: control target
= control target key end

     0   :  { %vm1033_vm0 = vcmask 1041408   ;;  %vm1035_vm1 = vcmask 1045508   ;;  %vm1037_vm2 = vcmask 1043456   ;;  %s3655_s1 = inlined_call_operand.vmem [shape: bf16[512,512], index: 1, kind: input, shape index: {}]   ;;  %s3656_s2 = inlined_call_operand.vmem [shape: bf16[128,512], index: 2, kind: input, shape index: {}]   ;;  %s3657_s4 = inlined_call_operand.vmem [shape: bf16[128,128], index: 4, kind: input, shape index: {}]   ;;  %s3658_s5 = inlined_call_operand.vmem [shape: f32[1,128], index: 5, kind: input, shape index: {}]   ;;  %s3659_s6 = inlined_call_operand.vmem [shape: bf16[128,128], index: 6, kind: input, shape index: {}]   ;;  %s3660_s7 = inlined_call_operand.vmem [shape: f32[1,128], index: 7, kind: input, shape index: {}]   ;;  %s3661_s8 = inlined_call_operand.vmem [shape: f32[2,128], index: 8, kind: output, shape index: {}]   ;;  %s3662_s0 = inlined_call_operand.vmem [shape: bf16[2,512], index: 0, kind: input, shape index: {}]   ;;  %s3663_s3 = inlined_call_operand.vmem [shape: f32[1,512], index: 3, kind: input, shape index: {}]  }
   0x1   :  { %v1689_v0 = vld [vmem:[%s3655_s1 + $0xe0] sm:$0xf]  ;;  %v2314_v1 = vld [vmem:[%s3655_s1 + $0xec] sm:$0xf0] }
   0x2   :  { %v1817_v2 = vld [vmem:[%s3655_s1 + $0x1e0] sm:$0xf]  ;;  %v1690_v3 = vor.u32 %v2314_v1, %v1689_v0  ;;  %v2346_v4 = vld [vmem:[%s3655_s1 + $0x1ec] sm:$0xf0] }
   0x3   :  { %v1945_v5 = vld [vmem:[%s3655_s1 + $0x2e0] sm:$0xf]  ;;  %v2378_v6 = vld [vmem:[%s3655_s1 + $0x2ec] sm:$0xf0]  ;;  %v1818_v7 = vor.u32 %v2346_v4, %v1817_v2 }
   0x4   :  { %v1946_v8 = vor.u32 %v2378_v6, %v1945_v5  ;;  %v2073_v9 = vld [vmem:[%s3655_s1 + $0x3e0] sm:$0xf]  ;;  %v2410_v10 = vld [vmem:[%s3655_s1 + $0x3ec] sm:$0xf0]  ;;  %818 = vmatpush.bf16.msra.mxu0 %v1690_v3 }
   0x5   :  { %v1673_v11 = vld [vmem:[%s3655_s1 + $0xc0] sm:$0xf]  ;;  %v2074_v12 = vor.u32 %v2410_v10, %v2073_v9  ;;  %v2310_v13 = vld [vmem:[%s3655_s1 + $0xcc] sm:$0xf0]  ;;  %831 = vmatpush.bf16.msra.mxu1 %v1818_v7 }
   0x6   :  { %v1801_v14 = vld [vmem:[%s3655_s1 + $0x1c0] sm:$0xf]  ;;  %v2342_v15 = vld [vmem:[%s3655_s1 + $0x1cc] sm:$0xf0]  ;;  %844 = vmatpush.bf16.msra.mxu2 %v1946_v8  ;;  %v1674_v16 = vor.u32 %v2310_v13, %v1673_v11 }
   0x7   :  { %v1802_v17 = vor.u32 %v2342_v15, %v1801_v14  ;;  %v1929_v18 = vld [vmem:[%s3655_s1 + $0x2c0] sm:$0xf]  ;;  %v2374_v19 = vld [vmem:[%s3655_s1 + $0x2cc] sm:$0xf0]  ;;  %857 = vmatpush.bf16.msra.mxu3 %v2074_v12 }
   0x8   :  { %v2057_v20 = vld [vmem:[%s3655_s1 + $0x3c0] sm:$0xf]  ;;  %v1930_v21 = vor.u32 %v2374_v19, %v1929_v18  ;;  %v2406_v22 = vld [vmem:[%s3655_s1 + $0x3cc] sm:$0xf0]  ;;  %819 = vmatpush.bf16.msra.mxu0 %v1674_v16 }
   0x9   :  { %v1657_v23 = vld [vmem:[%s3655_s1 + $0xa0] sm:$0xf]  ;;  %v2306_v24 = vld [vmem:[%s3655_s1 + $0xac] sm:$0xf0]  ;;  %v2058_v25 = vor.u32 %v2406_v22, %v2057_v20  ;;  %832 = vmatpush.bf16.msra.mxu1 %v1802_v17 }
   0xa   :  { %v1785_v26 = vld [vmem:[%s3655_s1 + $0x1a0] sm:$0xf]  ;;  %v2338_v27 = vld [vmem:[%s3655_s1 + $0x1ac] sm:$0xf0]  ;;  %v1658_v29 = vor.u32 %v2306_v24, %v1657_v23  ;;  %845 = vmatpush.bf16.msra.mxu2 %v1930_v21 }
   0xb   :  { %v1913_v28 = vld [vmem:[%s3655_s1 + $0x2a0] sm:$0xf]  ;;  %v2370_v30 = vld [vmem:[%s3655_s1 + $0x2ac] sm:$0xf0]  ;;  %v1786_v33 = vor.u32 %v2338_v27, %v1785_v26  ;;  %858 = vmatpush.bf16.msra.mxu3 %v2058_v25 }
   0xc   :  { %v2041_v31 = vld [vmem:[%s3655_s1 + $0x3a0] sm:$0xf]  ;;  %v2402_v32 = vld [vmem:[%s3655_s1 + $0x3ac] sm:$0xf0]  ;;  %v1914_v34 = vor.u32 %v2370_v30, %v1913_v28  ;;  %820 = vmatpush.bf16.msra.mxu0 %v1658_v29  ;;  %v2312_v28 = vld [vmem:[%s3655_s1 + $0xe4] sm:$0xf] }
   0xd   :  { %v1641_v35 = vld [vmem:[%s3655_s1 + $0x80] sm:$0xf]  ;;  %v2302_v36 = vld [vmem:[%s3655_s1 + $0x8c] sm:$0xf0]  ;;  %v2042_v38 = vor.u32 %v2402_v32, %v2041_v31  ;;  %833 = vmatpush.bf16.msra.mxu1 %v1786_v33  ;;  %v1691_v29 = vld [vmem:[%s3655_s1 + $0xf0] sm:$0xf0] }
   0xe   :  { %v1769_v37 = vld [vmem:[%s3655_s1 + $0x180] sm:$0xf]  ;;  %v2334_v39 = vld [vmem:[%s3655_s1 + $0x18c] sm:$0xf0]  ;;  %v1642_v44 = vor.u32 %v2302_v36, %v1641_v35  ;;  %846 = vmatpush.bf16.msra.mxu2 %v1914_v34  ;;  %v2344_v30 = vld [vmem:[%s3655_s1 + $0x1e4] sm:$0xf] }
   0xf   :  { %v1897_v40 = vld [vmem:[%s3655_s1 + $0x280] sm:$0xf]  ;;  %v2366_v41 = vld [vmem:[%s3655_s1 + $0x28c] sm:$0xf0]  ;;  %v1770_v45 = vor.u32 %v2334_v39, %v1769_v37  ;;  %859 = vmatpush.bf16.msra.mxu3 %v2042_v38  ;;  %v1819_v32 = vld [vmem:[%s3655_s1 + $0x1f0] sm:$0xf0] }
  0x10   :  { %v2025_v42 = vld [vmem:[%s3655_s1 + $0x380] sm:$0xf]  ;;  %v2398_v43 = vld [vmem:[%s3655_s1 + $0x38c] sm:$0xf0]  ;;  %v1898_v46 = vor.u32 %v2366_v41, %v1897_v40  ;;  %821 = vmatpush.bf16.msra.mxu0 %v1642_v44  ;;  %v2376_v33 = vld [vmem:[%s3655_s1 + $0x2e4] sm:$0xf]  ;;  %v1694_v40 = vor.u32 %v2312_v28, %v1691_v29  ;;  %v1822_v41 = vor.u32 %v2344_v30, %v1819_v32 }
  0x11   :  { %v1625_v47 = vld [vmem:[%s3655_s1 + $0x60] sm:$0xf]  ;;  %v2298_v48 = vld [vmem:[%s3655_s1 + $0x6c] sm:$0xf0]  ;;  %v2026_v50 = vor.u32 %v2398_v43, %v2025_v42  ;;  %834 = vmatpush.bf16.msra.mxu1 %v1770_v45  ;;  %v1947_v34 = vld [vmem:[%s3655_s1 + $0x2f0] sm:$0xf0] }
  0x12   :  { %v1753_v49 = vld [vmem:[%s3655_s1 + $0x160] sm:$0xf]  ;;  %v2330_v51 = vld [vmem:[%s3655_s1 + $0x16c] sm:$0xf0]  ;;  %v1626_v56 = vor.u32 %v2298_v48, %v1625_v47  ;;  %847 = vmatpush.bf16.msra.mxu2 %v1898_v46  ;;  %v2408_v37 = vld [vmem:[%s3655_s1 + $0x3e4] sm:$0xf]  ;;  %v1950_v42 = vor.u32 %v2376_v33, %v1947_v34 }
  0x13   :  { %v1881_v52 = vld [vmem:[%s3655_s1 + $0x260] sm:$0xf]  ;;  %v2362_v53 = vld [vmem:[%s3655_s1 + $0x26c] sm:$0xf0]  ;;  %v1754_v57 = vor.u32 %v2330_v51, %v1753_v49  ;;  %860 = vmatpush.bf16.msra.mxu3 %v2026_v50  ;;  %v2075_v38 = vld [vmem:[%s3655_s1 + $0x3f0] sm:$0xf0] }
  0x14   :  { %v2009_v54 = vld [vmem:[%s3655_s1 + $0x360] sm:$0xf]  ;;  %v2394_v55 = vld [vmem:[%s3655_s1 + $0x36c] sm:$0xf0]  ;;  %v1882_v58 = vor.u32 %v2362_v53, %v1881_v52  ;;  %822 = vmatpush.bf16.msra.mxu0 %v1626_v56  ;;  %v2308_v43 = vld [vmem:[%s3655_s1 + $0xc4] sm:$0xf]  ;;  %v2078_v46 = vor.u32 %v2408_v37, %v2075_v38 }
  0x15   :  { %v1609_v59 = vld [vmem:[%s3655_s1 + $0x40] sm:$0xf]  ;;  %v2294_v60 = vld [vmem:[%s3655_s1 + $0x4c] sm:$0xf0]  ;;  %v2010_v62 = vor.u32 %v2394_v55, %v2009_v54  ;;  %835 = vmatpush.bf16.msra.mxu1 %v1754_v57  ;;  %v1675_v44 = vld [vmem:[%s3655_s1 + $0xd0] sm:$0xf0] }
  0x16   :  { %v1737_v61 = vld [vmem:[%s3655_s1 + $0x140] sm:$0xf]  ;;  %v2326_v63 = vld [vmem:[%s3655_s1 + $0x14c] sm:$0xf0]  ;;  %v1610_v4 = vor.u32 %v2294_v60, %v1609_v59  ;;  %848 = vmatpush.bf16.msra.mxu2 %v1882_v58  ;;  %v2340_v45 = vld [vmem:[%s3655_s1 + $0x1c4] sm:$0xf]  ;;  %v1678_v53 = vor.u32 %v2308_v43, %v1675_v44 }
  0x17   :  { %v1865_v0 = vld [vmem:[%s3655_s1 + $0x240] sm:$0xf]  ;;  %v2358_v1 = vld [vmem:[%s3655_s1 + $0x24c] sm:$0xf0]  ;;  %v1738_v5 = vor.u32 %v2326_v63, %v1737_v61  ;;  %861 = vmatpush.bf16.msra.mxu3 %v2010_v62  ;;  %v1803_v47 = vld [vmem:[%s3655_s1 + $0x1d0] sm:$0xf0] }
  0x18   :  { %v1993_v2 = vld [vmem:[%s3655_s1 + $0x340] sm:$0xf]  ;;  %v2390_v3 = vld [vmem:[%s3655_s1 + $0x34c] sm:$0xf0]  ;;  %v1866_v6 = vor.u32 %v2358_v1, %v1865_v0  ;;  %823 = vmatpush.bf16.msra.mxu0 %v1610_v4  ;;  %v2372_v48 = vld [vmem:[%s3655_s1 + $0x2c4] sm:$0xf]  ;;  %v1806_v54 = vor.u32 %v2340_v45, %v1803_v47 }
  0x19   :  { %v1593_v7 = vld [vmem:[%s3655_s1 + $0x20] sm:$0xf]  ;;  %v2290_v8 = vld [vmem:[%s3655_s1 + $0x2c] sm:$0xf0]  ;;  %v1994_v10 = vor.u32 %v2390_v3, %v1993_v2  ;;  %836 = vmatpush.bf16.msra.mxu1 %v1738_v5  ;;  %v1931_v49 = vld [vmem:[%s3655_s1 + $0x2d0] sm:$0xf0] }
  0x1a   :  { %v1721_v9 = vld [vmem:[%s3655_s1 + $0x120] sm:$0xf]  ;;  %v2322_v11 = vld [vmem:[%s3655_s1 + $0x12c] sm:$0xf0]  ;;  %v1594_v16 = vor.u32 %v2290_v8, %v1593_v7  ;;  %849 = vmatpush.bf16.msra.mxu2 %v1866_v6  ;;  %v2404_v50 = vld [vmem:[%s3655_s1 + $0x3c4] sm:$0xf]  ;;  %v1934_v55 = vor.u32 %v2372_v48, %v1931_v49 }
  0x1b   :  { %v1849_v12 = vld [vmem:[%s3655_s1 + $0x220] sm:$0xf]  ;;  %v2354_v13 = vld [vmem:[%s3655_s1 + $0x22c] sm:$0xf0]  ;;  %v1722_v19 = vor.u32 %v2322_v11, %v1721_v9  ;;  %862 = vmatpush.bf16.msra.mxu3 %v1994_v10  ;;  %v2059_v51 = vld [vmem:[%s3655_s1 + $0x3d0] sm:$0xf0] }
  0x1c   :  { %v1977_v14 = vld [vmem:[%s3655_s1 + $0x320] sm:$0xf]  ;;  %v2386_v15 = vld [vmem:[%s3655_s1 + $0x32c] sm:$0xf0]  ;;  %v1850_v20 = vor.u32 %v2354_v13, %v1849_v12  ;;  %824 = vmatpush.bf16.msra.mxu0 %v1594_v16  ;;  %v2304_v56 = vld [vmem:[%s3655_s1 + $0xa4] sm:$0xf]  ;;  %v2062_v59 = vor.u32 %v2404_v50, %v2059_v51 }
  0x1d   :  { %v1577_v17 = vld [vmem:[%s3655_s1] sm:$0xf]  ;;  %v2286_v18 = vld [vmem:[%s3655_s1 + $0xc] sm:$0xf0]  ;;  %v1978_v24 = vor.u32 %v2386_v15, %v1977_v14  ;;  %837 = vmatpush.bf16.msra.mxu1 %v1722_v19  ;;  %v1659_v57 = vld [vmem:[%s3655_s1 + $0xb0] sm:$0xf0] }
  0x1e   :  { %v1705_v21 = vld [vmem:[%s3655_s1 + $0x100] sm:$0xf]  ;;  %v2318_v22 = vld [vmem:[%s3655_s1 + $0x10c] sm:$0xf0]  ;;  %v1578_v31 = vor.u32 %v2286_v18, %v1577_v17  ;;  %850 = vmatpush.bf16.msra.mxu2 %v1850_v20  ;;  %v2336_v58 = vld [vmem:[%s3655_s1 + $0x1a4] sm:$0xf]  ;;  %v1662_v1 = vor.u32 %v2304_v56, %v1659_v57 }
  0x1f   :  { %v1833_v23 = vld [vmem:[%s3655_s1 + $0x200] sm:$0xf]  ;;  %v2350_v25 = vld [vmem:[%s3655_s1 + $0x20c] sm:$0xf0]  ;;  %v1706_v35 = vor.u32 %v2318_v22, %v1705_v21  ;;  %863 = vmatpush.bf16.msra.mxu3 %v1978_v24  ;;  %v1787_v60 = vld [vmem:[%s3655_s1 + $0x1b0] sm:$0xf0] }
  0x20   :  { %v1961_v26 = vld [vmem:[%s3655_s1 + $0x300] sm:$0xf]  ;;  %v2382_v27 = vld [vmem:[%s3655_s1 + $0x30c] sm:$0xf0]  ;;  %v1834_v36 = vor.u32 %v2350_v25, %v1833_v23  ;;  %825 = vmatpush.bf16.msra.mxu0 %v1578_v31  ;;  %v2368_v61 = vld [vmem:[%s3655_s1 + $0x2a4] sm:$0xf]  ;;  %v1790_v3 = vor.u32 %v2336_v58, %v1787_v60 }
  0x21   :  { %v1962_v39 = vor.u32 %v2382_v27, %v1961_v26  ;;  %838 = vmatpush.bf16.msra.mxu1 %v1706_v35  ;;  %v29_v52 = vld [vmem:[%s3662_s0] sm:$0xf]  ;;  %v1915_v62 = vld [vmem:[%s3655_s1 + $0x2b0] sm:$0xf0]  ;;  %v2400_v63 = vld [vmem:[%s3655_s1 + $0x3a4] sm:$0xf] }
  0x22   :  { %851 = vmatpush.bf16.msra.mxu2 %v1834_v36  ;;  %169 = vst [vmem:[#allocation1] ss:$9 sm:$0xff] %v29_v52  ;;  %v2043_v0 = vld [vmem:[%s3655_s1 + $0x3b0] sm:$0xf0]  ;;  %v2300_v2 = vld [vmem:[%s3655_s1 + $0x84] sm:$0xf]  ;;  %v1918_v4 = vor.u32 %v2368_v61, %v1915_v62 }
  0x23   :  { %864 = vmatpush.bf16.msra.mxu3 %v1962_v39  ;;  %v1643_v5 = vld [vmem:[%s3655_s1 + $0x90] sm:$0xf0]  ;;  %v2332_v6 = vld [vmem:[%s3655_s1 + $0x184] sm:$0xf]  ;;  %v2046_v8 = vor.u32 %v2400_v63, %v2043_v0 }
  0x24   :  { %870 = vmatpush.bf16.msrb.mxu0 %v1694_v40  ;;  %v1771_v7 = vld [vmem:[%s3655_s1 + $0x190] sm:$0xf0]  ;;  %v2364_v9 = vld [vmem:[%s3655_s1 + $0x284] sm:$0xf]  ;;  %v1646_v15 = vor.u32 %v2300_v2, %v1643_v5  ;;  %v2315_v2 = vld [vmem:[%s3655_s1 + $0xf4] sm:$0xf0] }
  0x25   :  { %883 = vmatpush.bf16.msrb.mxu1 %v1822_v41  ;;  %v1899_v10 = vld [vmem:[%s3655_s1 + $0x290] sm:$0xf0]  ;;  %v2396_v11 = vld [vmem:[%s3655_s1 + $0x384] sm:$0xf]  ;;  %v1774_v18 = vor.u32 %v2332_v6, %v1771_v7  ;;  %v2347_v5 = vld [vmem:[%s3655_s1 + $0x1f4] sm:$0xf0] }
  0x26   :  { %896 = vmatpush.bf16.msrb.mxu2 %v1950_v42  ;;  %v2027_v12 = vld [vmem:[%s3655_s1 + $0x390] sm:$0xf0]  ;;  %v1902_v19 = vor.u32 %v2364_v9, %v1899_v10  ;;  %v2296_v20 = vld [vmem:[%s3655_s1 + $0x64] sm:$0xf]  ;;  %v1953_v6 = vld [vmem:[%s3655_s1 + $0x2e8] sm:$0xf] }
  0x27   :  { %909 = vmatpush.bf16.msrb.mxu3 %v2078_v46  ;;  %v1627_v21 = vld [vmem:[%s3655_s1 + $0x70] sm:$0xf0]  ;;  %v2328_v22 = vld [vmem:[%s3655_s1 + $0x164] sm:$0xf]  ;;  %v2030_v23 = vor.u32 %v2396_v11, %v2027_v12  ;;  %v2379_v7 = vld [vmem:[%s3655_s1 + $0x2f4] sm:$0xf0] }
  0x28   :  { %871 = vmatpush.bf16.msrb.mxu0 %v1678_v53  ;;  %v1755_v24 = vld [vmem:[%s3655_s1 + $0x170] sm:$0xf0]  ;;  %v2360_v25 = vld [vmem:[%s3655_s1 + $0x264] sm:$0xf]  ;;  %v1630_v29 = vor.u32 %v2296_v20, %v1627_v21  ;;  %v2081_v10 = vld [vmem:[%s3655_s1 + $0x3e8] sm:$0xf] }
  0x29   :  { %884 = vmatpush.bf16.msrb.mxu1 %v1806_v54  ;;  %v2863_v13 = vld [vmem:[#allocation1 + $0x12] sm:$0xff]  ;;  %v2865_v14 = vld [vmem:[#allocation1] sm:$0xff]  ;;  %v2870_v17 = vld [vmem:[#allocation1 + $0x9] sm:$0xff]  ;;  %v1758_v30 = vor.u32 %v2328_v22, %v1755_v24 }
  0x2a   :  { %897 = vmatpush.bf16.msrb.mxu2 %v1934_v55  ;;  %v2868_v16 = vld [vmem:[#allocation1 + $0x1b] sm:$0xff]  ;;  %v1883_v26 = vld [vmem:[%s3655_s1 + $0x270] sm:$0xf0]  ;;  %826 = vmatmul.bf16.vlgmr.msra.gmra.mxu0 %v2865_v14  ;;  %v2392_v27 = vld [vmem:[%s3655_s1 + $0x364] sm:$0xf] }
  0x2b   :  { %910 = vmatpush.bf16.msrb.mxu3 %v2062_v59  ;;  %852 = vmatmul.bf16.vlgmr.msra.gmra.mxu2 %v2863_v13  ;;  %v2011_v28 = vld [vmem:[%s3655_s1 + $0x370] sm:$0xf0]  ;;  %v1886_v31 = vor.u32 %v2360_v25, %v1883_v26  ;;  %v2292_v32 = vld [vmem:[%s3655_s1 + $0x44] sm:$0xf]  ;;  %v2411_v11 = vld [vmem:[%s3655_s1 + $0x3f4] sm:$0xf0] }
  0x2c   :  { %872 = vmatpush.bf16.msrb.mxu0 %v1662_v1  ;;  %865 = vmatmul.bf16.vlgmr.msra.gmra.mxu3 %v2868_v16  ;;  %v1611_v33 = vld [vmem:[%s3655_s1 + $0x50] sm:$0xf0]  ;;  %v2324_v34 = vld [vmem:[%s3655_s1 + $0x144] sm:$0xf]  ;;  %v2014_v35 = vor.u32 %v2392_v27, %v2011_v28  ;;  %v1697_v1 = vld [vmem:[%s3655_s1 + $0xe8] sm:$0xf] }
  0x2d   :  { %885 = vmatpush.bf16.msrb.mxu1 %v1790_v3  ;;  %v1739_v36 = vld [vmem:[%s3655_s1 + $0x150] sm:$0xf0]  ;;  %v2356_v37 = vld [vmem:[%s3655_s1 + $0x244] sm:$0xf]  ;;  %v1614_v41 = vor.u32 %v2292_v32, %v1611_v33  ;;  %v1825_v3 = vld [vmem:[%s3655_s1 + $0x1e8] sm:$0xf] }
  0x2e   :  { %898 = vmatpush.bf16.msrb.mxu2 %v1918_v4  ;;  %839 = vmatmul.bf16.vlgmr.msra.gmra.mxu1 %v2870_v17  ;;  %v1867_v38 = vld [vmem:[%s3655_s1 + $0x250] sm:$0xf0]  ;;  %v2388_v39 = vld [vmem:[%s3655_s1 + $0x344] sm:$0xf]  ;;  %v1742_v42 = vor.u32 %v2324_v34, %v1739_v36  ;;  %v1681_v20 = vld [vmem:[%s3655_s1 + $0xc8] sm:$0xf] }
  0x2f   :  { %911 = vmatpush.bf16.msrb.mxu3 %v2046_v8  ;;  %v1995_v40 = vld [vmem:[%s3655_s1 + $0x350] sm:$0xf0]  ;;  %v1870_v43 = vor.u32 %v2356_v37, %v1867_v38  ;;  %v2288_v44 = vld [vmem:[%s3655_s1 + $0x24] sm:$0xf]  ;;  %v2311_v21 = vld [vmem:[%s3655_s1 + $0xd4] sm:$0xf0] }
  0x30   :  { %873 = vmatpush.bf16.msrb.mxu0 %v1646_v15  ;;  %v1595_v45 = vld [vmem:[%s3655_s1 + $0x30] sm:$0xf0]  ;;  %v2320_v46 = vld [vmem:[%s3655_s1 + $0x124] sm:$0xf]  ;;  %v1998_v47 = vor.u32 %v2388_v39, %v1995_v40  ;;  %v1698_v15 = vor.u32 %v2315_v2, %v1697_v1  ;;  %v1809_v22 = vld [vmem:[%s3655_s1 + $0x1c8] sm:$0xf] }
  0x31   :  { %886 = vmatpush.bf16.msrb.mxu1 %v1774_v18  ;;  %v1723_v48 = vld [vmem:[%s3655_s1 + $0x130] sm:$0xf0]  ;;  %v2352_v49 = vld [vmem:[%s3655_s1 + $0x224] sm:$0xf]  ;;  %v1598_v53 = vor.u32 %v2288_v44, %v1595_v45  ;;  %v1826_v18 = vor.u32 %v2347_v5, %v1825_v3  ;;  %v2343_v24 = vld [vmem:[%s3655_s1 + $0x1d4] sm:$0xf0] }
  0x32   :  { %899 = vmatpush.bf16.msrb.mxu2 %v1902_v19  ;;  %v1851_v50 = vld [vmem:[%s3655_s1 + $0x230] sm:$0xf0]  ;;  %v2384_v51 = vld [vmem:[%s3655_s1 + $0x324] sm:$0xf]  ;;  %v1726_v56 = vor.u32 %v2320_v46, %v1723_v48  ;;  %v1954_v19 = vor.u32 %v2379_v7, %v1953_v6  ;;  %v1937_v25 = vld [vmem:[%s3655_s1 + $0x2c8] sm:$0xf] }
  0x33   :  { %912 = vmatpush.bf16.msrb.mxu3 %v2030_v23  ;;  %v1979_v52 = vld [vmem:[%s3655_s1 + $0x330] sm:$0xf0]  ;;  %v2284_v54 = vld [vmem:[%s3655_s1 + $0x4] sm:$0xf]  ;;  %v1854_v57 = vor.u32 %v2352_v49, %v1851_v50  ;;  %v2082_v23 = vor.u32 %v2411_v11, %v2081_v10  ;;  %v2375_v26 = vld [vmem:[%s3655_s1 + $0x2d4] sm:$0xf0] }
  0x34   :  { %874 = vmatpush.bf16.msrb.mxu0 %v1630_v29  ;;  %v1579_v55 = vld [vmem:[%s3655_s1 + $0x10] sm:$0xf0]  ;;  %v2316_v58 = vld [vmem:[%s3655_s1 + $0x104] sm:$0xf]  ;;  %v1982_v61 = vor.u32 %v2384_v51, %v1979_v52  ;;  %v2065_v27 = vld [vmem:[%s3655_s1 + $0x3c8] sm:$0xf]  ;;  %v1682_v29 = vor.u32 %v2311_v21, %v1681_v20 }
  0x35   :  { %887 = vmatpush.bf16.msrb.mxu1 %v1758_v30  ;;  %v1707_v59 = vld [vmem:[%s3655_s1 + $0x110] sm:$0xf0]  ;;  %v2348_v60 = vld [vmem:[%s3655_s1 + $0x204] sm:$0xf]  ;;  %v1582_v4 = vor.u32 %v2284_v54, %v1579_v55  ;;  %v2407_v28 = vld [vmem:[%s3655_s1 + $0x3d4] sm:$0xf0]  ;;  %v1810_v30 = vor.u32 %v2343_v24, %v1809_v22 }
  0x36   :  { %900 = vmatpush.bf16.msrb.mxu2 %v1886_v31  ;;  %v1835_v62 = vld [vmem:[%s3655_s1 + $0x210] sm:$0xf0]  ;;  %v2380_v63 = vld [vmem:[%s3655_s1 + $0x304] sm:$0xf]  ;;  %v1710_v8 = vor.u32 %v2316_v58, %v1707_v59  ;;  %v1938_v31 = vor.u32 %v2375_v26, %v1937_v25  ;;  %v1665_v32 = vld [vmem:[%s3655_s1 + $0xa8] sm:$0xf] }
  0x37   :  { %913 = vmatpush.bf16.msrb.mxu3 %v2014_v35  ;;  %v1963_v0 = vld [vmem:[%s3655_s1 + $0x310] sm:$0xf0]  ;;  %v1838_v9 = vor.u32 %v2348_v60, %v1835_v62  ;;  %v2307_v33 = vld [vmem:[%s3655_s1 + $0xb4] sm:$0xf0]  ;;  %v1793_v34 = vld [vmem:[%s3655_s1 + $0x1a8] sm:$0xf]  ;;  %v2066_v35 = vor.u32 %v2407_v28, %v2065_v27 }
  0x38   :  { %875 = vmatpush.bf16.msrb.mxu0 %v1614_v41  ;;  %v1966_v12 = vor.u32 %v2380_v63, %v1963_v0  ;;  %v2339_v36 = vld [vmem:[%s3655_s1 + $0x1b4] sm:$0xf0]  ;;  %v1921_v37 = vld [vmem:[%s3655_s1 + $0x2a8] sm:$0xf]  ;;  %v1666_v41 = vor.u32 %v2307_v33, %v1665_v32 }
  0x39   :  { %888 = vmatpush.bf16.msrb.mxu1 %v1742_v42  ;;  %v2371_v38 = vld [vmem:[%s3655_s1 + $0x2b4] sm:$0xf0]  ;;  %v2049_v39 = vld [vmem:[%s3655_s1 + $0x3a8] sm:$0xf]  ;;  %v1794_v42 = vor.u32 %v2339_v36, %v1793_v34 }
  0x3a   :  { %901 = vmatpush.bf16.msrb.mxu2 %v1870_v43  ;;  %v2403_v40 = vld [vmem:[%s3655_s1 + $0x3b4] sm:$0xf0]  ;;  %v1922_v43 = vor.u32 %v2371_v38, %v1921_v37  ;;  %v1649_v44 = vld [vmem:[%s3655_s1 + $0x88] sm:$0xf] }
  0x3b   :  { %914 = vmatpush.bf16.msrb.mxu3 %v1998_v47  ;;  %v2303_v45 = vld [vmem:[%s3655_s1 + $0x94] sm:$0xf0]  ;;  %v1777_v46 = vld [vmem:[%s3655_s1 + $0x188] sm:$0xf]  ;;  %v2050_v47 = vor.u32 %v2403_v40, %v2049_v39 }
  0x3c   :  { %876 = vmatpush.bf16.msrb.mxu0 %v1598_v53  ;;  %v2335_v48 = vld [vmem:[%s3655_s1 + $0x194] sm:$0xf0]  ;;  %v1905_v49 = vld [vmem:[%s3655_s1 + $0x288] sm:$0xf]  ;;  %v1650_v53 = vor.u32 %v2303_v45, %v1649_v44  ;;  %v1827_v45 = vld [vmem:[%s3655_s1 + $0x1f8] sm:$0xf0] }
  0x3d   :  { %889 = vmatpush.bf16.msrb.mxu1 %v1726_v56  ;;  %v2367_v50 = vld [vmem:[%s3655_s1 + $0x294] sm:$0xf0]  ;;  %v2033_v51 = vld [vmem:[%s3655_s1 + $0x388] sm:$0xf]  ;;  %v1778_v54 = vor.u32 %v2335_v48, %v1777_v46  ;;  %v2377_v46 = vld [vmem:[%s3655_s1 + $0x2ec] sm:$0xf] }
  0x3e   :  { %902 = vmatpush.bf16.msrb.mxu2 %v1854_v57  ;;  %v2399_v52 = vld [vmem:[%s3655_s1 + $0x394] sm:$0xf0]  ;;  %v1906_v55 = vor.u32 %v2367_v50, %v1905_v49  ;;  %v1633_v56 = vld [vmem:[%s3655_s1 + $0x68] sm:$0xf]  ;;  %v2409_v50 = vld [vmem:[%s3655_s1 + $0x3ec] sm:$0xf] }
  0x3f   :  { %915 = vmatpush.bf16.msrb.mxu3 %v1982_v61  ;;  %v2299_v57 = vld [vmem:[%s3655_s1 + $0x74] sm:$0xf0]  ;;  %v1761_v58 = vld [vmem:[%s3655_s1 + $0x168] sm:$0xf]  ;;  %v2034_v59 = vor.u32 %v2399_v52, %v2033_v51  ;;  %v2083_v51 = vld [vmem:[%s3655_s1 + $0x3f8] sm:$0xf0] }
  0x40   :  { %877 = vmatpush.bf16.msrb.mxu0 %v1582_v4  ;;  %v2331_v60 = vld [vmem:[%s3655_s1 + $0x174] sm:$0xf0]  ;;  %v1889_v61 = vld [vmem:[%s3655_s1 + $0x268] sm:$0xf]  ;;  %v1634_v1 = vor.u32 %v2299_v57, %v1633_v56  ;;  %v2309_v56 = vld [vmem:[%s3655_s1 + $0xcc] sm:$0xf] }
  0x41   :  { %890 = vmatpush.bf16.msrb.mxu1 %v1710_v8  ;;  %v2363_v62 = vld [vmem:[%s3655_s1 + $0x274] sm:$0xf0]  ;;  %v2017_v63 = vld [vmem:[%s3655_s1 + $0x368] sm:$0xf]  ;;  %v1762_v2 = vor.u32 %v2331_v60, %v1761_v58  ;;  %v1683_v57 = vld [vmem:[%s3655_s1 + $0xd8] sm:$0xf0] }
  0x42   :  { %903 = vmatpush.bf16.msrb.mxu2 %v1838_v9  ;;  %v2395_v0 = vld [vmem:[%s3655_s1 + $0x374] sm:$0xf0]  ;;  %v1890_v3 = vor.u32 %v2363_v62, %v1889_v61  ;;  %v1617_v4 = vld [vmem:[%s3655_s1 + $0x48] sm:$0xf]  ;;  %v2341_v58 = vld [vmem:[%s3655_s1 + $0x1cc] sm:$0xf] }
  0x43   :  { %916 = vmatpush.bf16.msrb.mxu3 %v1966_v12  ;;  %878 = vmatmul.bf16.vlgmr.msrb.gmra.mxu0 %v2865_v14  ;;  %v2295_v5 = vld [vmem:[%s3655_s1 + $0x54] sm:$0xf0]  ;;  %v1745_v6 = vld [vmem:[%s3655_s1 + $0x148] sm:$0xf]  ;;  %v2018_v7 = vor.u32 %v2395_v0, %v2017_v63  ;;  %v1811_v60 = vld [vmem:[%s3655_s1 + $0x1d8] sm:$0xf0] }
  0x44   :  { %922 = vmatpush.bf16.msra.mxu0 %v1698_v15  ;;  %891 = vmatmul.bf16.vlgmr.msrb.gmra.mxu1 %v2870_v17  ;;  %v2327_v8 = vld [vmem:[%s3655_s1 + $0x154] sm:$0xf0]  ;;  %v1873_v9 = vld [vmem:[%s3655_s1 + $0x248] sm:$0xf]  ;;  %v1618_v15 = vor.u32 %v2295_v5, %v1617_v4  ;;  %v2373_v61 = vld [vmem:[%s3655_s1 + $0x2cc] sm:$0xf] }
  0x45   :  { %935 = vmatpush.bf16.msra.mxu1 %v1826_v18  ;;  %904 = vmatmul.bf16.vlgmr.msrb.gmra.mxu2 %v2863_v13  ;;  %v2359_v10 = vld [vmem:[%s3655_s1 + $0x254] sm:$0xf0]  ;;  %v2001_v11 = vld [vmem:[%s3655_s1 + $0x348] sm:$0xf]  ;;  %v1746_v18 = vor.u32 %v2327_v8, %v1745_v6  ;;  %v1939_v62 = vld [vmem:[%s3655_s1 + $0x2d8] sm:$0xf0] }
  0x46   :  { %948 = vmatpush.bf16.msra.mxu2 %v1954_v19  ;;  %917 = vmatmul.bf16.vlgmr.msrb.gmra.mxu3 %v2868_v16  ;;  %v2391_v12 = vld [vmem:[%s3655_s1 + $0x354] sm:$0xf0]  ;;  %v1874_v19 = vor.u32 %v2359_v10, %v1873_v9  ;;  %v1601_v20 = vld [vmem:[%s3655_s1 + $0x28] sm:$0xf]  ;;  %v2405_v63 = vld [vmem:[%s3655_s1 + $0x3cc] sm:$0xf] }
  0x47   :  { %961 = vmatpush.bf16.msra.mxu3 %v2082_v23  ;;  %v2291_v21 = vld [vmem:[%s3655_s1 + $0x34] sm:$0xf0]  ;;  %v1729_v22 = vld [vmem:[%s3655_s1 + $0x128] sm:$0xf]  ;;  %v2002_v23 = vor.u32 %v2391_v12, %v2001_v11  ;;  %v2067_v0 = vld [vmem:[%s3655_s1 + $0x3d8] sm:$0xf0] }
  0x48   :  { %923 = vmatpush.bf16.msra.mxu0 %v1682_v29  ;;  %v2323_v24 = vld [vmem:[%s3655_s1 + $0x134] sm:$0xf0]  ;;  %v1857_v25 = vld [vmem:[%s3655_s1 + $0x228] sm:$0xf]  ;;  %v1602_v29 = vor.u32 %v2291_v21, %v1601_v20  ;;  %v2305_v4 = vld [vmem:[%s3655_s1 + $0xac] sm:$0xf] }
  0x49   :  { %936 = vmatpush.bf16.msra.mxu1 %v1810_v30  ;;  %v2355_v26 = vld [vmem:[%s3655_s1 + $0x234] sm:$0xf0]  ;;  %v1985_v27 = vld [vmem:[%s3655_s1 + $0x328] sm:$0xf]  ;;  %v1730_v32 = vor.u32 %v2323_v24, %v1729_v22  ;;  %v1667_v5 = vld [vmem:[%s3655_s1 + $0xb8] sm:$0xf0] }
  0x4a   :  { %949 = vmatpush.bf16.msra.mxu2 %v1938_v31  ;;  %v2387_v28 = vld [vmem:[%s3655_s1 + $0x334] sm:$0xf0]  ;;  %v1585_v30 = vld [vmem:[%s3655_s1 + $0x8] sm:$0xf]  ;;  %v1858_v33 = vor.u32 %v2355_v26, %v1857_v25  ;;  %v2337_v6 = vld [vmem:[%s3655_s1 + $0x1ac] sm:$0xf] }
  0x4b   :  { %962 = vmatpush.bf16.msra.mxu3 %v2066_v35  ;;  %v2287_v31 = vld [vmem:[%s3655_s1 + $0x14] sm:$0xf0]  ;;  %v1713_v34 = vld [vmem:[%s3655_s1 + $0x108] sm:$0xf]  ;;  %v1986_v37 = vor.u32 %v2387_v28, %v1985_v27  ;;  %v1795_v8 = vld [vmem:[%s3655_s1 + $0x1b8] sm:$0xf0] }
  0x4c   :  { %924 = vmatpush.bf16.msra.mxu0 %v1666_v41  ;;  %v2319_v35 = vld [vmem:[%s3655_s1 + $0x114] sm:$0xf0]  ;;  %v1841_v36 = vld [vmem:[%s3655_s1 + $0x208] sm:$0xf]  ;;  %v2313_v41 = vld [vmem:[%s3655_s1 + $0xec] sm:$0xf]  ;;  %v1586_v44 = vor.u32 %v2287_v31, %v1585_v30 }
  0x4d   :  { %937 = vmatpush.bf16.msra.mxu1 %v1794_v42  ;;  %v2351_v38 = vld [vmem:[%s3655_s1 + $0x214] sm:$0xf0]  ;;  %v1969_v39 = vld [vmem:[%s3655_s1 + $0x308] sm:$0xf]  ;;  %v1699_v42 = vld [vmem:[%s3655_s1 + $0xf8] sm:$0xf0]  ;;  %v1714_v48 = vor.u32 %v2319_v35, %v1713_v34 }
  0x4e   :  { %950 = vmatpush.bf16.msra.mxu2 %v1922_v43  ;;  %v2383_v40 = vld [vmem:[%s3655_s1 + $0x314] sm:$0xf0]  ;;  %v2345_v43 = vld [vmem:[%s3655_s1 + $0x1ec] sm:$0xf]  ;;  %v1842_v49 = vor.u32 %v2351_v38, %v1841_v36  ;;  %v1923_v10 = vld [vmem:[%s3655_s1 + $0x2b8] sm:$0xf0] }
  0x4f   :  { %963 = vmatpush.bf16.msra.mxu3 %v2050_v47  ;;  %v1955_v47 = vld [vmem:[%s3655_s1 + $0x2f8] sm:$0xf0]  ;;  %v1970_v52 = vor.u32 %v2383_v40, %v1969_v39  ;;  %v2369_v9 = vld [vmem:[%s3655_s1 + $0x2ac] sm:$0xf] }
  0x50   :  { %925 = vmatpush.bf16.msra.mxu0 %v1650_v53  ;;  %v1702_v53 = vor.u32 %v2313_v41, %v1699_v42  ;;  %v2401_v11 = vld [vmem:[%s3655_s1 + $0x3ac] sm:$0xf]  ;;  %v2051_v12 = vld [vmem:[%s3655_s1 + $0x3b8] sm:$0xf0] }
  0x51   :  { %938 = vmatpush.bf16.msra.mxu1 %v1778_v54  ;;  %v1830_v54 = vor.u32 %v2345_v43, %v1827_v45  ;;  %v2301_v20 = vld [vmem:[%s3655_s1 + $0x8c] sm:$0xf]  ;;  %v1651_v21 = vld [vmem:[%s3655_s1 + $0x98] sm:$0xf0] }
  0x52   :  { %951 = vmatpush.bf16.msra.mxu2 %v1906_v55  ;;  %v1958_v55 = vor.u32 %v2377_v46, %v1955_v47  ;;  %v2333_v22 = vld [vmem:[%s3655_s1 + $0x18c] sm:$0xf]  ;;  %v1779_v24 = vld [vmem:[%s3655_s1 + $0x198] sm:$0xf0] }
  0x53   :  { %964 = vmatpush.bf16.msra.mxu3 %v2034_v59  ;;  %v2086_v59 = vor.u32 %v2409_v50, %v2083_v51  ;;  %v2365_v25 = vld [vmem:[%s3655_s1 + $0x28c] sm:$0xf]  ;;  %v1907_v26 = vld [vmem:[%s3655_s1 + $0x298] sm:$0xf0]  ;;  %v1782_v30 = vor.u32 %v2333_v22, %v1779_v24 }
  0x54   :  { %926 = vmatpush.bf16.msra.mxu0 %v1634_v1  ;;  %v1686_v1 = vor.u32 %v2309_v56, %v1683_v57  ;;  %v2397_v27 = vld [vmem:[%s3655_s1 + $0x38c] sm:$0xf]  ;;  %v2035_v28 = vld [vmem:[%s3655_s1 + $0x398] sm:$0xf0]  ;;  %v1910_v31 = vor.u32 %v2365_v25, %v1907_v26 }
  0x55   :  { %939 = vmatpush.bf16.msra.mxu1 %v1762_v2  ;;  %v1814_v2 = vor.u32 %v2341_v58, %v1811_v60  ;;  %v2329_v34 = vld [vmem:[%s3655_s1 + $0x16c] sm:$0xf]  ;;  %v2038_v35 = vor.u32 %v2397_v27, %v2035_v28  ;;  %v1763_v36 = vld [vmem:[%s3655_s1 + $0x178] sm:$0xf0] }
  0x56   :  { %952 = vmatpush.bf16.msra.mxu2 %v1890_v3  ;;  %v1942_v3 = vor.u32 %v2373_v61, %v1939_v62  ;;  %v1891_v38 = vld [vmem:[%s3655_s1 + $0x278] sm:$0xf0]  ;;  %v2393_v39 = vld [vmem:[%s3655_s1 + $0x36c] sm:$0xf]  ;;  %v1766_v42 = vor.u32 %v2329_v34, %v1763_v36 }
  0x57   :  { %965 = vmatpush.bf16.msra.mxu3 %v2018_v7  ;;  %v2070_v7 = vor.u32 %v2405_v63, %v2067_v0  ;;  %v2019_v40 = vld [vmem:[%s3655_s1 + $0x378] sm:$0xf0]  ;;  %v2325_v46 = vld [vmem:[%s3655_s1 + $0x14c] sm:$0xf] }
  0x58   :  { %927 = vmatpush.bf16.msra.mxu0 %v1618_v15  ;;  %v1670_v15 = vor.u32 %v2305_v4, %v1667_v5  ;;  %v1619_v45 = vld [vmem:[%s3655_s1 + $0x58] sm:$0xf0]  ;;  %v2022_v47 = vor.u32 %v2393_v39, %v2019_v40  ;;  %v2389_v51 = vld [vmem:[%s3655_s1 + $0x34c] sm:$0xf] }
  0x59   :  { %940 = vmatpush.bf16.msra.mxu1 %v1746_v18  ;;  %v1798_v18 = vor.u32 %v2337_v6, %v1795_v8  ;;  %v1875_v50 = vld [vmem:[%s3655_s1 + $0x258] sm:$0xf0]  ;;  %v2289_v56 = vld [vmem:[%s3655_s1 + $0x2c] sm:$0xf] }
  0x5a   :  { %953 = vmatpush.bf16.msra.mxu2 %v1874_v19  ;;  %v1926_v19 = vor.u32 %v2369_v9, %v1923_v10  ;;  %v1603_v57 = vld [vmem:[%s3655_s1 + $0x38] sm:$0xf0]  ;;  %v2321_v58 = vld [vmem:[%s3655_s1 + $0x12c] sm:$0xf] }
  0x5b   :  { %966 = vmatpush.bf16.msra.mxu3 %v2002_v23  ;;  %v2054_v23 = vor.u32 %v2401_v11, %v2051_v12  ;;  %v1731_v60 = vld [vmem:[%s3655_s1 + $0x138] sm:$0xf0]  ;;  %v2353_v61 = vld [vmem:[%s3655_s1 + $0x22c] sm:$0xf] }
  0x5c   :  { %928 = vmatpush.bf16.msra.mxu0 %v1602_v29  ;;  %v1654_v29 = vor.u32 %v2301_v20, %v1651_v21  ;;  %v1859_v62 = vld [vmem:[%s3655_s1 + $0x238] sm:$0xf0]  ;;  %v2385_v63 = vld [vmem:[%s3655_s1 + $0x32c] sm:$0xf]  ;;  %v158_v21 = vld [vmem:[%s3663_s3] sm:$0xf] }
  0x5d   :  { %941 = vmatpush.bf16.msra.mxu1 %v1730_v32  ;;  %v2297_v32 = vld [vmem:[%s3655_s1 + $0x6c] sm:$0xf]  ;;  %v1987_v0 = vld [vmem:[%s3655_s1 + $0x338] sm:$0xf0]  ;;  %v160_v22 = vperm.slane %v158_v21, 0  ;;  %s3375_s3 = smov 0  }
  0x5e   :  { %954 = vmatpush.bf16.msra.mxu2 %v1858_v33  ;;  %v1635_v33 = vld [vmem:[%s3655_s1 + $0x78] sm:$0xf0]  ;;  %v2285_v4 = vld [vmem:[%s3655_s1 + $0xc] sm:$0xf] }
  0x5f   :  { %967 = vmatpush.bf16.msra.mxu3 %v1986_v37  ;;  %v2361_v37 = vld [vmem:[%s3655_s1 + $0x26c] sm:$0xf]  ;;  %v1638_v41 = vor.u32 %v2297_v32, %v1635_v33  ;;  %v1587_v5 = vld [vmem:[%s3655_s1 + $0x18] sm:$0xf0] }
  0x60   :  { %929 = vmatpush.bf16.msra.mxu0 %v1586_v44  ;;  %v1894_v43 = vor.u32 %v2361_v37, %v1891_v38  ;;  %v2293_v44 = vld [vmem:[%s3655_s1 + $0x4c] sm:$0xf]  ;;  %v1715_v8 = vld [vmem:[%s3655_s1 + $0x118] sm:$0xf0] }
  0x61   :  { %942 = vmatpush.bf16.msra.mxu1 %v1714_v48  ;;  %v1747_v48 = vld [vmem:[%s3655_s1 + $0x158] sm:$0xf0]  ;;  %v2317_v6 = vld [vmem:[%s3655_s1 + $0x10c] sm:$0xf] }
  0x62   :  { %955 = vmatpush.bf16.msra.mxu2 %v1842_v49  ;;  %v2357_v49 = vld [vmem:[%s3655_s1 + $0x24c] sm:$0xf]  ;;  %v1843_v10 = vld [vmem:[%s3655_s1 + $0x218] sm:$0xf0] }
  0x63   :  { %968 = vmatpush.bf16.msra.mxu3 %v1970_v52  ;;  %930 = vmatmul.bf16.vlgmr.msra.gmra.mxu0 %v2865_v14  ;;  %v2003_v52 = vld [vmem:[%s3655_s1 + $0x358] sm:$0xf0]  ;;  %v2349_v9 = vld [vmem:[%s3655_s1 + $0x20c] sm:$0xf] }
  0x64   :  { %974 = vmatpush.bf16.msrb.mxu0 %v1702_v53  ;;  %943 = vmatmul.bf16.vlgmr.msra.gmra.mxu1 %v2870_v17  ;;  %v1622_v53 = vor.u32 %v2293_v44, %v1619_v45  ;;  %v2381_v11 = vld [vmem:[%s3655_s1 + $0x30c] sm:$0xf]  ;;  %v1971_v12 = vld [vmem:[%s3655_s1 + $0x318] sm:$0xf0] }
  0x65   :  { %987 = vmatpush.bf16.msrb.mxu1 %v1830_v54  ;;  %956 = vmatmul.bf16.vlgmr.msra.gmra.mxu2 %v2863_v13  ;;  %v1750_v54 = vor.u32 %v2325_v46, %v1747_v48  ;;  %v1974_v20 = vor.u32 %v2381_v11, %v1971_v12  ;;  %v162_v48 = vperm.slane %v158_v21, 2  ;;  %v3371_v12 = vmov 0.0  }
  0x66   :  { %1000 = vmatpush.bf16.msrb.mxu2 %v1958_v55  ;;  %969 = vmatmul.bf16.vlgmr.msra.gmra.mxu3 %v2868_v16  ;;  %v1878_v55 = vor.u32 %v2357_v49, %v1875_v50 }
  0x67   :  { %1013 = vmatpush.bf16.msrb.mxu3 %v2086_v59  ;;  %v2006_v59 = vor.u32 %v2389_v51, %v2003_v52  ;;  %v163_v51 = vperm.slane %v158_v21, 3 }
  0x68   :  { %975 = vmatpush.bf16.msrb.mxu0 %v1686_v1  ;;  %v1606_v1 = vor.u32 %v2289_v56, %v1603_v57 }
  0x69   :  { %988 = vmatpush.bf16.msrb.mxu1 %v1814_v2  ;;  %v1734_v2 = vor.u32 %v2321_v58, %v1731_v60 }
  0x6a   :  { %1001 = vmatpush.bf16.msrb.mxu2 %v1942_v3  ;;  %v1862_v3 = vor.u32 %v2353_v61, %v1859_v62 }
  0x6b   :  { %1014 = vmatpush.bf16.msrb.mxu3 %v2070_v7  ;;  %v1990_v7 = vor.u32 %v2385_v63, %v1987_v0 }
  0x6c   :  { %976 = vmatpush.bf16.msrb.mxu0 %v1670_v15  ;;  %v1590_v15 = vor.u32 %v2285_v4, %v1587_v5 }
  0x6d   :  { %989 = vmatpush.bf16.msrb.mxu1 %v1798_v18  ;;  %v1718_v18 = vor.u32 %v2317_v6, %v1715_v8 }
  0x6e   :  { %1002 = vmatpush.bf16.msrb.mxu2 %v1926_v19  ;;  %v1846_v19 = vor.u32 %v2349_v9, %v1843_v10 }
  0x6f   :  { %1015 = vmatpush.bf16.msrb.mxu3 %v2054_v23 }
  0x70   :  { %977 = vmatpush.bf16.msrb.mxu0 %v1654_v29 }
  0x71   :  { %990 = vmatpush.bf16.msrb.mxu1 %v1782_v30 }
  0x72   :  { %1003 = vmatpush.bf16.msrb.mxu2 %v1910_v31 }
  0x73   :  { %1016 = vmatpush.bf16.msrb.mxu3 %v2038_v35 }
  0x74   :  { %978 = vmatpush.bf16.msrb.mxu0 %v1638_v41 }
  0x75   :  { %991 = vmatpush.bf16.msrb.mxu1 %v1766_v42 }
  0x76   :  { %1004 = vmatpush.bf16.msrb.mxu2 %v1894_v43 }
  0x77   :  { %1017 = vmatpush.bf16.msrb.mxu3 %v2022_v47  ;;  %v161_v47 = vperm.slane %v158_v21, 1 }
  0x78   :  { %979 = vmatpush.bf16.msrb.mxu0 %v1622_v53 }
  0x79   :  { %992 = vmatpush.bf16.msrb.mxu1 %v1750_v54 }
  0x7a   :  { %1005 = vmatpush.bf16.msrb.mxu2 %v1878_v55 }
  0x7b   :  { %1018 = vmatpush.bf16.msrb.mxu3 %v2006_v59 }
  0x7c   :  { %980 = vmatpush.bf16.msrb.mxu0 %v1606_v1 }
  0x7d   :  { %993 = vmatpush.bf16.msrb.mxu1 %v1734_v2 }
  0x7e   :  { %1006 = vmatpush.bf16.msrb.mxu2 %v1862_v3 }
  0x7f   :  { %1019 = vmatpush.bf16.msrb.mxu3 %v1990_v7 }
  0x80   :  { %981 = vmatpush.bf16.msrb.mxu0 %v1590_v15  ;;  %v3373_v15 = vmov 0.0  }
  0x81   :  { %994 = vmatpush.bf16.msrb.mxu1 %v1718_v18 }
  0x82   :  { %1007 = vmatpush.bf16.msrb.mxu2 %v1846_v19 }
  0x83   :  { %1020 = vmatpush.bf16.msrb.mxu3 %v1974_v20  ;;  %982 = vmatmul.bf16.vlgmr.msrb.gmra.mxu0 %v2865_v14 }
  0x84   :  { %995 = vmatmul.bf16.vlgmr.msrb.gmra.mxu1 %v2870_v17 }
  0x85   :  { %1008 = vmatmul.bf16.vlgmr.msrb.gmra.mxu2 %v2863_v13 }
  0x86   :  { %1021 = vmatmul.bf16.vlgmr.msrb.gmra.mxu3 %v2868_v16 }
  0xa7   :  { %v827_v23 = vpop.f32.mrf.mxu0 }
  0xa8   :  { %v828_v24 = vadd.f32 %v827_v23, %v160_v22 }
  0xab   :  { %v840_v25 = vpop.f32.mrf.mxu1 }
  0xac   :  { %v841_v26 = vadd.f32 %v840_v25, %v828_v24 }
  0xae   :  { %v853_v27 = vpop.f32.mrf.mxu2 }
  0xaf   :  { %v854_v28 = vadd.f32 %v853_v27, %v841_v26  ;;  %v866_v29 = vpop.f32.mrf.mxu3  ;;  %v829_v14 = vpop.f32.mrf.mxu0 }
  0xb1   :  { %v867_v30 = vadd.f32 %v866_v29, %v854_v28 }
  0xb3   :  { %v842_v31 = vpop.f32.mrf.mxu1 }
  0xb6   :  { %v855_v17 = vpop.f32.mrf.mxu2 }
  0xb7   :  { %v868_v32 = vpop.f32.mrf.mxu3 }
  0xc0   :  { %v879_v13 = vpop.f32.mrf.mxu0 }
  0xc1   :  { %v892_v33 = vpop.f32.mrf.mxu1  ;;  %v880_v49 = vadd.f32 %v879_v13, %v161_v47 }
  0xc3   :  { %v893_v52 = vadd.f32 %v892_v33, %v880_v49 }
  0xc8   :  { %v905_v16 = vpop.f32.mrf.mxu2  ;;  %v881_v35 = vpop.f32.mrf.mxu0 }
  0xc9   :  { %v918_v34 = vpop.f32.mrf.mxu3  ;;  %v894_v36 = vpop.f32.mrf.mxu1  ;;  %v906_v57 = vadd.f32 %v905_v16, %v893_v52 }
  0xcb   :  { %v919_v60 = vadd.f32 %v918_v34, %v906_v57 }
  0xcd   :  { %v1030_v3 = vrot.slane %v919_v60, 6 }
  0xcf   :  { %v1034_v7 = vsel %vm1033_vm0, %v867_v30, %v1030_v3 }
  0xd0   :  { %v907_v37 = vpop.f32.mrf.mxu2 }
  0xd1   :  { %v920_v38 = vpop.f32.mrf.mxu3 }
  0xe0   :  { %v931_v39 = vpop.f32.mrf.mxu0 }
  0xe1   :  { %v944_v40 = vpop.f32.mrf.mxu1  ;;  %v932_v50 = vadd.f32 %v931_v39, %v162_v48 }
  0xe3   :  { %v945_v53 = vadd.f32 %v944_v40, %v932_v50 }
  0xe8   :  { %v957_v41 = vpop.f32.mrf.mxu2  ;;  %v933_v43 = vpop.f32.mrf.mxu0 }
  0xe9   :  { %v970_v42 = vpop.f32.mrf.mxu3  ;;  %v946_v44 = vpop.f32.mrf.mxu1  ;;  %v958_v58 = vadd.f32 %v957_v41, %v945_v53 }
  0xeb   :  { %v971_v62 = vadd.f32 %v970_v42, %v958_v58 }
  0xed   :  { %v1031_v5 = vrot.slane %v971_v62, 4 }
  0xf0   :  { %v959_v45 = vpop.f32.mrf.mxu2 }
  0xf1   :  { %v972_v46 = vpop.f32.mrf.mxu3 }
 0x100   :  { %v983_v54 = vpop.f32.mrf.mxu0 }
 0x101   :  { %v984_v55 = vadd.f32 %v983_v54, %v163_v51  ;;  %v996_v56 = vpop.f32.mrf.mxu1 }
 0x103   :  { %v997_v59 = vadd.f32 %v996_v56, %v984_v55 }
 0x108   :  { %v1009_v61 = vpop.f32.mrf.mxu2  ;;  %v985_v1 = vpop.f32.mrf.mxu0 }
 0x109   :  { %v1010_v63 = vadd.f32 %v1009_v61, %v997_v59  ;;  %v1022_v0 = vpop.f32.mrf.mxu3  ;;  %v998_v2 = vpop.f32.mrf.mxu1 }
 0x10b   :  { %v1023_v4 = vadd.f32 %v1022_v0, %v1010_v63 }
 0x10d   :  { %v1032_v6 = vrot.slane %v1023_v4, 2 }
 0x10f   :  { %v1036_v8 = vsel %vm1035_vm1, %v1031_v5, %v1032_v6 }
 0x110   :  { %v1038_v9 = vsel %vm1037_vm2, %v1034_v7, %v1036_v8  ;;  %v1011_v10 = vpop.f32.mrf.mxu2 }
 0x111   :  { %1040 = vst [vmem:[#allocation2] sm:$0xff] %v1038_v9  ;;  %v1024_v11 = vpop.f32.mrf.mxu3 }
 0x112 LB: > { %v2203_v18 = vld [vmem:[%s3656_s2 + $0xe0] sm:$0xf]  ;;  %v2443_v19 = vld [vmem:[%s3656_s2 + $0xec] sm:$0xf0]  ;;  %v2441_v20 = vld [vmem:[%s3656_s2 + $0xe4] sm:$0xf]  ;;  %s1387_s13 = scalar_lea.vmem %s3661_s8, %s2525_s3  ;;  %s2525_s3 = sphi %s3375_s3, %s1046_s3   ;;  %v2521_v15 = vphi %v3373_v15, %v1386_v15   ;;  %v2517_v12 = vphi %v3371_v12, %v1384_v12  }
 0x113   : > { %v2204_v21 = vor.u32 %v2443_v19, %v2203_v18  ;;  %v2205_v22 = vld [vmem:[%s3656_s2 + $0xf0] sm:$0xf0]  ;;  %v2211_v23 = vld [vmem:[%s3656_s2 + $0xe8] sm:$0xf]  ;;  %v2444_v24 = vld [vmem:[%s3656_s2 + $0xf4] sm:$0xf0] }
 0x114   : > { %v2208_v25 = vor.u32 %v2441_v20, %v2205_v22  ;;  %v2212_v26 = vor.u32 %v2444_v24, %v2211_v23  ;;  %v2442_v27 = vld [vmem:[%s3656_s2 + $0xec] sm:$0xf]  ;;  %v2213_v28 = vld [vmem:[%s3656_s2 + $0xf8] sm:$0xf0]  ;;  %v2187_v29 = vld [vmem:[%s3656_s2 + $0xc0] sm:$0xf] }
 0x115   : > { %1251 = vmatpush.bf16.msra.mxu0 %v2204_v21  ;;  %v2216_v30 = vor.u32 %v2442_v27, %v2213_v28  ;;  %v2439_v14 = vld [vmem:[%s3656_s2 + $0xcc] sm:$0xf0]  ;;  %v2437_v31 = vld [vmem:[%s3656_s2 + $0xc4] sm:$0xf]  ;;  %v2189_v17 = vld [vmem:[%s3656_s2 + $0xd0] sm:$0xf0] }
 0x116   : > { %1264 = vmatpush.bf16.msra.mxu1 %v2208_v25  ;;  %1277 = vmatpush.bf16.msra.mxu2 %v2212_v26  ;;  %v2188_v32 = vor.u32 %v2439_v14, %v2187_v29  ;;  %v2192_v13 = vor.u32 %v2437_v31, %v2189_v17  ;;  %v2195_v33 = vld [vmem:[%s3656_s2 + $0xc8] sm:$0xf]  ;;  %v2440_v16 = vld [vmem:[%s3656_s2 + $0xd4] sm:$0xf0]  ;;  %v2438_v34 = vld [vmem:[%s3656_s2 + $0xcc] sm:$0xf] }
 0x117   : > { %1290 = vmatpush.bf16.msra.mxu3 %v2216_v30  ;;  %v2196_v35 = vor.u32 %v2440_v16, %v2195_v33  ;;  %v2197_v36 = vld [vmem:[%s3656_s2 + $0xd8] sm:$0xf0]  ;;  %v2171_v37 = vld [vmem:[%s3656_s2 + $0xa0] sm:$0xf]  ;;  %v2435_v38 = vld [vmem:[%s3656_s2 + $0xac] sm:$0xf0] }
 0x118   : > { %v2200_v39 = vor.u32 %v2438_v34, %v2197_v36  ;;  %v2433_v40 = vld [vmem:[%s3656_s2 + $0xa4] sm:$0xf]  ;;  %v2173_v41 = vld [vmem:[%s3656_s2 + $0xb0] sm:$0xf0]  ;;  %v2179_v42 = vld [vmem:[%s3656_s2 + $0xa8] sm:$0xf]  ;;  %v2172_v43 = vor.u32 %v2435_v38, %v2171_v37 }
 0x119   : > { %1252 = vmatpush.bf16.msra.mxu0 %v2188_v32  ;;  %v2436_v44 = vld [vmem:[%s3656_s2 + $0xb4] sm:$0xf0]  ;;  %v2434_v45 = vld [vmem:[%s3656_s2 + $0xac] sm:$0xf]  ;;  %v2181_v46 = vld [vmem:[%s3656_s2 + $0xb8] sm:$0xf0]  ;;  %v2176_v47 = vor.u32 %v2433_v40, %v2173_v41 }
 0x11a   : > { %1265 = vmatpush.bf16.msra.mxu1 %v2192_v13  ;;  %1278 = vmatpush.bf16.msra.mxu2 %v2196_v35  ;;  %v2180_v48 = vor.u32 %v2436_v44, %v2179_v42  ;;  %v2155_v49 = vld [vmem:[%s3656_s2 + $0x80] sm:$0xf]  ;;  %v2431_v50 = vld [vmem:[%s3656_s2 + $0x8c] sm:$0xf0]  ;;  %v2429_v51 = vld [vmem:[%s3656_s2 + $0x84] sm:$0xf]  ;;  %v2184_v52 = vor.u32 %v2434_v45, %v2181_v46 }
 0x11b   : > { %1291 = vmatpush.bf16.msra.mxu3 %v2200_v39  ;;  %v2157_v53 = vld [vmem:[%s3656_s2 + $0x90] sm:$0xf0]  ;;  %v2163_v54 = vld [vmem:[%s3656_s2 + $0x88] sm:$0xf]  ;;  %v2432_v55 = vld [vmem:[%s3656_s2 + $0x94] sm:$0xf0]  ;;  %v2156_v58 = vor.u32 %v2431_v50, %v2155_v49 }
 0x11c   : > { %v2430_v56 = vld [vmem:[%s3656_s2 + $0x8c] sm:$0xf]  ;;  %v2165_v57 = vld [vmem:[%s3656_s2 + $0x98] sm:$0xf0]  ;;  %v2160_v59 = vor.u32 %v2429_v51, %v2157_v53  ;;  %v2164_v60 = vor.u32 %v2432_v55, %v2163_v54  ;;  %v2139_v61 = vld [vmem:[%s3656_s2 + $0x60] sm:$0xf] }
 0x11d   : > { %1253 = vmatpush.bf16.msra.mxu0 %v2172_v43  ;;  %v2427_v62 = vld [vmem:[%s3656_s2 + $0x6c] sm:$0xf0]  ;;  %v2425_v63 = vld [vmem:[%s3656_s2 + $0x64] sm:$0xf]  ;;  %v2168_v0 = vor.u32 %v2430_v56, %v2165_v57  ;;  %v2141_v1 = vld [vmem:[%s3656_s2 + $0x70] sm:$0xf0] }
 0x11e   : > { %1266 = vmatpush.bf16.msra.mxu1 %v2176_v47  ;;  %1279 = vmatpush.bf16.msra.mxu2 %v2180_v48  ;;  %v2147_v2 = vld [vmem:[%s3656_s2 + $0x68] sm:$0xf]  ;;  %v2428_v3 = vld [vmem:[%s3656_s2 + $0x74] sm:$0xf0]  ;;  %v2426_v4 = vld [vmem:[%s3656_s2 + $0x6c] sm:$0xf]  ;;  %v2140_v6 = vor.u32 %v2427_v62, %v2139_v61  ;;  %v2144_v7 = vor.u32 %v2425_v63, %v2141_v1  ;;  %v1058_v48 = vpack.c.bf16 %v2521_v15, %v2521_v15 }
 0x11f   : > { %1292 = vmatpush.bf16.msra.mxu3 %v2184_v52  ;;  %v2149_v5 = vld [vmem:[%s3656_s2 + $0x78] sm:$0xf0]  ;;  %v2148_v8 = vor.u32 %v2428_v3, %v2147_v2  ;;  %v2123_v9 = vld [vmem:[%s3656_s2 + $0x40] sm:$0xf]  ;;  %v2423_v10 = vld [vmem:[%s3656_s2 + $0x4c] sm:$0xf0] }
 0x120   : > { %v2421_v11 = vld [vmem:[%s3656_s2 + $0x44] sm:$0xf]  ;;  %v2152_v18 = vor.u32 %v2426_v4, %v2149_v5  ;;  %v2125_v19 = vld [vmem:[%s3656_s2 + $0x50] sm:$0xf0]  ;;  %v2131_v20 = vld [vmem:[%s3656_s2 + $0x48] sm:$0xf]  ;;  %v2124_v24 = vor.u32 %v2423_v10, %v2123_v9 }
 0x121   : > { %1254 = vmatpush.bf16.msra.mxu0 %v2156_v58  ;;  %v2424_v21 = vld [vmem:[%s3656_s2 + $0x54] sm:$0xf0]  ;;  %v2422_v22 = vld [vmem:[%s3656_s2 + $0x4c] sm:$0xf]  ;;  %v2133_v23 = vld [vmem:[%s3656_s2 + $0x58] sm:$0xf0]  ;;  %v2128_v25 = vor.u32 %v2421_v11, %v2125_v19 }
 0x122   : > { %1267 = vmatpush.bf16.msra.mxu1 %v2160_v59  ;;  %1280 = vmatpush.bf16.msra.mxu2 %v2164_v60  ;;  %v2132_v26 = vor.u32 %v2424_v21, %v2131_v20  ;;  %v2107_v27 = vld [vmem:[%s3656_s2 + $0x20] sm:$0xf]  ;;  %v2419_v28 = vld [vmem:[%s3656_s2 + $0x2c] sm:$0xf0]  ;;  %v2417_v29 = vld [vmem:[%s3656_s2 + $0x24] sm:$0xf]  ;;  %v2136_v30 = vor.u32 %v2422_v22, %v2133_v23 }
 0x123   : > { %1293 = vmatpush.bf16.msra.mxu3 %v2168_v0  ;;  %v2109_v14 = vld [vmem:[%s3656_s2 + $0x30] sm:$0xf0]  ;;  %v2115_v31 = vld [vmem:[%s3656_s2 + $0x28] sm:$0xf]  ;;  %v2420_v17 = vld [vmem:[%s3656_s2 + $0x34] sm:$0xf0]  ;;  %v2108_v33 = vor.u32 %v2419_v28, %v2107_v27 }
 0x124   : > { %v2418_v32 = vld [vmem:[%s3656_s2 + $0x2c] sm:$0xf]  ;;  %v2117_v13 = vld [vmem:[%s3656_s2 + $0x38] sm:$0xf0]  ;;  %v2112_v16 = vor.u32 %v2417_v29, %v2109_v14  ;;  %v2116_v34 = vor.u32 %v2420_v17, %v2115_v31  ;;  %v2091_v35 = vld [vmem:[%s3656_s2] sm:$0xf] }
 0x125   : > { %1255 = vmatpush.bf16.msra.mxu0 %v2140_v6  ;;  %v2415_v36 = vld [vmem:[%s3656_s2 + $0xc] sm:$0xf0]  ;;  %v2413_v37 = vld [vmem:[%s3656_s2 + $0x4] sm:$0xf]  ;;  %v2120_v38 = vor.u32 %v2418_v32, %v2117_v13  ;;  %v2093_v39 = vld [vmem:[%s3656_s2 + $0x10] sm:$0xf0] }
 0x126   : > { %1268 = vmatpush.bf16.msra.mxu1 %v2144_v7  ;;  %1281 = vmatpush.bf16.msra.mxu2 %v2148_v8  ;;  %v2099_v40 = vld [vmem:[%s3656_s2 + $0x8] sm:$0xf]  ;;  %v2416_v41 = vld [vmem:[%s3656_s2 + $0x14] sm:$0xf0]  ;;  %v2414_v42 = vld [vmem:[%s3656_s2 + $0xc] sm:$0xf]  ;;  %v2092_v44 = vor.u32 %v2415_v36, %v2091_v35  ;;  %v2096_v45 = vor.u32 %v2413_v37, %v2093_v39 }
 0x127   : > { %1294 = vmatpush.bf16.msra.mxu3 %v2152_v18  ;;  %v2101_v43 = vld [vmem:[%s3656_s2 + $0x18] sm:$0xf0]  ;;  %v2100_v46 = vor.u32 %v2416_v41, %v2099_v40  ;;  %s1049_s28 = sshra.s32 %s2525_s3, 1  ;;  %s1052_s29 = sand.u32 1, %s2525_s3  ;;  %vm1310_vm3 = vcmask 1040384   ;;  %vm1312_vm4 = vcmask 1042434  }
 0x128   : > { %v2104_v47 = vor.u32 %v2414_v42, %v2101_v43  ;;  %s2412_s30 = sshll.u32 %s1049_s28, 3  ;;  %s1046_s3 = sadd.s32 1, %s2525_s3  }
 0x129   : > { %1256 = vmatpush.bf16.msra.mxu0 %v2124_v24  ;;  %s1055_s9 = sadd.s32 %s2412_s30, %s1052_s29  ;;  %p1043_p0 = scmp.ge.s32.totalorder %s1046_s3, 2  }
 0x12a   : > { %1269 = vmatpush.bf16.msra.mxu1 %v2128_v25  ;;  %1282 = vmatpush.bf16.msra.mxu2 %v2132_v26  ;;  %s1056_s10 = scalar_lea.vmem [#allocation2], %s1055_s9 }
 0x12b   : > { %1295 = vmatpush.bf16.msra.mxu3 %v2136_v30  ;;  %v1057_v58 = vld [vmem:[%s1056_s10] ss:$2 sm:$0xf] }
 0x12d   : > { %1257 = vmatpush.bf16.msra.mxu0 %v2108_v33 }
 0x12e   : > { %1270 = vmatpush.bf16.msra.mxu1 %v2112_v16  ;;  %1283 = vmatpush.bf16.msra.mxu2 %v2116_v34 }
 0x12f   : > { %1296 = vmatpush.bf16.msra.mxu3 %v2120_v38 }
 0x131   : > { %1258 = vmatpush.bf16.msra.mxu0 %v2092_v44 }
 0x132   : > { %1271 = vmatpush.bf16.msra.mxu1 %v2096_v45  ;;  %1284 = vmatpush.bf16.msra.mxu2 %v2100_v46 }
 0x133   : > { %1297 = vmatpush.bf16.msra.mxu3 %v2104_v47 }
 0x134   : > { %1259 = vmatmul.bf16.vlgmr.msra.gmra.mxu0 %v1058_v48 }
 0x135   : > { %1272 = vmatmul.bf16.vlgmr.msra.gmra.mxu1 %v1058_v48  ;;  %1285 = vmatmul.bf16.vlgmr.msra.gmra.mxu2 %v1058_v48 }
 0x136   : > { %1298 = vmatmul.bf16.vlgmr.msra.gmra.mxu3 %v1058_v48  ;;  %v2452_v48 = vld [vmem:[%s3657_s4 + $0x38] sm:$0xff] (%p1043_p0) }
 0x137   :  { %1459 = vmatpush.bf16.msra.mxu0 (%p1043_p0), %v2452_v48 }
 0x1b1   : > { %v1260_v49 = vpop.f32.mrf.mxu0 }
 0x1b2   : > { %v1273_v50 = vpop.f32.mrf.mxu1 }
 0x1b3   : > { %v1307_v51 = vrot.slane %v1273_v50, 7  ;;  %v2460_v50 = vld [vmem:[%s3659_s6 + $0x38] sm:$0xff] (%p1043_p0) }
 0x1b4   :  { %1542 = vmatpush.bf16.msra.mxu1 (%p1043_p0), %v2460_v50 }
 0x1b5   : > { %v1311_v55 = vsel %vm1310_vm3, %v1260_v49, %v1307_v51  ;;  %v2451_v49 = vld [vmem:[%s3657_s4 + $0x30] sm:$0xff] (%p1043_p0) }
 0x1b6   :  { %v2459_v51 = vld [vmem:[%s3659_s6 + $0x30] sm:$0xff] (%p1043_p0)  ;;  %1460 = vmatpush.bf16.msra.mxu0 (%p1043_p0), %v2451_v49 }
 0x1b8   : > { %v1286_v52 = vpop.f32.mrf.mxu2  ;;  %1543 = vmatpush.bf16.msra.mxu1 (%p1043_p0), %v2459_v51 }
 0x1b9   : > { %v1308_v53 = vrot.slane %v1286_v52, 6  ;;  %v1299_v54 = vpop.f32.mrf.mxu3  ;;  %v1262_v15 = vpop.f32.mrf.mxu0  ;;  %v2458_v52 = vld [vmem:[%s3659_s6 + $0x28] sm:$0xff] (%p1043_p0) }
 0x1ba   : > { %v1309_v56 = vrot.slane %v1299_v54, 5  ;;  %v1275_v57 = vpop.f32.mrf.mxu1  ;;  %v2457_v54 = vld [vmem:[%s3659_s6 + $0x20] sm:$0xff] (%p1043_p0) }
 0x1bb   :  { %v2455_v57 = vld [vmem:[%s3659_s6 + $0x10] sm:$0xff] (%p1043_p0) }
 0x1bc   : > { %v1313_v59 = vsel %vm1312_vm4, %v1308_v53, %v1309_v56  ;;  %v2449_v53 = vld [vmem:[%s3657_s4 + $0x20] sm:$0xff] (%p1043_p0)  ;;  %1544 = vmatpush.bf16.msra.mxu1 (%p1043_p0), %v2458_v52  ;;  %v2447_v56 = vld [vmem:[%s3657_s4 + $0x10] sm:$0xff] (%p1043_p0) }
 0x1bd   : > { %v1314_v60 = vsel %vm1033_vm0, %v1311_v55, %v1313_v59  ;;  %v2456_v55 = vld [vmem:[%s3659_s6 + $0x18] sm:$0xff] (%p1043_p0)  ;;  %v2445_v59 = vld [vmem:[%s3657_s4] sm:$0xff] (%p1043_p0) }
 0x1be   : > { %v1316_v61 = vadd.f32 %v1314_v60, %v1057_v58  ;;  %v2446_v58 = vld [vmem:[%s3657_s4 + $0x8] sm:$0xff] (%p1043_p0) }
 0x1c0   : > { %v2217_v62 = vmul.f32 -1.442695, %v1316_v61  ;;  %v1337_v63 = vrot.slane %v1316_v61, 1  ;;  %v1361_v0 = vrot.slane %v1316_v61, 3  ;;  %v1288_v1 = vpop.f32.mrf.mxu2  ;;  %v1358_v21 = vrot.slane %v1316_v61, 2  ;;  %1545 = vmatpush.bf16.msra.mxu1 (%p1043_p0), %v2457_v54 }
 0x1c1   : > { %v1301_v2 = vpop.f32.mrf.mxu3 }
 0x1c2   : > { %2485 = vpow2.f32 %v2217_v62  ;;  %v2218_v3 = vmul.f32 -1.442695, %v1337_v63  ;;  %v2219_v4 = vmul.f32 -1.442695, %v1361_v0  ;;  %v2454_v62 = vld [vmem:[%s3659_s6 + $0x8] sm:$0xff] (%p1043_p0)  ;;  %v2453_v63 = vld [vmem:[%s3659_s6] sm:$0xff] (%p1043_p0) }
 0x1c3   :  { %v2501_v0 = vld [vmem:[%s3658_s5] ss:$0 sm:$0xff] (%p1043_p0) }
 0x1c4   : > { %2487 = vpow2.f32 %v2218_v3  ;;  %1546 = vmatpush.bf16.msra.mxu1 (%p1043_p0), %v2456_v55 }
 0x1c5   : > { %2489 = vpow2.f32 %v2219_v4 }
 0x1c8   : > { %v2486_v5 = vpop.eup %2485  ;;  %1547 = vmatpush.bf16.msra.mxu1 (%p1043_p0), %v2455_v57 }
 0x1c9   : > { %v1320_v6 = vadd.f32 1.0, %v2486_v5 }
 0x1ca   : > { %v2488_v7 = vpop.eup %2487 }
 0x1cb   : > { %v2490_v8 = vpop.eup %2489  ;;  %2491 = vrcp.f32 %v1320_v6  ;;  %v1342_v9 = vadd.f32 1.0, %v2488_v7  ;;  %v1332_v25 = vand.u32 2147483648, %v1320_v6  ;;  %v1330_v27 = vand.u32 2147483647, %v1320_v6 }
 0x1cc   : > { %v1366_v10 = vadd.f32 1.0, %v2490_v8  ;;  %vm1326_vm6 = vweird.f32 %v1320_v6  ;;  %1548 = vmatpush.bf16.msra.mxu1 (%p1043_p0), %v2454_v62 }
 0x1cd   : > { %2493 = vrcp.f32 %v1342_v9  ;;  %v1354_v30 = vand.u32 2147483648, %v1342_v9  ;;  %v1352_v31 = vand.u32 2147483647, %v1342_v9  ;;  %v1333_v32 = vor.u32 1.1754944e-38, %v1332_v25 }
 0x1ce   : > { %2495 = vrcp.f32 %v1366_v10  ;;  %vm1331_vm9 = vcmp.eq.f32.partialorder %v1330_v27, 8.507059e+37  ;;  %vm1348_vm10 = vweird.f32 %v1342_v9  ;;  %v1378_v42 = vand.u32 2147483648, %v1366_v10 }
 0x1cf   : > { %2497 = vtanh.f32 %v1358_v21  ;;  %v1355_v34 = vor.u32 1.1754944e-38, %v1354_v30  ;;  %vm1353_vm12 = vcmp.eq.f32.partialorder %v1352_v31, 8.507059e+37  ;;  %vm1372_vm14 = vweird.f32 %v1366_v10 }
 0x1d0   : > { %v1376_v43 = vand.u32 2147483647, %v1366_v10  ;;  %v1379_v45 = vor.u32 1.1754944e-38, %v1378_v42  ;;  %1549 = vmatpush.bf16.msra.mxu1 (%p1043_p0), %v2453_v63 }
 0x1d1   : > { %v2492_v11 = vpop.eup %2491 }
 0x1d2   : > { %v1322_v18 = vmul.f32 %v2492_v11, %v1320_v6  ;;  %vm1327_vm5 = vweird.f32 %v2492_v11  ;;  %vm1377_vm1 = vcmp.eq.f32.partialorder %v1376_v43, 8.507059e+37  ;;  %v2502_v6 = vld [vmem:[%s3660_s7] ss:$0 sm:$0xff] (%p1043_p0) }
 0x1d3   : > { %v2494_v19 = vpop.eup %2493  ;;  %vm1328_vm7 = vmor %vm1326_vm6, %vm1327_vm5 }
 0x1d4   : > { %v1323_v20 = vsub.f32 1.0, %v1322_v18  ;;  %v2496_v22 = vpop.eup %2495  ;;  %v1344_v23 = vmul.f32 %v2494_v19, %v1342_v9  ;;  %vm1349_vm8 = vweird.f32 %v2494_v19 }
 0x1d5   : > { %v1368_v26 = vmul.f32 %v2496_v22, %v1366_v10  ;;  %vm1350_vm11 = vmor %vm1348_vm10, %vm1349_vm8  ;;  %v2498_v36 = vpop.eup %2497  ;;  %vm1373_vm13 = vweird.f32 %v2496_v22 }
 0x1d6   : > { %v1324_v24 = vmul.f32 %v2492_v11, %v1323_v20  ;;  %v1345_v28 = vsub.f32 1.0, %v1344_v23  ;;  %vm1374_vm15 = vmor %vm1372_vm14, %vm1373_vm13 }
 0x1d7   : > { %v1369_v13 = vsub.f32 1.0, %v1368_v26 }
 0x1d8   : > { %v1325_v29 = vadd.f32 %v2492_v11, %v1324_v24  ;;  %v1346_v14 = vmul.f32 %v2494_v19, %v1345_v28 }
 0x1d9   : > { %v1370_v38 = vmul.f32 %v2496_v22, %v1369_v13 }
 0x1da   : > { %v1329_v17 = vsel %vm1328_vm7, %v2492_v11, %v1325_v29  ;;  %v1347_v33 = vadd.f32 %v2494_v19, %v1346_v14 }
 0x1db   : > { %v1334_v16 = vsel %vm1331_vm9, %v1333_v32, %v1329_v17  ;;  %v1371_v41 = vadd.f32 %v2496_v22, %v1370_v38 }
 0x1dc   : > { %v1351_v35 = vsel %vm1350_vm11, %v2494_v19, %v1347_v33  ;;  %v1383_v40 = vmul.f32 %v2498_v36, %v1334_v16 }
 0x1dd   : > { %v1356_v37 = vsel %vm1353_vm12, %v1355_v34, %v1351_v35  ;;  %v1375_v44 = vsel %vm1374_vm15, %v2496_v22, %v1371_v41 }
 0x1de   : > { %v1382_v39 = vmul.f32 %v2517_v12, %v1356_v37  ;;  %v1380_v47 = vsel %vm1377_vm1, %v1379_v45, %v1375_v44 }
 0x1e0   : > { %v1384_v12 = vadd.f32 %v1383_v40, %v1382_v39  }
 0x1e2   : > { %2499 = vtanh.f32 %v1384_v12  ;;  %v2450_v12 = vld [vmem:[%s3657_s4 + $0x28] sm:$0xff] (%p1043_p0) }
 0x1e3   :  { %1461 = vmatpush.bf16.msra.mxu0 (%p1043_p0), %v2450_v12 }
 0x1e7   :  { %1045 = sbr.rel (!%p1043_p0) target bundleno = 274 (0x112), region = 61  ;;  %1462 = vmatpush.bf16.msra.mxu0 (%p1043_p0), %v2449_v53 }
 0x1e8   : > { %v2500_v46 = vpop.eup %2499 }
 0x1e9   : > { %v1386_v15 = vmul.f32 %v2500_v46, %v1380_v47  }
 0x1eb   : > { %1388 = vst [vmem:[%s1387_s13] sm:$0x1] %v1386_v15  ;;  %v2448_v15 = vld [vmem:[%s3657_s4 + $0x18] sm:$0xff] (%p1043_p0) }
 0x1ec   :  { %1463 = vmatpush.bf16.msra.mxu0 %v2448_v15 }
 0x1f0   :  { %1464 = vmatpush.bf16.msra.mxu0 %v2447_v56 }
 0x1f2   :  { %v1389_v60 = vld [vmem:[%s3661_s8] sm:$0x3] }
 0x1f3   :  { %v1390_v61 = vpack.c.bf16 %v1389_v60, %v1389_v60 }
 0x1f4   :  { %1465 = vmatpush.bf16.msra.mxu0 %v2446_v58 }
 0x1f8   :  { %1466 = vmatpush.bf16.msra.mxu0 %v2445_v59 }
 0x1fb   :  { %1467 = vmatmul.bf16.vlgmr.msra.gmra.mxu0 %v1390_v61 }
 0x278   :  { %v1468_v1 = vpop.f32.mrf.mxu0 }
 0x279   :  { %v1469_v2 = vadd.f32 %v2501_v0, %v1468_v1 }
 0x27b   :  { %v1472_v3 = vmax.f32 %v1469_v2, 0.0 }
 0x27d   :  { %v1473_v4 = vpack.c.bf16 %v1472_v3, %v1472_v3 }
 0x27f   :  { %1550 = vmatmul.bf16.vlgmr.msra.gmra.mxu1 %v1473_v4 }
 0x280   :  { %v1470_v5 = vpop.f32.mrf.mxu0 }
 0x2fc   :  { %v1551_v7 = vpop.f32.mrf.mxu1 }
 0x2fd   :  { %v1552_v8 = vadd.f32 %v2502_v6, %v1551_v7 }
 0x2ff   :  { %1555 = vst [vmem:[%s3661_s8] sm:$0x3] %v1552_v8 }
 0x304   :  { %v1553_v9 = vpop.f32.mrf.mxu1 }

</bundles_post_ra>
